<compile_context>
chip_gen: v7x
topology: tpu7x:2x2x1
jax: 0.10.0
libtpu: 0.0.40
codegen_flags: <defaults>
</compile_context>

<pallas_src>
import functools

import jax
import jax.numpy as jnp
from jax.experimental import pallas as pl
from jax.experimental.pallas import tpu as pltpu

EPS = 1e-5  # BatchNorm2d default eps


# ---------------------------------------------------------------------------
# trace-time helpers
# ---------------------------------------------------------------------------
def _bn_affine(mean, var, g, be):
    scale = jax.lax.rsqrt(jnp.maximum(var, 0.0) + EPS) * g
    return scale, be - mean * scale


def _full_stats(y, denom):
    s = jnp.sum(y, axis=0, keepdims=True)
    q = jnp.sum(y * y, axis=0, keepdims=True)
    mean = s / denom
    return mean, q / denom - mean * mean


def _masked_stats(y, mask, denom):
    s = jnp.sum(mask * y, axis=0, keepdims=True)
    q = jnp.sum(mask * (y * y), axis=0, keepdims=True)
    mean = s / denom
    return mean, q / denom - mean * mean


# ---------------------------------------------------------------------------
# the single fused kernel
# ---------------------------------------------------------------------------
def fused_kernel(xp_ref, w13b_ref, g3_ref, be3_ref, w56_ref, w78_ref,
                 g56_ref, be56_ref, g78_ref, be78_ref,
                 o_ref, dbuf_ref, *, n, h2, hp):
    rtot = n * hp * hp                 # rows of every padded flat buffer
    lead = ((hp + 1 + 7) // 8) * 8     # 8-aligned leading halo of the shift scratch
    tail = hp + 1
    p3 = float(n * h2 * h2)            # bn3 / bn7 / bn8 pixel count (h2^2 map)
    pf5 = float(rtot)                  # bn5 / bn6 pixel count ((h2+2)^2 map)

    # packed narrow input: lane0 = mp (valid h2xh2 interior), lane1 = m2 (sh1-sample
    # mask), lanes2-4 = stride-2 x samples, lanes5-7 = 0.
    xp = xp_ref[...]
    mp = xp[:, 0:1]

    # ---- conv3 (conv1+bn1 folded into w13b) + bn3 -------------------------------
    # w13b rows: [0 | sh1@w3 | (w1*sc1)@w3 | 0 0 0], so the m2*bias term is part of
    # the single K=8 matmul.  Non-interior rows of z are exactly 0.
    z = jnp.dot(xp, w13b_ref[...], preferred_element_type=jnp.float32)
    mean3, var3 = _full_stats(z, p3)
    sc3, sh3 = _bn_affine(mean3, var3, g3_ref[...], be3_ref[...])
    v7p = z * sc3 + mp * sh3           # zero ring (= conv5/6/7/8 padding) + v7 interior

    # ---- conv5 | conv6 (merged 1x1, pad 1) + bn5 | bn6 first-pass stats ----------
    y56 = jnp.dot(v7p, w56_ref[...], preferred_element_type=jnp.float32)
    mean56, var56 = _full_stats(y56, pf5)
    sc56, sh56 = _bn_affine(mean56, var56, g56_ref[...], be56_ref[...])

    # ---- conv7 | conv8 (merged 3x3, pad 1): ONE K=288 matmul ---------------------
    # Single copy of v7p with a zeroed halo; the 9 statically-offset taps are lane-
    # concatenated and contracted against w78 (288,256) in one MXU pass group.
    dbuf_ref[pl.ds(0, lead), :] = jnp.zeros((lead, 32), jnp.float32)
    dbuf_ref[pl.ds(lead + rtot, tail), :] = jnp.zeros((tail, 32), jnp.float32)
    dbuf_ref[pl.ds(lead, rtot), :] = v7p
    taps = []
    for kh in range(3):
        for kw in range(3):
            delta = (kh - 1) * hp + (kw - 1)
            taps.append(dbuf_ref[pl.ds(lead + delta, rtot), :])   # row r -> v7p[r+delta]
    xcat = jnp.concatenate(taps, axis=1)                          # (rtot, 288)
    acc = jnp.dot(xcat, w78_ref[...], preferred_element_type=jnp.float32)
    mean78, var78 = _masked_stats(acc, mp, p3)    # stats only over the h2 x h2 output
    sc78, sh78 = _bn_affine(mean78, var78, g78_ref[...], be78_ref[...])

    # ---- split the merged 128-lane halves ---------------------------------------
    g56 = g56_ref[...]; be56 = be56_ref[...]
    g78 = g78_ref[...]; be78 = be78_ref[...]
    sc5, sc6 = sc56[:, :128], sc56[:, 128:]
    sh5, sh6 = sh56[:, :128], sh56[:, 128:]
    sc7, sc8 = sc78[:, :128], sc78[:, 128:]
    sh7, sh8 = sh78[:, :128], sh78[:, 128:]
    g5, be5 = g56[:, :128], be56[:, :128]
    g6, be6 = g56[:, 128:], be56[:, 128:]
    g7, be7 = g78[:, :128], be78[:, :128]
    mean6, var6 = mean56[:, 128:], var56[:, 128:]
    mean8, var8 = mean78[:, 128:], var78[:, 128:]

    # ---- v17 = v13 + v15 (center aligned) and bn7 second pass --------------------
    # TODO(synk): torch's v13.add(v15) raises (36x36 vs 34x34 at spec size);
    # aligned on the common center region (the h2 x h2 interior).
    v17 = y56[:, :128] * sc5 + acc[:, :128] * sc7 + (sh5 + sh7)
    m20, va20 = _masked_stats(v17, mp, p3)        # only genuinely new reduction
    s20, h20 = _bn_affine(m20, va20, g7, be7)

    # ---- v18 = bn5(v14), v19 = bn6(v16): stats derived analytically --------------
    # v14 / v16 are per-channel affine transforms of populations whose stats we
    # already hold, so no re-reduction is needed; the affines are composed so the
    # output is formed directly from the matmul column halves.
    m18 = mean6 * sc6 + sh6
    va18 = var6 * sc6 * sc6
    s18, h18 = _bn_affine(m18, va18, g5, be5)
    a18 = sc6 * s18
    b18 = sh6 * s18 + h18

    m19 = mean8 * sc8 + sh8
    va19 = var8 * sc8 * sc8
    s19, h19 = _bn_affine(m19, va19, g6, be6)
    a19 = sc8 * s19
    b19 = sh8 * s19 + h19

    # ---- v22 = v20 / (v18 * v19): one fused traversal ----------------------------
    # Ring rows hold don't-care values and are cropped by the wrapper.
    denom = (y56[:, 128:] * a18 + b18) * (acc[:, 128:] * a19 + b19)
    r = pl.reciprocal(denom, approx=True)
    r = r * (2.0 - denom * r)            # one Newton refinement step
    o_ref[...] = (v17 * s20 + h20) * r


# ---------------------------------------------------------------------------
# wrapper: Gram-trick bn1 stats + weight folding, packed input, one pallas_call
# ---------------------------------------------------------------------------
def forward(x1, x2, params):
    # The x2 branch (conv2/bn2 -> conv4/bn4 -> v8) never reaches the output.
    del x2
    n, c, h, w = x1.shape
    assert c == 3 and h == w and h % 2 == 0
    h2 = h // 2 + 2                      # conv3 / conv7 / conv8 output spatial size
    hp = h2 + 2                          # conv5 / conv6 output spatial size
    rtot = n * hp * hp

    a = jnp.transpose(x1, (0, 2, 3, 1))  # NCHW -> NHWC
    x_flat = a.reshape(n * h * w, c)

    # conv1 + bn1 statistics via the 3x3 Gram trick (tiny XLA reduction); border
    # rows of conv1's padded output are exactly 0 with the bias dropped, so they
    # only enter through the pf1 denominator.
    w1, w3 = params['w1'], params['w3']
    g1, be1 = params['g1'], params['be1']
    pf1 = float(n * (h + 2) * (h + 2))
    colsum = jnp.sum(x_flat, axis=0, keepdims=True)          # (1, 3)
    gram = x_flat.T @ x_flat                                  # (3, 3)
    mean1 = (colsum @ w1) / pf1                               # (1, 8)
    ex2 = jnp.sum(w1 * (gram @ w1), axis=0, keepdims=True) / pf1
    var1 = jnp.maximum(ex2 - mean1 * mean1, 0.0)
    sc1 = jax.lax.rsqrt(var1 + EPS) * g1
    sh1 = be1 - mean1 * sc1
    # fold conv1*bn1 into conv3's weight / bias
    w13 = (w1 * sc1) @ w3                                     # (3, 32)
    b13 = sh1 @ w3                                            # (1, 32)
    w13b = jnp.concatenate(
        [jnp.zeros((1, 32), jnp.float32), b13, w13, jnp.zeros((3, 32), jnp.float32)],
        axis=0)                                               # (8, 32)

    # single packed narrow input on the padded hp grid:
    #   lane0 = mp (h2 x h2 interior), lane1 = m2 (samples carrying bn1's shift),
    #   lanes2-4 = stride-2 x samples, lanes5-7 = 0.
    x_str = a[:, ::2, ::2, :]
    xsp = jnp.pad(x_str, ((0, 0), (2, 2), (2, 2), (0, 0)))
    m2 = jnp.pad(jnp.ones((n, h2 - 1, h2 - 1, 1), jnp.float32),
                 ((0, 0), (2, 1), (2, 1), (0, 0)))
    mpad = jnp.pad(jnp.ones((n, h2, h2, 1), jnp.float32),
                   ((0, 0), (1, 1), (1, 1), (0, 0)))
    zeros3 = jnp.zeros((n, hp, hp, 3), jnp.float32)
    packed = jnp.concatenate([mpad, m2, xsp, zeros3], axis=-1).reshape(rtot, 8)

    lead = ((hp + 1 + 7) // 8) * 8
    vmem_limit = int(min(64 * 1024 * 1024, max(32 * 1024 * 1024, rtot * 16 * 1024)))

    in_specs = [pl.BlockSpec(memory_space=pltpu.MemorySpace.VMEM) for _ in range(10)]
    out_flat = pl.pallas_call(
        functools.partial(fused_kernel, n=n, h2=h2, hp=hp),
        out_shape=jax.ShapeDtypeStruct((rtot, 128), jnp.float32),
        in_specs=in_specs,
        out_specs=pl.BlockSpec(memory_space=pltpu.MemorySpace.VMEM),
        scratch_shapes=[pltpu.VMEM((lead + rtot + hp + 1, 32), jnp.float32)],
        compiler_params=pltpu.CompilerParams(vmem_limit_bytes=vmem_limit),
    )(packed, w13b, params['g3'], params['be3'], params['w56'], params['w78'],
      params['g56'], params['be56'], params['g78'], params['be78'])

    out = out_flat.reshape(n, hp, hp, 128)[:, 1:1 + h2, 1:1 + h2, :]
    return jnp.transpose(out, (0, 3, 1, 2))   # back to NCHW


# ---------------------------------------------------------------------------
# deterministic parameter init (packed for the fused kernel)
# ---------------------------------------------------------------------------
def init_params(key):
    ks = iter(jax.random.split(key, 24))

    def conv_w(cout, cin, k):
        return 0.1 * jax.random.normal(next(ks), (cout, cin, k, k), jnp.float32)

    def bn(ch):
        g = 1.0 + 0.05 * jax.random.normal(next(ks), (ch,), jnp.float32)
        be = 0.05 * jax.random.normal(next(ks), (ch,), jnp.float32)
        return g.reshape(1, ch), be.reshape(1, ch)

    # conv biases are omitted on purpose: they are exactly cancelled by the
    # training-mode BatchNorm that follows every conv on the live path.
    w1 = conv_w(8, 3, 1)
    w3 = conv_w(32, 8, 1)
    w5 = conv_w(128, 32, 1)
    w6 = conv_w(128, 32, 1)
    w7 = conv_w(128, 32, 3)
    w8 = conv_w(128, 32, 3)
    g1, be1 = bn(8)
    g3, be3 = bn(32)
    g5, be5 = bn(128)
    g6, be6 = bn(128)
    g7, be7 = bn(128)
    g8, be8 = bn(128)

    p = {}
    p['w1'] = w1[:, :, 0, 0].T                                            # (3, 8)
    p['w3'] = w3[:, :, 0, 0].T                                            # (8, 32)
    p['w56'] = jnp.concatenate([w5[:, :, 0, 0].T, w6[:, :, 0, 0].T], 1)   # (32, 256)
    taps = []
    for kh in range(3):
        for kw in range(3):
            taps.append(jnp.concatenate([w7[:, :, kh, kw].T,
                                         w8[:, :, kh, kw].T], axis=1))    # (32, 256)
    p['w78'] = jnp.concatenate(taps, axis=0)                              # (288, 256)
    p['g1'], p['be1'] = g1, be1
    p['g3'], p['be3'] = g3, be3
    p['g56'] = jnp.concatenate([g5, g6], axis=1)
    p['be56'] = jnp.concatenate([be5, be6], axis=1)
    p['g78'] = jnp.concatenate([g7, g8], axis=1)
    p['be78'] = jnp.concatenate([be7, be8], axis=1)
    return p


if __name__ == "__main__":
    key = jax.random.PRNGKey(0)
    kx1, kx2, kp = jax.random.split(key, 3)

    N, C, H, W = 1, 3, 16, 16                      # small shapes, same structure
    x1 = jax.random.normal(kx1, (N, C, H, W), jnp.float32)
    x2 = jax.random.normal(kx2, (N, C, H, W), jnp.float32)
    params = init_params(kp)

    out = jax.jit(forward)(x1, x2, params)
    out = jax.block_until_ready(out)
    assert out.shape == (N, 128, H // 2 + 2, W // 2 + 2), out.shape
    print("KERNEL_OK")
</pallas_src>

<mosaic_0001>
module attributes {stable_mosaic.version = 11 : i64} {
  func.func @fused_kernel(%arg0: memref<144x8xf32, #tpu.memory_space<vmem>>, %arg1: memref<8x32xf32, #tpu.memory_space<vmem>>, %arg2: memref<1x32xf32, #tpu.memory_space<vmem>>, %arg3: memref<1x32xf32, #tpu.memory_space<vmem>>, %arg4: memref<32x256xf32, #tpu.memory_space<vmem>>, %arg5: memref<288x256xf32, #tpu.memory_space<vmem>>, %arg6: memref<1x256xf32, #tpu.memory_space<vmem>>, %arg7: memref<1x256xf32, #tpu.memory_space<vmem>>, %arg8: memref<1x256xf32, #tpu.memory_space<vmem>>, %arg9: memref<1x256xf32, #tpu.memory_space<vmem>>, %arg10: memref<144x128xf32, #tpu.memory_space<vmem>>, %arg11: memref<173x32xf32, #tpu.memory_space<vmem>>) attributes {dimension_semantics = [], scalar_prefetch = 0 : i64, scratch_operands = 1 : i64, tpu.core_type = #tpu.core_type<tc>} {
    %c0 = arith.constant 0 : index
    %c0_0 = arith.constant 0 : index
    %0 = vector.load %arg0[%c0, %c0_0] : memref<144x8xf32, #tpu.memory_space<vmem>>, vector<144x8xf32>
    %1 = vector.extract_strided_slice %0 {offsets = [0, 0], sizes = [144, 1], strides = [1, 1]} : vector<144x8xf32> to vector<144x1xf32>
    %c0_1 = arith.constant 0 : index
    %c0_2 = arith.constant 0 : index
    %2 = vector.load %arg1[%c0_1, %c0_2] : memref<8x32xf32, #tpu.memory_space<vmem>>, vector<8x32xf32>
    %cst = arith.constant dense<0.000000e+00> : vector<144x32xf32>
    %3 = tpu.matmul %0, %2, %cst {dimension_numbers = #tpu.dot_dimension_numbers<[1], [0], [0], [1], [0, 0, 1, 1], [], []>} : vector<144x8xf32>, vector<8x32xf32>, vector<144x32xf32> -> vector<144x32xf32>
    %cst_3 = arith.constant dense<0.000000e+00> : vector<32xf32>
    %4 = vector.multi_reduction <add>, %3, %cst_3 [0] : vector<144x32xf32> to vector<32xf32>
    %5 = vector.shape_cast %4 : vector<32xf32> to vector<1x32xf32>
    %6 = arith.mulf %3, %3 : vector<144x32xf32>
    %cst_4 = arith.constant dense<0.000000e+00> : vector<32xf32>
    %7 = vector.multi_reduction <add>, %6, %cst_4 [0] : vector<144x32xf32> to vector<32xf32>
    %8 = vector.shape_cast %7 : vector<32xf32> to vector<1x32xf32>
    %cst_5 = arith.constant 1.000000e+02 : f32
    %9 = vector.broadcast %cst_5 : f32 to vector<1x32xf32>
    %10 = arith.divf %5, %9 : vector<1x32xf32>
    %cst_6 = arith.constant 1.000000e+02 : f32
    %11 = vector.broadcast %cst_6 : f32 to vector<1x32xf32>
    %12 = arith.divf %8, %11 : vector<1x32xf32>
    %13 = arith.mulf %10, %10 : vector<1x32xf32>
    %14 = arith.subf %12, %13 : vector<1x32xf32>
    %c0_7 = arith.constant 0 : index
    %c0_8 = arith.constant 0 : index
    %15 = vector.load %arg2[%c0_7, %c0_8] : memref<1x32xf32, #tpu.memory_space<vmem>>, vector<1x32xf32>
    %c0_9 = arith.constant 0 : index
    %c0_10 = arith.constant 0 : index
    %16 = vector.load %arg3[%c0_9, %c0_10] : memref<1x32xf32, #tpu.memory_space<vmem>>, vector<1x32xf32>
    %cst_11 = arith.constant 0.000000e+00 : f32
    %17 = vector.broadcast %cst_11 : f32 to vector<1x32xf32>
    %18 = arith.maximumf %14, %17 : vector<1x32xf32>
    %cst_12 = arith.constant 9.99999974E-6 : f32
    %19 = vector.broadcast %cst_12 : f32 to vector<1x32xf32>
    %20 = arith.addf %18, %19 : vector<1x32xf32>
    %21 = math.rsqrt %20 : vector<1x32xf32>
    %22 = arith.mulf %21, %15 : vector<1x32xf32>
    %23 = arith.mulf %10, %22 : vector<1x32xf32>
    %24 = arith.subf %16, %23 : vector<1x32xf32>
    %25 = vector.broadcast %22 : vector<1x32xf32> to vector<144x32xf32>
    %26 = arith.mulf %3, %25 : vector<144x32xf32>
    %27 = vector.broadcast %1 : vector<144x1xf32> to vector<144x32xf32>
    %28 = vector.broadcast %24 : vector<1x32xf32> to vector<144x32xf32>
    %29 = arith.mulf %27, %28 : vector<144x32xf32>
    %30 = arith.addf %26, %29 : vector<144x32xf32>
    %c0_13 = arith.constant 0 : index
    %c0_14 = arith.constant 0 : index
    %31 = vector.load %arg4[%c0_13, %c0_14] : memref<32x256xf32, #tpu.memory_space<vmem>>, vector<32x256xf32>
    %cst_15 = arith.constant dense<0.000000e+00> : vector<144x256xf32>
    %32 = tpu.matmul %30, %31, %cst_15 {dimension_numbers = #tpu.dot_dimension_numbers<[1], [0], [0], [1], [0, 0, 1, 1], [], []>} : vector<144x32xf32>, vector<32x256xf32>, vector<144x256xf32> -> vector<144x256xf32>
    %cst_16 = arith.constant dense<0.000000e+00> : vector<256xf32>
    %33 = vector.multi_reduction <add>, %32, %cst_16 [0] : vector<144x256xf32> to vector<256xf32>
    %34 = vector.shape_cast %33 : vector<256xf32> to vector<1x256xf32>
    %35 = arith.mulf %32, %32 : vector<144x256xf32>
    %cst_17 = arith.constant dense<0.000000e+00> : vector<256xf32>
    %36 = vector.multi_reduction <add>, %35, %cst_17 [0] : vector<144x256xf32> to vector<256xf32>
    %37 = vector.shape_cast %36 : vector<256xf32> to vector<1x256xf32>
    %cst_18 = arith.constant 1.440000e+02 : f32
    %38 = vector.broadcast %cst_18 : f32 to vector<1x256xf32>
    %39 = arith.divf %34, %38 : vector<1x256xf32>
    %cst_19 = arith.constant 1.440000e+02 : f32
    %40 = vector.broadcast %cst_19 : f32 to vector<1x256xf32>
    %41 = arith.divf %37, %40 : vector<1x256xf32>
    %42 = arith.mulf %39, %39 : vector<1x256xf32>
    %43 = arith.subf %41, %42 : vector<1x256xf32>
    %c0_20 = arith.constant 0 : index
    %c0_21 = arith.constant 0 : index
    %44 = vector.load %arg6[%c0_20, %c0_21] : memref<1x256xf32, #tpu.memory_space<vmem>>, vector<1x256xf32>
    %c0_22 = arith.constant 0 : index
    %c0_23 = arith.constant 0 : index
    %45 = vector.load %arg7[%c0_22, %c0_23] : memref<1x256xf32, #tpu.memory_space<vmem>>, vector<1x256xf32>
    %cst_24 = arith.constant 0.000000e+00 : f32
    %46 = vector.broadcast %cst_24 : f32 to vector<1x256xf32>
    %47 = arith.maximumf %43, %46 : vector<1x256xf32>
    %cst_25 = arith.constant 9.99999974E-6 : f32
    %48 = vector.broadcast %cst_25 : f32 to vector<1x256xf32>
    %49 = arith.addf %47, %48 : vector<1x256xf32>
    %50 = math.rsqrt %49 : vector<1x256xf32>
    %51 = arith.mulf %50, %44 : vector<1x256xf32>
    %52 = arith.mulf %39, %51 : vector<1x256xf32>
    %53 = arith.subf %45, %52 : vector<1x256xf32>
    %cst_26 = arith.constant 0.000000e+00 : f32
    %54 = vector.broadcast %cst_26 : f32 to vector<16x32xf32>
    %c0_27 = arith.constant 0 : index
    %c0_28 = arith.constant 0 : index
    %55 = vector.load %arg11[%c0_27, %c0_28] : memref<173x32xf32, #tpu.memory_space<vmem>>, vector<16x32xf32>
    tpu.vector_store %arg11[%c0_27, %c0_28], %54 {strides = array<i32>} : memref<173x32xf32, #tpu.memory_space<vmem>>, vector<16x32xf32>,
    %cst_29 = arith.constant 0.000000e+00 : f32
    %56 = vector.broadcast %cst_29 : f32 to vector<13x32xf32>
    %c160 = arith.constant 160 : index
    %c0_30 = arith.constant 0 : index
    %57 = vector.load %arg11[%c160, %c0_30] : memref<173x32xf32, #tpu.memory_space<vmem>>, vector<13x32xf32>
    tpu.vector_store %arg11[%c160, %c0_30], %56 {strides = array<i32>} : memref<173x32xf32, #tpu.memory_space<vmem>>, vector<13x32xf32>,
    %c16 = arith.constant 16 : index
    %c0_31 = arith.constant 0 : index
    %58 = vector.load %arg11[%c16, %c0_31] : memref<173x32xf32, #tpu.memory_space<vmem>>, vector<144x32xf32>
    tpu.vector_store %arg11[%c16, %c0_31], %30 {strides = array<i32>} : memref<173x32xf32, #tpu.memory_space<vmem>>, vector<144x32xf32>,
    %c3 = arith.constant 3 : index
    %c0_32 = arith.constant 0 : index
    %59 = vector.load %arg11[%c3, %c0_32] : memref<173x32xf32, #tpu.memory_space<vmem>>, vector<144x32xf32>
    %c4 = arith.constant 4 : index
    %c0_33 = arith.constant 0 : index
    %60 = vector.load %arg11[%c4, %c0_33] : memref<173x32xf32, #tpu.memory_space<vmem>>, vector<144x32xf32>
    %c5 = arith.constant 5 : index
    %c0_34 = arith.constant 0 : index
    %61 = vector.load %arg11[%c5, %c0_34] : memref<173x32xf32, #tpu.memory_space<vmem>>, vector<144x32xf32>
    %c15 = arith.constant 15 : index
    %c0_35 = arith.constant 0 : index
    %62 = vector.load %arg11[%c15, %c0_35] : memref<173x32xf32, #tpu.memory_space<vmem>>, vector<144x32xf32>
    %c16_36 = arith.constant 16 : index
    %c0_37 = arith.constant 0 : index
    %63 = vector.load %arg11[%c16_36, %c0_37] : memref<173x32xf32, #tpu.memory_space<vmem>>, vector<144x32xf32>
    %c17 = arith.constant 17 : index
    %c0_38 = arith.constant 0 : index
    %64 = vector.load %arg11[%c17, %c0_38] : memref<173x32xf32, #tpu.memory_space<vmem>>, vector<144x32xf32>
    %c27 = arith.constant 27 : index
    %c0_39 = arith.constant 0 : index
    %65 = vector.load %arg11[%c27, %c0_39] : memref<173x32xf32, #tpu.memory_space<vmem>>, vector<144x32xf32>
    %c28 = arith.constant 28 : index
    %c0_40 = arith.constant 0 : index
    %66 = vector.load %arg11[%c28, %c0_40] : memref<173x32xf32, #tpu.memory_space<vmem>>, vector<144x32xf32>
    %c29 = arith.constant 29 : index
    %c0_41 = arith.constant 0 : index
    %67 = vector.load %arg11[%c29, %c0_41] : memref<173x32xf32, #tpu.memory_space<vmem>>, vector<144x32xf32>
    %68 = tpu.concatenate %59, %60, %61, %62, %63, %64, %65, %66, %67 in 1 : vector<144x32xf32>, vector<144x32xf32>, vector<144x32xf32>, vector<144x32xf32>, vector<144x32xf32>, vector<144x32xf32>, vector<144x32xf32>, vector<144x32xf32>, vector<144x32xf32> -> vector<144x288xf32>
    %c0_42 = arith.constant 0 : index
    %c0_43 = arith.constant 0 : index
    %69 = vector.load %arg5[%c0_42, %c0_43] : memref<288x256xf32, #tpu.memory_space<vmem>>, vector<288x256xf32>
    %cst_44 = arith.constant dense<0.000000e+00> : vector<144x256xf32>
    %70 = tpu.matmul %68, %69, %cst_44 {dimension_numbers = #tpu.dot_dimension_numbers<[1], [0], [0], [1], [0, 0, 1, 1], [], []>} : vector<144x288xf32>, vector<288x256xf32>, vector<144x256xf32> -> vector<144x256xf32>
    %71 = vector.broadcast %1 : vector<144x1xf32> to vector<144x256xf32>
    %72 = arith.mulf %71, %70 : vector<144x256xf32>
    %cst_45 = arith.constant dense<0.000000e+00> : vector<256xf32>
    %73 = vector.multi_reduction <add>, %72, %cst_45 [0] : vector<144x256xf32> to vector<256xf32>
    %74 = vector.shape_cast %73 : vector<256xf32> to vector<1x256xf32>
    %75 = arith.mulf %70, %70 : vector<144x256xf32>
    %76 = vector.broadcast %1 : vector<144x1xf32> to vector<144x256xf32>
    %77 = arith.mulf %76, %75 : vector<144x256xf32>
    %cst_46 = arith.constant dense<0.000000e+00> : vector<256xf32>
    %78 = vector.multi_reduction <add>, %77, %cst_46 [0] : vector<144x256xf32> to vector<256xf32>
    %79 = vector.shape_cast %78 : vector<256xf32> to vector<1x256xf32>
    %cst_47 = arith.constant 1.000000e+02 : f32
    %80 = vector.broadcast %cst_47 : f32 to vector<1x256xf32>
    %81 = arith.divf %74, %80 : vector<1x256xf32>
    %cst_48 = arith.constant 1.000000e+02 : f32
    %82 = vector.broadcast %cst_48 : f32 to vector<1x256xf32>
    %83 = arith.divf %79, %82 : vector<1x256xf32>
    %84 = arith.mulf %81, %81 : vector<1x256xf32>
    %85 = arith.subf %83, %84 : vector<1x256xf32>
    %c0_49 = arith.constant 0 : index
    %c0_50 = arith.constant 0 : index
    %86 = vector.load %arg8[%c0_49, %c0_50] : memref<1x256xf32, #tpu.memory_space<vmem>>, vector<1x256xf32>
    %c0_51 = arith.constant 0 : index
    %c0_52 = arith.constant 0 : index
    %87 = vector.load %arg9[%c0_51, %c0_52] : memref<1x256xf32, #tpu.memory_space<vmem>>, vector<1x256xf32>
    %cst_53 = arith.constant 0.000000e+00 : f32
    %88 = vector.broadcast %cst_53 : f32 to vector<1x256xf32>
    %89 = arith.maximumf %85, %88 : vector<1x256xf32>
    %cst_54 = arith.constant 9.99999974E-6 : f32
    %90 = vector.broadcast %cst_54 : f32 to vector<1x256xf32>
    %91 = arith.addf %89, %90 : vector<1x256xf32>
    %92 = math.rsqrt %91 : vector<1x256xf32>
    %93 = arith.mulf %92, %86 : vector<1x256xf32>
    %94 = arith.mulf %81, %93 : vector<1x256xf32>
    %95 = arith.subf %87, %94 : vector<1x256xf32>
    %c0_55 = arith.constant 0 : index
    %c0_56 = arith.constant 0 : index
    %96 = vector.load %arg6[%c0_55, %c0_56] : memref<1x256xf32, #tpu.memory_space<vmem>>, vector<1x256xf32>
    %c0_57 = arith.constant 0 : index
    %c0_58 = arith.constant 0 : index
    %97 = vector.load %arg7[%c0_57, %c0_58] : memref<1x256xf32, #tpu.memory_space<vmem>>, vector<1x256xf32>
    %c0_59 = arith.constant 0 : index
    %c0_60 = arith.constant 0 : index
    %98 = vector.load %arg8[%c0_59, %c0_60] : memref<1x256xf32, #tpu.memory_space<vmem>>, vector<1x256xf32>
    %c0_61 = arith.constant 0 : index
    %c0_62 = arith.constant 0 : index
    %99 = vector.load %arg9[%c0_61, %c0_62] : memref<1x256xf32, #tpu.memory_space<vmem>>, vector<1x256xf32>
    %100 = vector.extract_strided_slice %51 {offsets = [0, 0], sizes = [1, 128], strides = [1, 1]} : vector<1x256xf32> to vector<1x128xf32>
    %101 = vector.extract_strided_slice %51 {offsets = [0, 128], sizes = [1, 128], strides = [1, 1]} : vector<1x256xf32> to vector<1x128xf32>
    %102 = vector.extract_strided_slice %53 {offsets = [0, 0], sizes = [1, 128], strides = [1, 1]} : vector<1x256xf32> to vector<1x128xf32>
    %103 = vector.extract_strided_slice %53 {offsets = [0, 128], sizes = [1, 128], strides = [1, 1]} : vector<1x256xf32> to vector<1x128xf32>
    %104 = vector.extract_strided_slice %93 {offsets = [0, 0], sizes = [1, 128], strides = [1, 1]} : vector<1x256xf32> to vector<1x128xf32>
    %105 = vector.extract_strided_slice %93 {offsets = [0, 128], sizes = [1, 128], strides = [1, 1]} : vector<1x256xf32> to vector<1x128xf32>
    %106 = vector.extract_strided_slice %95 {offsets = [0, 0], sizes = [1, 128], strides = [1, 1]} : vector<1x256xf32> to vector<1x128xf32>
    %107 = vector.extract_strided_slice %95 {offsets = [0, 128], sizes = [1, 128], strides = [1, 1]} : vector<1x256xf32> to vector<1x128xf32>
    %108 = vector.extract_strided_slice %96 {offsets = [0, 0], sizes = [1, 128], strides = [1, 1]} : vector<1x256xf32> to vector<1x128xf32>
    %109 = vector.extract_strided_slice %97 {offsets = [0, 0], sizes = [1, 128], strides = [1, 1]} : vector<1x256xf32> to vector<1x128xf32>
    %110 = vector.extract_strided_slice %96 {offsets = [0, 128], sizes = [1, 128], strides = [1, 1]} : vector<1x256xf32> to vector<1x128xf32>
    %111 = vector.extract_strided_slice %97 {offsets = [0, 128], sizes = [1, 128], strides = [1, 1]} : vector<1x256xf32> to vector<1x128xf32>
    %112 = vector.extract_strided_slice %98 {offsets = [0, 0], sizes = [1, 128], strides = [1, 1]} : vector<1x256xf32> to vector<1x128xf32>
    %113 = vector.extract_strided_slice %99 {offsets = [0, 0], sizes = [1, 128], strides = [1, 1]} : vector<1x256xf32> to vector<1x128xf32>
    %114 = vector.extract_strided_slice %39 {offsets = [0, 128], sizes = [1, 128], strides = [1, 1]} : vector<1x256xf32> to vector<1x128xf32>
    %115 = vector.extract_strided_slice %43 {offsets = [0, 128], sizes = [1, 128], strides = [1, 1]} : vector<1x256xf32> to vector<1x128xf32>
    %116 = vector.extract_strided_slice %81 {offsets = [0, 128], sizes = [1, 128], strides = [1, 1]} : vector<1x256xf32> to vector<1x128xf32>
    %117 = vector.extract_strided_slice %85 {offsets = [0, 128], sizes = [1, 128], strides = [1, 1]} : vector<1x256xf32> to vector<1x128xf32>
    %118 = vector.extract_strided_slice %32 {offsets = [0, 0], sizes = [144, 128], strides = [1, 1]} : vector<144x256xf32> to vector<144x128xf32>
    %119 = vector.broadcast %100 : vector<1x128xf32> to vector<144x128xf32>
    %120 = arith.mulf %118, %119 : vector<144x128xf32>
    %121 = vector.extract_strided_slice %70 {offsets = [0, 0], sizes = [144, 128], strides = [1, 1]} : vector<144x256xf32> to vector<144x128xf32>
    %122 = vector.broadcast %104 : vector<1x128xf32> to vector<144x128xf32>
    %123 = arith.mulf %121, %122 : vector<144x128xf32>
    %124 = arith.addf %120, %123 : vector<144x128xf32>
    %125 = arith.addf %102, %106 : vector<1x128xf32>
    %126 = vector.broadcast %125 : vector<1x128xf32> to vector<144x128xf32>
    %127 = arith.addf %124, %126 : vector<144x128xf32>
    %128 = vector.broadcast %1 : vector<144x1xf32> to vector<144x128xf32>
    %129 = arith.mulf %128, %127 : vector<144x128xf32>
    %cst_63 = arith.constant dense<0.000000e+00> : vector<128xf32>
    %130 = vector.multi_reduction <add>, %129, %cst_63 [0] : vector<144x128xf32> to vector<128xf32>
    %131 = vector.shape_cast %130 : vector<128xf32> to vector<1x128xf32>
    %132 = arith.mulf %127, %127 : vector<144x128xf32>
    %133 = vector.broadcast %1 : vector<144x1xf32> to vector<144x128xf32>
    %134 = arith.mulf %133, %132 : vector<144x128xf32>
    %cst_64 = arith.constant dense<0.000000e+00> : vector<128xf32>
    %135 = vector.multi_reduction <add>, %134, %cst_64 [0] : vector<144x128xf32> to vector<128xf32>
    %136 = vector.shape_cast %135 : vector<128xf32> to vector<1x128xf32>
    %cst_65 = arith.constant 1.000000e+02 : f32
    %137 = vector.broadcast %cst_65 : f32 to vector<1x128xf32>
    %138 = arith.divf %131, %137 : vector<1x128xf32>
    %cst_66 = arith.constant 1.000000e+02 : f32
    %139 = vector.broadcast %cst_66 : f32 to vector<1x128xf32>
    %140 = arith.divf %136, %139 : vector<1x128xf32>
    %141 = arith.mulf %138, %138 : vector<1x128xf32>
    %142 = arith.subf %140, %141 : vector<1x128xf32>
    %cst_67 = arith.constant 0.000000e+00 : f32
    %143 = vector.broadcast %cst_67 : f32 to vector<1x128xf32>
    %144 = arith.maximumf %142, %143 : vector<1x128xf32>
    %cst_68 = arith.constant 9.99999974E-6 : f32
    %145 = vector.broadcast %cst_68 : f32 to vector<1x128xf32>
    %146 = arith.addf %144, %145 : vector<1x128xf32>
    %147 = math.rsqrt %146 : vector<1x128xf32>
    %148 = arith.mulf %147, %112 : vector<1x128xf32>
    %149 = arith.mulf %138, %148 : vector<1x128xf32>
    %150 = arith.subf %113, %149 : vector<1x128xf32>
    %151 = arith.mulf %114, %101 : vector<1x128xf32>
    %152 = arith.addf %151, %103 : vector<1x128xf32>
    %153 = arith.mulf %115, %101 : vector<1x128xf32>
    %154 = arith.mulf %153, %101 : vector<1x128xf32>
    %cst_69 = arith.constant 0.000000e+00 : f32
    %155 = vector.broadcast %cst_69 : f32 to vector<1x128xf32>
    %156 = arith.maximumf %154, %155 : vector<1x128xf32>
    %cst_70 = arith.constant 9.99999974E-6 : f32
    %157 = vector.broadcast %cst_70 : f32 to vector<1x128xf32>
    %158 = arith.addf %156, %157 : vector<1x128xf32>
    %159 = math.rsqrt %158 : vector<1x128xf32>
    %160 = arith.mulf %159, %108 : vector<1x128xf32>
    %161 = arith.mulf %152, %160 : vector<1x128xf32>
    %162 = arith.subf %109, %161 : vector<1x128xf32>
    %163 = arith.mulf %101, %160 : vector<1x128xf32>
    %164 = arith.mulf %103, %160 : vector<1x128xf32>
    %165 = arith.addf %164, %162 : vector<1x128xf32>
    %166 = arith.mulf %116, %105 : vector<1x128xf32>
    %167 = arith.addf %166, %107 : vector<1x128xf32>
    %168 = arith.mulf %117, %105 : vector<1x128xf32>
    %169 = arith.mulf %168, %105 : vector<1x128xf32>
    %cst_71 = arith.constant 0.000000e+00 : f32
    %170 = vector.broadcast %cst_71 : f32 to vector<1x128xf32>
    %171 = arith.maximumf %169, %170 : vector<1x128xf32>
    %cst_72 = arith.constant 9.99999974E-6 : f32
    %172 = vector.broadcast %cst_72 : f32 to vector<1x128xf32>
    %173 = arith.addf %171, %172 : vector<1x128xf32>
    %174 = math.rsqrt %173 : vector<1x128xf32>
    %175 = arith.mulf %174, %110 : vector<1x128xf32>
    %176 = arith.mulf %167, %175 : vector<1x128xf32>
    %177 = arith.subf %111, %176 : vector<1x128xf32>
    %178 = arith.mulf %105, %175 : vector<1x128xf32>
    %179 = arith.mulf %107, %175 : vector<1x128xf32>
    %180 = arith.addf %179, %177 : vector<1x128xf32>
    %181 = vector.extract_strided_slice %32 {offsets = [0, 128], sizes = [144, 128], strides = [1, 1]} : vector<144x256xf32> to vector<144x128xf32>
    %182 = vector.broadcast %163 : vector<1x128xf32> to vector<144x128xf32>
    %183 = arith.mulf %181, %182 : vector<144x128xf32>
    %184 = vector.broadcast %165 : vector<1x128xf32> to vector<144x128xf32>
    %185 = arith.addf %183, %184 : vector<144x128xf32>
    %186 = vector.extract_strided_slice %70 {offsets = [0, 128], sizes = [144, 128], strides = [1, 1]} : vector<144x256xf32> to vector<144x128xf32>
    %187 = vector.broadcast %178 : vector<1x128xf32> to vector<144x128xf32>
    %188 = arith.mulf %186, %187 : vector<144x128xf32>
    %189 = vector.broadcast %180 : vector<1x128xf32> to vector<144x128xf32>
    %190 = arith.addf %188, %189 : vector<144x128xf32>
    %191 = arith.mulf %185, %190 : vector<144x128xf32>
    %192 = tpu.reciprocal %191 {approx = true} : vector<144x128xf32> -> vector<144x128xf32>
    %193 = arith.mulf %191, %192 : vector<144x128xf32>
    %cst_73 = arith.constant 2.000000e+00 : f32
    %194 = vector.broadcast %cst_73 : f32 to vector<144x128xf32>
    %195 = arith.subf %194, %193 : vector<144x128xf32>
    %196 = arith.mulf %192, %195 : vector<144x128xf32>
    %197 = vector.broadcast %148 : vector<1x128xf32> to vector<144x128xf32>
    %198 = arith.mulf %127, %197 : vector<144x128xf32>
    %199 = vector.broadcast %150 : vector<1x128xf32> to vector<144x128xf32>
    %200 = arith.addf %198, %199 : vector<144x128xf32>
    %201 = arith.mulf %200, %196 : vector<144x128xf32>
    %c0_74 = arith.constant 0 : index
    %c0_75 = arith.constant 0 : index
    %202 = vector.load %arg10[%c0_74, %c0_75] : memref<144x128xf32, #tpu.memory_space<vmem>>, vector<144x128xf32>
    tpu.vector_store %arg10[%c0_74, %c0_75], %201 {strides = array<i32>} : memref<144x128xf32, #tpu.memory_space<vmem>>, vector<144x128xf32>,
    return
  }
}

</mosaic_0001>

<bundles_post_ra>
// kernel: forward.1
= control target key start
LH: loop header
LB: loop body
LE: loop exit
PB: predicated region body
PF: predicated region fallthrough
CT: control target
= control target key end

     0   :  { %vm54_vm0 = vcmask 64512   ;;  %v3398_v3 = vmov 0   ;;  %vm264_vm1 = vcmask 261120   ;;  %v5632_v32 = vmov 0.0   ;;  %s3400_s19 = smov 64   ;;  %s3401_s20 = smov 32   ;;  %s5621_s1 = inlined_call_operand.vmem [shape: f32[8,32], index: 1, kind: input, shape index: {}]   ;;  %s5622_s0 = inlined_call_operand.vmem [shape: f32[144,8], index: 0, kind: input, shape index: {}]   ;;  %s5623_s4 = inlined_call_operand.vmem [shape: f32[32,256], index: 4, kind: input, shape index: {}]   ;;  %s5624_s5 = inlined_call_operand.vmem [shape: f32[288,256], index: 5, kind: input, shape index: {}]   ;;  %s5625_s2 = inlined_call_operand.vmem [shape: f32[1,32], index: 2, kind: input, shape index: {}]   ;;  %s5626_s3 = inlined_call_operand.vmem [shape: f32[1,32], index: 3, kind: input, shape index: {}]   ;;  %s5627_s6 = inlined_call_operand.vmem [shape: f32[1,256], index: 6, kind: input, shape index: {}]   ;;  %s5628_s7 = inlined_call_operand.vmem [shape: f32[1,256], index: 7, kind: input, shape index: {}]   ;;  %s5629_s8 = inlined_call_operand.vmem [shape: f32[1,256], index: 8, kind: input, shape index: {}]   ;;  %s5630_s9 = inlined_call_operand.vmem [shape: f32[1,256], index: 9, kind: input, shape index: {}]   ;;  %s5631_s10 = inlined_call_operand.vmem [shape: f32[144,128], index: 10, kind: output, shape index: {}]  }
   0x1   :  { %v53_v0 = vld [vmem:[%s5621_s1] sm:$0xff]  ;;  %v36_v2 = vld [vmem:[%s5622_s0 + $0x8] sm:$0xff]  ;;  %3074 = vset.pattern.permute.xlu0 %v3398_v3  ;;  %3075 = vset.pattern.permute.xlu1 %v3398_v3  ;;  %v37_v4 = vld [vmem:[%s5622_s0 + $0x10] sm:$0xff]  ;;  %928 = vst.msk [vmem:[#allocation2] sm:$0xff] %vm264_vm1, %v5632_v32  ;;  %vm931_vm2 = vcmask 258048   ;;  %s3402_s1 = smov 96  }
   0x2   :  { %v35_v1 = vld [vmem:[%s5622_s0] sm:$0xff]  ;;  %2891 = vmatprep.subr.mxu0 %v53_v0  ;;  %409 = vperm.xlu1 %3075, %v37_v4   ;;  %v38_v5 = vld [vmem:[%s5622_s0 + $0x18] sm:$0xff]  ;;  %v40_v7 = vld [vmem:[%s5622_s0 + $0x28] sm:$0xff]  ;;  %929 = vst.msk [vmem:[#allocation2 + $0x8] sm:$0xff] %vm264_vm1, %v5632_v32  ;;  %vm1503_vm3 = vcmask 523264   ;;  %vm1522_vm4 = vcmask 785408  }
   0x3   :  { %2893 = vmatprep.mubr.msk.f32.mxu0 %vm54_vm0, %v35_v1  ;;  %2892 = vmatpush3.msra.mxu0 %v53_v0  ;;  %v39_v6 = vld [vmem:[%s5622_s0 + $0x20] sm:$0xff]  ;;  %v41_v8 = vld [vmem:[%s5622_s0 + $0x30] sm:$0xff]  ;;  %v42_v9 = vld [vmem:[%s5622_s0 + $0x38] sm:$0xff]  ;;  %930 = vst.msk [vmem:[#allocation2 + $0xa0] sm:$0xff] %vm264_vm1, %v5632_v32 }
   0x4   :  { %401 = vperm.xlu0 %3074, %v35_v1   ;;  %2894 = vmatmul.mubr.msk.f32.vlgmr.msra.gmra.mrb[0].mxu0 %vm54_vm0, %v36_v2  ;;  %v43_v10 = vld [vmem:[%s5622_s0 + $0x40] sm:$0xff]  ;;  %v44_v11 = vld [vmem:[%s5622_s0 + $0x48] sm:$0xff]  ;;  %v45_v12 = vld [vmem:[%s5622_s0 + $0x50] sm:$0xff]  ;;  %932 = vst.msk [vmem:[#allocation2 + $0xa8] sm:$0x1f] %vm931_vm2, %v5632_v32 }
   0x5   :  { %2896 = vmatprep.mubr.msk.f32.mxu0 %vm54_vm0, %v37_v4  ;;  %v46_v13 = vld [vmem:[%s5622_s0 + $0x58] sm:$0xff]  ;;  %v47_v14 = vld [vmem:[%s5622_s0 + $0x60] sm:$0xff]  ;;  %v48_v15 = vld [vmem:[%s5622_s0 + $0x68] sm:$0xff]  ;;  %640 = vmatprep.mubr.f32.mxu1 %v5632_v32 }
   0x6   :  { %413 = vperm.xlu1 %3075, %v38_v5   ;;  %v49_v16 = vld [vmem:[%s5622_s0 + $0x70] sm:$0xff]  ;;  %v50_v17 = vld [vmem:[%s5622_s0 + $0x78] sm:$0xff]  ;;  %v51_v18 = vld [vmem:[%s5622_s0 + $0x80] sm:$0xff] }
   0x7   :  { %v52_v19 = vld [vmem:[%s5622_s0 + $0x88] sm:$0xff]  ;;  %v517_v21 = vld [vmem:[%s5623_s4 + $0x18] sm:$0xff]  ;;  %v514_v23 = vld [vmem:[%s5623_s4] sm:$0xff] }
   0x8   :  { %405 = vperm.xlu0 %3074, %v36_v2   ;;  %2897 = vmatmul.mubr.msk.f32.gmra.mrb[2].mxu0 %vm54_vm0, %v38_v5  ;;  %v515_v20 = vld [vmem:[%s5623_s4 + $0x8] sm:$0xff]  ;;  %v516_v24 = vld [vmem:[%s5623_s4 + $0x10] sm:$0xff]  ;;  %v521_v27 = vld [vmem:[%s5623_s4 + $0x38] sm:$0xff] }
   0x9   :  { %2899 = vmatprep.mubr.msk.f32.mxu0 %vm54_vm0, %v39_v6  ;;  %v2920_v22 = vpack.c.bf16 %v517_v21, %v515_v20  ;;  %v2922_v25 = vpack.c.bf16 %v516_v24, %v514_v23  ;;  %v519_v26 = vld [vmem:[%s5623_s4 + $0x28] sm:$0xff]  ;;  %v518_v29 = vld [vmem:[%s5623_s4 + $0x20] sm:$0xff]  ;;  %v520_v30 = vld [vmem:[%s5623_s4 + $0x30] sm:$0xff] }
   0xa   :  { %421 = vperm.xlu1 %3075, %v40_v7   ;;  %v2924_v28 = vpack.c.bf16 %v521_v27, %v519_v26  ;;  %v2926_v31 = vpack.c.bf16 %v520_v30, %v518_v29  ;;  %v1648_v32 = vld [vmem:[%s5624_s5 + $0x1a8] sm:$0xff] }
   0xb   :  { %2921 = vmatprep.subr.bf16.mxu1 %v2920_v22 }
   0xc   :  { %417 = vperm.xlu0 %3074, %v39_v6   ;;  %2900 = vmatmul.mubr.msk.f32.gmra.mrb[4].mxu0 %vm54_vm0, %v40_v7 }
   0xd   :  { %2902 = vmatprep.mubr.msk.f32.mxu0 %vm54_vm0, %v41_v8  ;;  %2923 = vmatpush1.bf16.msra.mxu1 %v2922_v25 }
   0xe   :  { %429 = vperm.xlu1 %3075, %v42_v9   ;;  %2925 = vmatprep.subr.bf16.mxu1 %v2924_v28 }
  0x10   :  { %425 = vperm.xlu0 %3074, %v41_v8   ;;  %2903 = vmatmul.mubr.msk.f32.gmra.mrb[6].mxu0 %vm54_vm0, %v42_v9 }
  0x11   :  { %2905 = vmatprep.mubr.msk.f32.mxu0 %vm54_vm0, %v43_v10  ;;  %2927 = vmatpush1.bf16.msra.mxu1 %v2926_v31 }
  0x12   :  { %437 = vperm.xlu1 %3075, %v44_v11  }
  0x14   :  { %433 = vperm.xlu0 %3074, %v43_v10   ;;  %2906 = vmatmul.mubr.msk.f32.gmra.mrb[8].mxu0 %vm54_vm0, %v44_v11 }
  0x15   :  { %2908 = vmatprep.mubr.msk.f32.mxu0 %vm54_vm0, %v45_v12 }
  0x16   :  { %445 = vperm.xlu1 %3075, %v46_v13  }
  0x18   :  { %441 = vperm.xlu0 %3074, %v45_v12   ;;  %2909 = vmatmul.mubr.msk.f32.gmra.mrb[10].mxu0 %vm54_vm0, %v46_v13 }
  0x19   :  { %2911 = vmatprep.mubr.msk.f32.mxu0 %vm54_vm0, %v47_v14 }
  0x1a   :  { %453 = vperm.xlu1 %3075, %v48_v15  }
  0x1c   :  { %449 = vperm.xlu0 %3074, %v47_v14   ;;  %2912 = vmatmul.mubr.msk.f32.gmra.mrb[12].mxu0 %vm54_vm0, %v48_v15 }
  0x1d   :  { %2914 = vmatprep.mubr.msk.f32.mxu0 %vm54_vm0, %v49_v16 }
  0x1e   :  { %461 = vperm.xlu1 %3075, %v50_v17  }
  0x20   :  { %457 = vperm.xlu0 %3074, %v49_v16   ;;  %2915 = vmatmul.mubr.msk.f32.gmra.mrb[14].mxu0 %vm54_vm0, %v50_v17 }
  0x21   :  { %2917 = vmatprep.mubr.msk.f32.mxu0 %vm54_vm0, %v51_v18 }
  0x22   :  { %469 = vperm.xlu1 %3075, %v52_v19  }
  0x24   :  { %465 = vperm.xlu0 %3074, %v51_v18   ;;  %2918 = vmatmul.mubr.msk.f32.gmra.mrb[16].mxu0 %vm54_vm0, %v52_v19 }
  0xd7   :  { %v3566_v33 = vpop.f32.mrb[0].mxu0 }
  0xd8   :  { %v266_v34 = vsel %vm264_vm1, %v3566_v33, 0.0  ;;  %v307_v35 = vmul.f32 %v3566_v33, %v3566_v33  ;;  %v3572_v36 = vpop.f32.mrb[1].mxu0 }
  0xd9   :  { %v265_v37 = vsel %vm264_vm1, %v3572_v36, 0.0  ;;  %v306_v38 = vmul.f32 %v3572_v36, %v3572_v36 }
  0xda   :  { %v325_v39 = vsel %vm264_vm1, %v307_v35, 0.0  ;;  %v267_v40 = vadd.f32 %v266_v34, %v265_v37 }
  0xdb   :  { %v324_v41 = vsel %vm264_vm1, %v306_v38, 0.0  ;;  %v3580_v42 = vpop.f32.mrb[2].mxu0 }
  0xdc   :  { %v326_v43 = vadd.f32 %v325_v39, %v324_v41  ;;  %v3582_v44 = vpop.f32.mrb[3].mxu0  ;;  %v309_v45 = vmul.f32 %v3580_v42, %v3580_v42  ;;  %v270_v49 = vsel %vm264_vm1, %v3580_v42, 0.0 }
  0xdd   :  { %v268_v46 = vsel %vm264_vm1, %v3582_v44, 0.0  ;;  %v308_v47 = vmul.f32 %v3582_v44, %v3582_v44 }
  0xde   :  { %v269_v48 = vadd.f32 %v268_v46, %v267_v40  ;;  %v329_v55 = vsel %vm264_vm1, %v309_v45, 0.0  ;;  %v1596_v45 = vld [vmem:[%s5624_s5 + $0x8] sm:$0xff]  ;;  %v1598_v46 = vld [vmem:[%s5624_s5 + $0x18] sm:$0xff] }
  0xdf   :  { %v327_v50 = vsel %vm264_vm1, %v308_v47, 0.0  ;;  %v3593_v51 = vpop.f32.mrb[4].mxu0  ;;  %v1595_v47 = vld [vmem:[%s5624_s5] sm:$0xff] }
  0xe0   :  { %v328_v52 = vadd.f32 %v327_v50, %v326_v43  ;;  %v3595_v53 = vpop.f32.mrb[5].mxu0  ;;  %v271_v54 = vadd.f32 %v270_v49, %v269_v48  ;;  %v311_v56 = vmul.f32 %v3593_v51, %v3593_v51  ;;  %v274_v61 = vsel %vm264_vm1, %v3593_v51, 0.0 }
  0xe1   :  { %v272_v57 = vsel %vm264_vm1, %v3595_v53, 0.0  ;;  %v310_v58 = vmul.f32 %v3595_v53, %v3595_v53 }
  0xe2   :  { %v273_v59 = vadd.f32 %v272_v57, %v271_v54  ;;  %v330_v60 = vadd.f32 %v329_v55, %v328_v52  ;;  %v333_v3 = vsel %vm264_vm1, %v311_v56, 0.0  ;;  %v2928_v52 = vpack.c.bf16 %v1598_v46, %v1596_v45  ;;  %v1597_v54 = vld [vmem:[%s5624_s5 + $0x10] sm:$0xff]  ;;  %v1600_v55 = vld [vmem:[%s5624_s5 + $0x28] sm:$0xff]  ;;  %v1602_v56 = vld [vmem:[%s5624_s5 + $0x38] sm:$0xff] }
  0xe3   :  { %v331_v62 = vsel %vm264_vm1, %v310_v58, 0.0  ;;  %v3607_v63 = vpop.f32.mrb[6].mxu0 }
  0xe4   :  { %v332_v0 = vadd.f32 %v331_v62, %v330_v60  ;;  %v3609_v1 = vpop.f32.mrb[7].mxu0  ;;  %v275_v2 = vadd.f32 %v274_v61, %v273_v59  ;;  %v313_v4 = vmul.f32 %v3607_v63, %v3607_v63  ;;  %v278_v9 = vsel %vm264_vm1, %v3607_v63, 0.0  ;;  %v1599_v60 = vld [vmem:[%s5624_s5 + $0x20] sm:$0xff]  ;;  %v1601_v61 = vld [vmem:[%s5624_s5 + $0x30] sm:$0xff]  ;;  %2929 = vmatprep.subr.bf16.mxu0 %v2928_v52  ;;  %3000 = vmatprep.subr.bf16.mxu1 %v2928_v52 }
  0xe5   :  { %v276_v5 = vsel %vm264_vm1, %v3609_v1, 0.0  ;;  %v312_v6 = vmul.f32 %v3609_v1, %v3609_v1  ;;  %v3678_v59 = vpack.c.bf16 %v1597_v54, %v1595_v47  ;;  %v1609_v47 = vld [vmem:[%s5624_s5 + $0x70] sm:$0xff]  ;;  %v3755_v54 = vpop.permute.xlu1 %409 }
  0xe6   :  { %v277_v7 = vadd.f32 %v276_v5, %v275_v2  ;;  %v334_v8 = vadd.f32 %v333_v3, %v332_v0  ;;  %v337_v15 = vsel %vm264_vm1, %v313_v4, 0.0  ;;  %v3691_v3 = vpack.c.bf16 %v1602_v56, %v1600_v55  ;;  %5710 = vst [vmem:[#allocation3_spill] sm:$0xff] %v3755_v54 }
  0xe7   :  { %v335_v10 = vsel %vm264_vm1, %v312_v6, 0.0  ;;  %v3621_v11 = vpop.f32.mrb[8].mxu0  ;;  %2931 = vmatpush1.bf16.msra.mxu0 %v3678_v59 }
  0xe8   :  { %v336_v12 = vadd.f32 %v335_v10, %v334_v8  ;;  %v3623_v13 = vpop.f32.mrb[9].mxu0  ;;  %v279_v14 = vadd.f32 %v278_v9, %v277_v7  ;;  %v315_v16 = vmul.f32 %v3621_v11, %v3621_v11  ;;  %v282_v21 = vsel %vm264_vm1, %v3621_v11, 0.0  ;;  %2933 = vmatprep.subr.bf16.mxu0 %v3691_v3 }
  0xe9   :  { %v280_v17 = vsel %vm264_vm1, %v3623_v13, 0.0  ;;  %v314_v18 = vmul.f32 %v3623_v13, %v3623_v13  ;;  %v3696_v7 = vpack.c.bf16 %v1601_v61, %v1599_v60  ;;  %v1611_v60 = vld [vmem:[%s5624_s5 + $0x80] sm:$0xff] }
  0xea   :  { %v281_v19 = vadd.f32 %v280_v17, %v279_v14  ;;  %v338_v20 = vadd.f32 %v337_v15, %v336_v12  ;;  %v341_v28 = vsel %vm264_vm1, %v315_v16, 0.0  ;;  %v1604_v14 = vld [vmem:[%s5624_s5 + $0x48] sm:$0xff]  ;;  %v1606_v15 = vld [vmem:[%s5624_s5 + $0x58] sm:$0xff]  ;;  %v1603_v16 = vld [vmem:[%s5624_s5 + $0x40] sm:$0xff] }
  0xeb   :  { %v339_v22 = vsel %vm264_vm1, %v314_v18, 0.0  ;;  %v3635_v23 = vpop.f32.mrb[10].mxu0  ;;  %2935 = vmatpush1.bf16.msra.mxu0 %v3696_v7 }
  0xec   :  { %v340_v24 = vadd.f32 %v339_v22, %v338_v20  ;;  %v317_v25 = vmul.f32 %v3635_v23, %v3635_v23  ;;  %v3639_v26 = vpop.f32.mrb[11].mxu0  ;;  %v283_v27 = vadd.f32 %v282_v21, %v281_v19  ;;  %v286_v35 = vsel %vm264_vm1, %v3635_v23, 0.0  ;;  %v1605_v20 = vld [vmem:[%s5624_s5 + $0x50] sm:$0xff] }
  0xed   :  { %v284_v29 = vsel %vm264_vm1, %v3639_v26, 0.0  ;;  %v316_v30 = vmul.f32 %v3639_v26, %v3639_v26  ;;  %v3715_v19 = vpack.c.bf16 %v1606_v15, %v1604_v14  ;;  %v1618_v14 = vld [vmem:[%s5624_s5 + $0xb8] sm:$0xff]  ;;  %v1615_v15 = vld [vmem:[%s5624_s5 + $0xa0] sm:$0xff] }
  0xee   :  { %v285_v31 = vadd.f32 %v284_v29, %v283_v27  ;;  %v342_v34 = vadd.f32 %v341_v28, %v340_v24  ;;  %v345_v39 = vsel %vm264_vm1, %v317_v25, 0.0  ;;  %v3728_v29 = vpack.c.bf16 %v1605_v20, %v1603_v16 }
  0xef   :  { %v343_v37 = vsel %vm264_vm1, %v316_v30, 0.0  ;;  %v3649_v38 = vpop.f32.mrb[12].mxu0  ;;  %2937 = vmatprep.subr.bf16.mxu0 %v3715_v19 }
  0xf0   :  { %v344_v40 = vadd.f32 %v343_v37, %v342_v34  ;;  %v3652_v41 = vpop.f32.mrb[13].mxu0  ;;  %v287_v43 = vadd.f32 %v286_v35, %v285_v31  ;;  %v319_v48 = vmul.f32 %v3649_v38, %v3649_v38  ;;  %v290_v62 = vsel %vm264_vm1, %v3649_v38, 0.0  ;;  %v1608_v37 = vld [vmem:[%s5624_s5 + $0x68] sm:$0xff]  ;;  %2939 = vmatpush1.bf16.msra.mxu0 %v3728_v29 }
  0xf1   :  { %v288_v49 = vsel %vm264_vm1, %v3652_v41, 0.0  ;;  %v318_v50 = vmul.f32 %v3652_v41, %v3652_v41 }
  0xf2   :  { %v289_v57 = vadd.f32 %v288_v49, %v287_v43  ;;  %v346_v58 = vadd.f32 %v345_v39, %v344_v40  ;;  %v349_v8 = vsel %vm264_vm1, %v319_v48, 0.0  ;;  %v1610_v39 = vld [vmem:[%s5624_s5 + $0x78] sm:$0xff]  ;;  %v1607_v40 = vld [vmem:[%s5624_s5 + $0x60] sm:$0xff] }
  0xf3   :  { %v347_v0 = vsel %vm264_vm1, %v318_v50, 0.0  ;;  %v3689_v2 = vpop.f32.mrb[14].mxu0  ;;  %v3747_v46 = vpack.c.bf16 %v1610_v39, %v1608_v37  ;;  %v3758_v55 = vpack.c.bf16 %v1609_v47, %v1607_v40 }
  0xf4   :  { %v348_v4 = vadd.f32 %v347_v0, %v346_v58  ;;  %v3693_v5 = vpop.f32.mrb[15].mxu0  ;;  %v291_v6 = vadd.f32 %v290_v62, %v289_v57  ;;  %v321_v9 = vmul.f32 %v3689_v2, %v3689_v2  ;;  %v294_v21 = vsel %vm264_vm1, %v3689_v2, 0.0  ;;  %v1612_v57 = vld [vmem:[%s5624_s5 + $0x88] sm:$0xff]  ;;  %v1614_v58 = vld [vmem:[%s5624_s5 + $0x98] sm:$0xff]  ;;  %v3771_v0 = vpop.permute.xlu0 %401 }
  0xf5   :  { %v292_v10 = vsel %vm264_vm1, %v3693_v5, 0.0  ;;  %v320_v12 = vmul.f32 %v3693_v5, %v3693_v5  ;;  %2941 = vmatprep.subr.bf16.mxu0 %v3747_v46  ;;  %5711 = vst [vmem:[#allocation4_spill] sm:$0xff] %v3771_v0 }
  0xf6   :  { %v293_v17 = vadd.f32 %v292_v10, %v291_v6  ;;  %v350_v18 = vadd.f32 %v349_v8, %v348_v4  ;;  %v353_v30 = vsel %vm264_vm1, %v321_v9, 0.0  ;;  %v3773_v4 = vpack.c.bf16 %v1614_v58, %v1612_v57  ;;  %v1613_v6 = vld [vmem:[%s5624_s5 + $0x90] sm:$0xff]  ;;  %2943 = vmatpush1.bf16.msra.mxu0 %v3758_v55 }
  0xf7   :  { %v351_v22 = vsel %vm264_vm1, %v320_v12, 0.0  ;;  %v3723_v24 = vpop.f32.mrb[16].mxu0  ;;  %v3779_v10 = vpack.c.bf16 %v1613_v6, %v1611_v60  ;;  %v1616_v12 = vld [vmem:[%s5624_s5 + $0xa8] sm:$0xff] }
  0xf8   :  { %v352_v25 = vadd.f32 %v351_v22, %v350_v18  ;;  %v3725_v27 = vpop.f32.mrb[17].mxu0  ;;  %v295_v28 = vadd.f32 %v294_v21, %v293_v17  ;;  %v323_v31 = vmul.f32 %v3723_v24, %v3723_v24  ;;  %v298_v48 = vsel %vm264_vm1, %v3723_v24, 0.0  ;;  %2945 = vmatprep.subr.bf16.mxu0 %v3773_v4  ;;  %v3791_v18 = vpop.permute.xlu1 %413  ;;  %v1617_v21 = vld [vmem:[%s5624_s5 + $0xb0] sm:$0xff] }
  0xf9   :  { %v296_v34 = vsel %vm264_vm1, %v3725_v27, 0.0  ;;  %v322_v35 = vmul.f32 %v3725_v27, %v3725_v27  ;;  %5712 = vst [vmem:[#allocation5_spill] sm:$0xff] %v3791_v18  ;;  %v3793_v20 = vpack.c.bf16 %v1618_v14, %v1616_v12  ;;  %v1628_v12 = vld [vmem:[%s5624_s5 + $0x108] sm:$0xff]  ;;  %v1630_v14 = vld [vmem:[%s5624_s5 + $0x118] sm:$0xff] }
  0xfa   :  { %v297_v43 = vadd.f32 %v296_v34, %v295_v28  ;;  %v354_v45 = vadd.f32 %v353_v30, %v352_v25  ;;  %v357_v56 = vsel %vm264_vm1, %v323_v31, 0.0  ;;  %v3798_v28 = vpop.permute.xlu0 %405  ;;  %2947 = vmatpush1.bf16.msra.mxu0 %v3779_v10  ;;  %v3801_v30 = vpack.c.bf16 %v1617_v21, %v1615_v15  ;;  %v1620_v31 = vld [vmem:[%s5624_s5 + $0xc8] sm:$0xff]  ;;  %v1622_v34 = vld [vmem:[%s5624_s5 + $0xd8] sm:$0xff]  ;;  %v1627_v15 = vld [vmem:[%s5624_s5 + $0x100] sm:$0xff] }
  0xfb   :  { %v355_v49 = vsel %vm264_vm1, %v322_v35, 0.0  ;;  %5713 = vst [vmem:[#allocation6_spill] sm:$0xff] %v3798_v28  ;;  %2949 = vmatprep.subr.bf16.mxu0 %v3793_v20  ;;  %v1619_v35 = vld [vmem:[%s5624_s5 + $0xc0] sm:$0xff]  ;;  %v3813_v40 = vpack.c.bf16 %v1622_v34, %v1620_v31  ;;  %v3859_v21 = vpack.c.bf16 %v1630_v14, %v1628_v12  ;;  %v1637_v14 = vld [vmem:[%s5624_s5 + $0x150] sm:$0xff] }
  0xfc   :  { %v299_v50 = vadd.f32 %v298_v48, %v297_v43  ;;  %v356_v52 = vadd.f32 %v355_v49, %v354_v45  ;;  %v1621_v43 = vld [vmem:[%s5624_s5 + $0xd0] sm:$0xff]  ;;  %v3818_v48 = vpop.permute.xlu1 %421 }
  0xfd   :  { %5714 = vst [vmem:[#allocation7_spill] sm:$0xff] %v3818_v48  ;;  %v3821_v49 = vpack.c.bf16 %v1621_v43, %v1619_v35  ;;  %5719 = vst [vmem:[#allocation12_spill] sm:$0xff] %v3859_v21  ;;  %v1632_v35 = vld [vmem:[%s5624_s5 + $0x128] sm:$0xff] }
  0xfe   :  { %v300_v61 = vrot.slane %v299_v50, 4  ;;  %v358_v62 = vadd.f32 %v357_v56, %v356_v52  ;;  %2951 = vmatpush1.bf16.msra.mxu0 %v3801_v30  ;;  %v1626_v52 = vld [vmem:[%s5624_s5 + $0xf8] sm:$0xff]  ;;  %v1623_v56 = vld [vmem:[%s5624_s5 + $0xe0] sm:$0xff]  ;;  %v3835_v60 = vpop.permute.xlu0 %417 }
  0xff   :  { %2953 = vmatprep.subr.bf16.mxu0 %v3813_v40  ;;  %5715 = vst [vmem:[#allocation8_spill] sm:$0xff] %v3835_v60 }
 0x100   :  { %v301_v8 = vadd.f32 %v300_v61, %v299_v50  ;;  %v359_v9 = vrot.slane %v358_v62, 4  ;;  %v1624_v50 = vld [vmem:[%s5624_s5 + $0xe8] sm:$0xff] }
 0x101   :  { %v3837_v61 = vpack.c.bf16 %v1626_v52, %v1624_v50 }
 0x102   :  { %v302_v16 = vrot.slane %v301_v8, 2  ;;  %v360_v17 = vadd.f32 %v359_v9, %v358_v62  ;;  %v1625_v62 = vld [vmem:[%s5624_s5 + $0xf0] sm:$0xff]  ;;  %2955 = vmatpush1.bf16.msra.mxu0 %v3821_v49  ;;  %v3864_v31 = vpop.permute.xlu0 %425 }
 0x103   :  { %5716 = vst [vmem:[#allocation9_spill] sm:$0xff] %v3837_v61  ;;  %v3845_v9 = vpack.c.bf16 %v1625_v62, %v1623_v56  ;;  %2957 = vmatprep.subr.bf16.mxu0 %v3837_v61  ;;  %5720 = vst [vmem:[#allocation13_spill] sm:$0xff] %v3864_v31  ;;  %v378_v56 = vlaneseq  ;;  %v1638_v62 = vld [vmem:[%s5624_s5 + $0x158] sm:$0xff] }
 0x104   :  { %v303_v22 = vadd.f32 %v302_v16, %v301_v8  ;;  %v361_v25 = vrot.slane %v360_v17, 2 }
 0x105   :  { %5717 = vst [vmem:[#allocation10_spill] sm:$0xff] %v3845_v9 }
 0x106   :  { %v304_v37 = vrot.slane %v303_v22, 1  ;;  %v362_v39 = vadd.f32 %v361_v25, %v360_v17  ;;  %v3857_v17 = vpop.permute.xlu1 %429  ;;  %2959 = vmatpush1.bf16.msra.mxu0 %v3845_v9 }
 0x107   :  { %5718 = vst [vmem:[#allocation11_spill] sm:$0xff] %v3857_v17  ;;  %2961 = vmatprep.subr.bf16.mxu0 %v3859_v21 }
 0x108   :  { %v305_v45 = vadd.f32 %v304_v37, %v303_v22  ;;  %v363_v47 = vrot.slane %v362_v39, 1  ;;  %v1629_v22 = vld [vmem:[%s5624_s5 + $0x110] sm:$0xff]  ;;  %v1634_v37 = vld [vmem:[%s5624_s5 + $0x138] sm:$0xff] }
 0x109   :  { %v3867_v34 = vpack.c.bf16 %v1629_v22, %v1627_v15  ;;  %v1640_v22 = vld [vmem:[%s5624_s5 + $0x168] sm:$0xff] }
 0x10a   :  { %v364_v57 = vadd.f32 %v363_v47, %v362_v39  ;;  %v3833_v58 = vmul.f32 0.01, %v305_v45  ;;  %v1631_v39 = vld [vmem:[%s5624_s5 + $0x120] sm:$0xff]  ;;  %v3879_v45 = vpack.c.bf16 %v1634_v37, %v1632_v35  ;;  %v1633_v47 = vld [vmem:[%s5624_s5 + $0x130] sm:$0xff]  ;;  %v3884_v50 = vpop.permute.xlu1 %437 }
 0x10b   :  { %5721 = vst [vmem:[#allocation14_spill] sm:$0xff] %v3867_v34  ;;  %5723 = vst [vmem:[#allocation16_spill] sm:$0xff] %v3884_v50  ;;  %2963 = vmatpush1.bf16.msra.mxu0 %v3867_v34  ;;  %v3887_v52 = vpack.c.bf16 %v1633_v47, %v1631_v39  ;;  %v1639_v35 = vld [vmem:[%s5624_s5 + $0x160] sm:$0xff] }
 0x10c   :  { %v367_v6 = vmul.f32 0.01, %v364_v57  ;;  %v368_v8 = vmul.f32 %v3833_v58, %v3833_v58  ;;  %5722 = vst [vmem:[#allocation15_spill] sm:$0xff] %v3879_v45  ;;  %2965 = vmatprep.subr.bf16.mxu0 %v3879_v45  ;;  %v1636_v57 = vld [vmem:[%s5624_s5 + $0x148] sm:$0xff]  ;;  %v370_v47 = vld [vmem:[%s5625_s2] sm:$0x1] }
 0x10d   :  { %5724 = vst [vmem:[#allocation17_spill] sm:$0xff] %v3887_v52  ;;  %v3901_v12 = vpack.c.bf16 %v1638_v62, %v1636_v57 }
 0x10e   :  { %v369_v16 = vsub.f32 %v367_v6, %v368_v8  ;;  %v1635_v6 = vld [vmem:[%s5624_s5 + $0x140] sm:$0xff]  ;;  %v3899_v8 = vpop.permute.xlu0 %433  ;;  %v3921_v37 = vpop.permute.xlu1 %445 }
 0x10f   :  { %5725 = vst [vmem:[#allocation18_spill] sm:$0xff] %v3899_v8  ;;  %5726 = vst [vmem:[#allocation19_spill] sm:$0xff] %v3901_v12  ;;  %2967 = vmatpush1.bf16.msra.mxu0 %v3887_v52  ;;  %v3907_v15 = vpack.c.bf16 %v1637_v14, %v1635_v6  ;;  %v1644_v6 = vld [vmem:[%s5624_s5 + $0x188] sm:$0xff]  ;;  %v1646_v14 = vld [vmem:[%s5624_s5 + $0x198] sm:$0xff] }
 0x110   :  { %v372_v25 = vmax.f32 %v369_v16, 0.0  ;;  %v3909_v16 = vshrl.u32 %v378_v56, 7  ;;  %2969 = vmatprep.subr.bf16.mxu0 %v3901_v12  ;;  %5729 = vst [vmem:[#allocation22_spill] sm:$0xff] %v3921_v37 }
 0x111   :  { %5727 = vst [vmem:[#allocation20_spill] sm:$0xff] %v3907_v15 }
 0x112   :  { %v373_v43 = vadd.f32 1e-05, %v372_v25  ;;  %5728 = vst [vmem:[#allocation21_spill] sm:$0xff] %v3909_v16  ;;  %v1642_v25 = vld [vmem:[%s5624_s5 + $0x178] sm:$0xff]  ;;  %v3931_v56 = vpop.permute.xlu0 %441  ;;  %v3937_v62 = vsub.s32 0, %v3909_v16  ;;  %v3969_v12 = vpop.permute.xlu1 %453 }
 0x113   :  { %v3923_v39 = vpack.c.bf16 %v1642_v25, %v1640_v22  ;;  %5731 = vst [vmem:[#allocation24_spill] sm:$0xff] %v3931_v56  ;;  %2971 = vmatpush1.bf16.msra.mxu0 %v3907_v15  ;;  %v1643_v22 = vld [vmem:[%s5624_s5 + $0x180] sm:$0xff]  ;;  %v1650_v16 = vld [vmem:[%s5624_s5 + $0x1b8] sm:$0xff]  ;;  %5733 = vst [vmem:[#allocation26_spill] sm:$0xff] %v3969_v12 }
 0x114   :  { %3346 = vrsqrt.f32 %v373_v43  ;;  %v1641_v43 = vld [vmem:[%s5624_s5 + $0x170] sm:$0xff]  ;;  %5732 = vst [vmem:[#allocation25_spill] sm:$0xff] %v3937_v62  ;;  %v1647_v15 = vld [vmem:[%s5624_s5 + $0x1a0] sm:$0xff]  ;;  %v3979_v45 = vpack.c.bf16 %v1650_v16, %v1648_v32 }
 0x115   :  { %5730 = vst [vmem:[#allocation23_spill] sm:$0xff] %v3923_v39  ;;  %v3934_v57 = vpack.c.bf16 %v1641_v43, %v1639_v35  ;;  %2973 = vmatprep.subr.bf16.mxu0 %v3923_v39  ;;  %v3949_v35 = vpack.c.bf16 %v1646_v14, %v1644_v6  ;;  %v1645_v43 = vld [vmem:[%s5624_s5 + $0x190] sm:$0xff]  ;;  %v371_v14 = vld [vmem:[%s5626_s3] sm:$0x1] }
 0x116   :  { %v1649_v6 = vld [vmem:[%s5624_s5 + $0x1b0] sm:$0xff]  ;;  %v3972_v52 = vpack.c.bf16 %v1645_v43, %v1643_v22  ;;  %v3981_v34 = vpop.permute.xlu0 %449 }
 0x117   :  { %2975 = vmatpush1.bf16.msra.mxu0 %v3934_v57  ;;  %5734 = vst [vmem:[#allocation27_spill] sm:$0xff] %v3981_v34  ;;  %v3983_v21 = vpack.c.bf16 %v1649_v6, %v1647_v15 }
 0x118   :  { %2977 = vmatprep.subr.bf16.mxu0 %v3949_v35 }
 0x11a   :  { %v4030_v6 = vpop.permute.xlu0 %457 }
 0x11b   :  { %2979 = vmatpush1.bf16.msra.mxu0 %v3972_v52  ;;  %5736 = vst [vmem:[#allocation29_spill] sm:$0xff] %v4030_v6 }
 0x11c   :  { %2981 = vmatprep.subr.bf16.mxu0 %v3979_v45 }
 0x11e   :  { %v3347_v25 = vpop.eup %3346 }
 0x11f   :  { %v375_v39 = vmul.f32 %v3347_v25, %v370_v47  ;;  %2983 = vmatpush1.bf16.msra.mxu0 %v3983_v21 }
 0x121   :  { %v376_v47 = vmul.f32 %v375_v39, %v3833_v58  ;;  %v3976_v25 = vrot.slane %v375_v39, %v3937_v62 }
 0x123   :  { %v377_v9 = vsub.f32 %v371_v14, %v376_v47  ;;  %v3987_v61 = vmul.f32 %v3976_v25, %v3725_v27  ;;  %v382_v22 = vmul.f32 %v3976_v25, %v3572_v36  ;;  %v383_v58 = vmul.f32 %v3566_v33, %v3976_v25 }
 0x124   :  { %v384_v39 = vmul.f32 %v3976_v25, %v3582_v44  ;;  %v385_v32 = vmul.f32 %v3580_v42, %v3976_v25  ;;  %v386_v15 = vmul.f32 %v3976_v25, %v3595_v53  ;;  %v387_v16 = vmul.f32 %v3593_v51, %v3976_v25  ;;  %v4012_v44 = vpop.permute.xlu1 %461 }
 0x125   :  { %v4003_v27 = vrot.slane %v377_v9, %v3937_v62  ;;  %v388_v33 = vmul.f32 %v3976_v25, %v3609_v1  ;;  %v389_v36 = vmul.f32 %v3607_v63, %v3976_v25  ;;  %v390_v42 = vmul.f32 %v3976_v25, %v3623_v13  ;;  %5735 = vst [vmem:[#allocation28_spill] sm:$0xff] %v4012_v44 }
 0x126   :  { %v391_v51 = vmul.f32 %v3621_v11, %v3976_v25  ;;  %v392_v53 = vmul.f32 %v3976_v25, %v3639_v26  ;;  %v393_v9 = vmul.f32 %v3635_v23, %v3976_v25  ;;  %v394_v1 = vmul.f32 %v3976_v25, %v3652_v41 }
 0x127   :  { %v478_v63 = vmul.f32 %v4003_v27, %v3771_v0  ;;  %v479_v13 = vmul.f32 %v4003_v27, %v3798_v28  ;;  %v480_v43 = vmul.f32 %v4003_v27, %v3755_v54  ;;  %v481_v11 = vmul.f32 %v4003_v27, %v3791_v18 }
 0x128   :  { %v482_v23 = vmul.f32 %v4003_v27, %v3835_v60  ;;  %v483_v26 = vmul.f32 %v4003_v27, %v3818_v48  ;;  %v484_v41 = vmul.f32 %v4003_v27, %v3864_v31  ;;  %v485_v14 = vmul.f32 %v4003_v27, %v3857_v17 }
 0x129   :  { %v496_v47 = vadd.f32 %v478_v63, %v382_v22  ;;  %v497_v54 = vadd.f32 %v479_v13, %v383_v58  ;;  %v4041_v28 = vadd.f32 %v480_v43, %v384_v39  ;;  %v4043_v18 = vadd.f32 %v481_v11, %v385_v32  ;;  %v1652_v43 = vld [vmem:[%s5624_s5 + $0x1c8] sm:$0xff]  ;;  %v1654_v11 = vld [vmem:[%s5624_s5 + $0x1d8] sm:$0xff] }
 0x12a   :  { %v4045_v0 = vadd.f32 %v482_v23, %v386_v15  ;;  %v4047_v60 = vadd.f32 %v483_v26, %v387_v16  ;;  %v4049_v62 = vadd.f32 %v484_v41, %v388_v33  ;;  %v4051_v48 = vadd.f32 %v485_v14, %v389_v36  ;;  %v4068_v15 = vpop.permute.xlu1 %469  ;;  %v1651_v23 = vld [vmem:[%s5624_s5 + $0x1c0] sm:$0xff] }
 0x12b   :  { %2836 = vmatmul.mubr.msk.f32.vlgmr.msra.gmra.mrb[0].mxu1 %vm264_vm1, %v496_v47  ;;  %933 = vst.msk [vmem:[#allocation2 + $0x10] sm:$0xff] %vm264_vm1, %v496_v47  ;;  %934 = vst.msk [vmem:[#allocation2 + $0x18] sm:$0xff] %vm264_vm1, %v497_v54  ;;  %v486_v22 = vmul.f32 %v4003_v27, %v3899_v8  ;;  %v487_v58 = vmul.f32 %v4003_v27, %v3884_v50  ;;  %v488_v39 = vmul.f32 %v4003_v27, %v3931_v56  ;;  %v5738_v16 = vmov 0.0   ;;  %v1656_v47 = vld [vmem:[%s5624_s5 + $0x1e8] sm:$0xff] }
 0x12c   :  { %935 = vst.msk [vmem:[#allocation2 + $0x20] sm:$0xff] %vm264_vm1, %v4041_v28  ;;  %936 = vst.msk [vmem:[#allocation2 + $0x28] sm:$0xff] %vm264_vm1, %v4043_v18  ;;  %v489_v32 = vmul.f32 %v4003_v27, %v3921_v37  ;;  %646 = vmatprep.mubr.f32.mxu1 %v5738_v16  ;;  %v490_v33 = vmul.f32 %v4003_v27, %v3981_v34  ;;  %v395_v36 = vmul.f32 %v3649_v38, %v3976_v25 }
 0x12d   :  { %5737 = vst [vmem:[#allocation30_spill] sm:$0xff] %v4068_v15  ;;  %937 = vst.msk [vmem:[#allocation2 + $0x30] sm:$0xff] %vm264_vm1, %v4045_v0  ;;  %v491_v63 = vmul.f32 %v4003_v27, %v3969_v12  ;;  %v396_v13 = vmul.f32 %v3976_v25, %v3693_v5  ;;  %v4096_v26 = vadd.f32 %v486_v22, %v390_v42  ;;  %3016 = vmatpush1.bf16.msra.mxu1 %v3678_v59  ;;  %v1653_v5 = vld [vmem:[%s5624_s5 + $0x1d0] sm:$0xff]  ;;  %v1658_v42 = vld [vmem:[%s5624_s5 + $0x1f8] sm:$0xff] }
 0x12e   :  { %938 = vst.msk [vmem:[#allocation2 + $0x38] sm:$0xff] %vm264_vm1, %v4047_v60  ;;  %939 = vst.msk [vmem:[#allocation2 + $0x40] sm:$0xff] %vm264_vm1, %v4049_v62  ;;  %v4098_v38 = vadd.f32 %v487_v58, %v391_v51  ;;  %v4100_v41 = vadd.f32 %v488_v39, %v392_v53  ;;  %v4102_v14 = vadd.f32 %v489_v32, %v393_v9  ;;  %v4114_v51 = vpop.permute.xlu0 %465  ;;  %3001 = vmatprep.subr.bf16.mxu1 %v3691_v3  ;;  %v987_v58 = vld [vmem:[#allocation2 + $0x5] sm:$0xff] }
 0x12f   :  { %940 = vst.msk [vmem:[#allocation2 + $0x48] sm:$0xff] %vm264_vm1, %v4051_v48  ;;  %5739 = vst [vmem:[#allocation31_spill] sm:$0xff] %v4114_v51  ;;  %v4116_v53 = vadd.f32 %v490_v33, %v394_v1  ;;  %v4118_v9 = vadd.f32 %v491_v63, %v395_v36  ;;  %v492_v59 = vmul.f32 %v4003_v27, %v4030_v6  ;;  %2837 = vmatmul.mubr.msk.f32.gmra.mrb[2].mxu1 %vm264_vm1, %v497_v54  ;;  %v969_v39 = vld [vmem:[#allocation2 + $0x4] sm:$0xff] }
 0x130   :  { %v397_v22 = vmul.f32 %v3689_v2, %v3976_v25  ;;  %941 = vst.msk [vmem:[#allocation2 + $0x50] sm:$0xff] %vm264_vm1, %v4096_v26  ;;  %942 = vst.msk [vmem:[#allocation2 + $0x58] sm:$0xff] %vm264_vm1, %v4098_v38  ;;  %v493_v1 = vmul.f32 %v4003_v27, %v4012_v44  ;;  %v494_v2 = vmul.f32 %v4003_v27, %v4114_v51  ;;  %652 = vmatprep.mubr.f32.mxu1 %v5738_v16  ;;  %v1663_v51 = vld [vmem:[%s5624_s5 + $0x220] sm:$0xff] }
 0x131   :  { %943 = vst.msk [vmem:[#allocation2 + $0x60] sm:$0xff] %vm264_vm1, %v4100_v41  ;;  %944 = vst.msk [vmem:[#allocation2 + $0x68] sm:$0xff] %vm264_vm1, %v4102_v14  ;;  %v399_v3 = vmul.f32 %v3723_v24, %v3976_v25  ;;  %v495_v54 = vmul.f32 %v4003_v27, %v4068_v15  ;;  %v4147_v32 = vadd.f32 %v492_v59, %v396_v13  ;;  %3017 = vmatpush1.bf16.msra.mxu1 %v3696_v7  ;;  %v1655_v13 = vld [vmem:[%s5624_s5 + $0x1e0] sm:$0xff] }
 0x132   :  { %945 = vst.msk [vmem:[#allocation2 + $0x70] sm:$0xff] %vm264_vm1, %v4116_v53  ;;  %946 = vst.msk [vmem:[#allocation2 + $0x78] sm:$0xff] %vm264_vm1, %v4118_v9  ;;  %v4149_v33 = vpack.c.bf16 %v1654_v11, %v1652_v43  ;;  %v4151_v36 = vpack.c.bf16 %v1653_v5, %v1651_v23  ;;  %v4153_v24 = vpack.c.bf16 %v1658_v42, %v1656_v47  ;;  %v1657_v43 = vld [vmem:[%s5624_s5 + $0x1f0] sm:$0xff]  ;;  %3002 = vmatprep.subr.bf16.mxu1 %v3715_v19  ;;  %v1660_v19 = vld [vmem:[%s5624_s5 + $0x208] sm:$0xff] }
 0x133   :  { %v4155_v25 = vadd.f32 %v493_v1, %v397_v22  ;;  %v4158_v27 = vadd.f32 %v494_v2, %v3987_v61  ;;  %v4160_v63 = vadd.f32 %v495_v54, %v399_v3  ;;  %v4169_v11 = vld [vmem:[#allocation2 + $0x1b] sm:$0xff]  ;;  %v1041_v23 = vld [vmem:[#allocation2 + $0x11] sm:$0xff]  ;;  %947 = vst.msk [vmem:[#allocation2 + $0x80] sm:$0xff] %vm264_vm1, %v4147_v32  ;;  %2838 = vmatmul.mubr.msk.f32.gmra.mrb[4].mxu1 %vm264_vm1, %v4041_v28  ;;  %v4203_v54 = vld [vmem:[#allocation2 + $0x23] sm:$0xff] }
 0x134   :  { %2985 = vmatprep.subr.bf16.mxu0 %v4149_v33  ;;  %v3081_v7 = vpack.i.bf16 %v987_v58, %v4169_v11  ;;  %v3076_v61 = vpack.i.bf16 %v969_v39, %v1041_v23  ;;  %v4178_v5 = vld [vmem:[#allocation2 + $0x1c] sm:$0xff]  ;;  %658 = vmatprep.mubr.f32.mxu1 %v5738_v16  ;;  %v1005_v47 = vld [vmem:[#allocation2 + $0xf] sm:$0xff]  ;;  %v4195_v22 = vpack.c.bf16 %v1657_v43, %v1655_v13  ;;  %v973_v39 = vld [vmem:[#allocation2 + $0x24] sm:$0xff] }
 0x135   :  { %948 = vst.msk [vmem:[#allocation2 + $0x88] sm:$0xff] %vm264_vm1, %v4155_v25  ;;  %949 = vst.msk [vmem:[#allocation2 + $0x90] sm:$0xff] %vm264_vm1, %v4158_v27  ;;  %2987 = vmatpush1.bf16.msra.mxu0 %v4151_v36  ;;  %v1662_v28 = vld [vmem:[%s5624_s5 + $0x218] sm:$0xff]  ;;  %v970_v42 = vld [vmem:[#allocation2 + $0xc] sm:$0xff]  ;;  %3018 = vmatpush1.bf16.msra.mxu1 %v3728_v29  ;;  %v3086_v2 = vpack.i.bf16 %v1005_v47, %v4178_v5 }
 0x136   :  { %950 = vst.msk [vmem:[#allocation2 + $0x98] sm:$0xff] %vm264_vm1, %v4160_v63  ;;  %v1042_v59 = vld [vmem:[#allocation2 + $0x19] sm:$0xff]  ;;  %2989 = vmatprep.subr.bf16.mxu0 %v4153_v24  ;;  %3082 = vrot.lane.b32.xlu1 %v3081_v7, %s3400_s19  ;;  %v2992_v1 = vpack.c.bf16 %v1662_v28, %v1660_v19  ;;  %v988_v58 = vld [vmem:[#allocation2 + $0xd] sm:$0xff]  ;;  %v1043_v43 = vld [vmem:[#allocation2 + $0x21] sm:$0xff] }
 0x137   :  { %3077 = vrot.lane.b32.xlu0 %v3076_v61, %s3401_s20  ;;  %2839 = vmatmul.mubr.msk.f32.gmra.mrb[6].mxu1 %vm264_vm1, %v4043_v18  ;;  %v3091_v3 = vpack.i.bf16 %v970_v42, %v1042_v59  ;;  %v1006_v13 = vld [vmem:[#allocation2 + $0x17] sm:$0xff]  ;;  %v3096_v29 = vpack.i.bf16 %v988_v58, %v4203_v54  ;;  %v4216_v23 = vld [vmem:[#allocation2 + $0x2b] sm:$0xff]  ;;  %v1007_v61 = vld [vmem:[#allocation2 + $0x1f] sm:$0xff] }
 0x138   :  { %3003 = vmatprep.subr.bf16.mxu1 %v3747_v46  ;;  %664 = vmatprep.mubr.f32.mxu1 %v5738_v16  ;;  %v3101_v46 = vpack.i.bf16 %v1006_v13, %v973_v39  ;;  %v971_v18 = vld [vmem:[#allocation2 + $0x14] sm:$0xff]  ;;  %v1044_v19 = vld [vmem:[#allocation2 + $0x29] sm:$0xff]  ;;  %v976_v58 = vld [vmem:[#allocation2 + $0x3c] sm:$0xff] }
 0x139   :  { %2991 = vmatpush1.bf16.msra.mxu0 %v4195_v22  ;;  %3019 = vmatpush1.bf16.msra.mxu1 %v3758_v55  ;;  %v989_v7 = vld [vmem:[#allocation2 + $0x15] sm:$0xff]  ;;  %v3106_v55 = vpack.i.bf16 %v971_v18, %v1043_v43  ;;  %v1008_v42 = vld [vmem:[#allocation2 + $0x27] sm:$0xff] }
 0x13a   :  { %3092 = vrot.lane.b32.xlu1 %v3091_v3, %s3401_s20  ;;  %2993 = vmatprep.subr.bf16.mxu0 %v2992_v1  ;;  %v4232_v28 = vld [vmem:[#allocation2 + $0x33] sm:$0xff]  ;;  %v4247_v59 = vld [vmem:[#allocation2 + $0x3b] sm:$0xff]  ;;  %v4249_v1 = vld [vmem:[#allocation2 + $0x25] sm:$0xff] }
 0x13b   :  { %3087 = vrot.lane.b32.xlu0 %v3086_v2, %s3402_s1  ;;  %2840 = vmatmul.mubr.msk.f32.gmra.mrb[8].mxu1 %vm264_vm1, %v4045_v0  ;;  %v3111_v0 = vpack.i.bf16 %v989_v7, %v4216_v23  ;;  %v975_v47 = vld [vmem:[#allocation2 + $0x34] sm:$0xff]  ;;  %v3141_v2 = vpack.i.bf16 %v4249_v1, %v4247_v59  ;;  %v4265_v18 = vld [vmem:[#allocation2 + $0x43] sm:$0xff] }
 0x13c   :  { %3004 = vmatprep.subr.bf16.mxu1 %v3773_v4  ;;  %670 = vmatprep.mubr.f32.mxu1 %v5738_v16  ;;  %v974_v4 = vld [vmem:[#allocation2 + $0x2c] sm:$0xff]  ;;  %v5742_v3 = vld [vmem:[#allocation12_spill] sm:$0xff] }
 0x13d   :  { %3020 = vmatpush1.bf16.msra.mxu1 %v3779_v10  ;;  %v3116_v10 = vpack.i.bf16 %v1007_v61, %v974_v4  ;;  %v1009_v13 = vld [vmem:[#allocation2 + $0x2f] sm:$0xff]  ;;  %v5745_v61 = vld [vmem:[#allocation17_spill] sm:$0xff] }
 0x13e   :  { %3102 = vrot.lane.b32.xlu1 %v3101_v46, %s3402_s1  ;;  %3005 = vmatprep.subr.bf16.mxu1 %v3793_v20  ;;  %v4236_v20 = vld [vmem:[#allocation2 + $0x1d] sm:$0xff]  ;;  %v5743_v46 = vld [vmem:[#allocation14_spill] sm:$0xff]  ;;  %v5744_v43 = vld [vmem:[#allocation15_spill] sm:$0xff] }
 0x13f   :  { %3097 = vrot.lane.b32.xlu0 %v3096_v29, %s3400_s19  ;;  %2841 = vmatmul.mubr.msk.f32.gmra.mrb[10].mxu1 %vm264_vm1, %v4047_v60  ;;  %v3121_v60 = vpack.i.bf16 %v4178_v5, %v1044_v19  ;;  %v1045_v5 = vld [vmem:[#allocation2 + $0x31] sm:$0xff]  ;;  %v1046_v29 = vld [vmem:[#allocation2 + $0x39] sm:$0xff] }
 0x140   :  { %676 = vmatprep.mubr.f32.mxu1 %v5738_v16  ;;  %v4269_v7 = vld [vmem:[#allocation2 + $0x2d] sm:$0xff] }
 0x141   :  { %3021 = vmatpush1.bf16.msra.mxu1 %v3801_v30  ;;  %v3126_v30 = vpack.i.bf16 %v4236_v20, %v4232_v28  ;;  %v5746_v19 = vld [vmem:[#allocation19_spill] sm:$0xff] }
 0x142   :  { %3112 = vrot.lane.b32.xlu1 %v3111_v0, %s3400_s19  ;;  %3006 = vmatprep.subr.bf16.mxu1 %v3813_v40  ;;  %v5740_v40 = vld [vmem:[#allocation9_spill] sm:$0xff]  ;;  %v1010_v0 = vld [vmem:[#allocation2 + $0x37] sm:$0xff] }
 0x143   :  { %3107 = vrot.lane.b32.xlu0 %v3106_v55, %s3401_s20  ;;  %2842 = vmatmul.mubr.msk.f32.gmra.mrb[12].mxu1 %vm264_vm1, %v4049_v62  ;;  %v3131_v62 = vpack.i.bf16 %v1008_v42, %v975_v47  ;;  %v977_v55 = vld [vmem:[#allocation2 + $0x44] sm:$0xff]  ;;  %v4282_v42 = vld [vmem:[#allocation2 + $0x35] sm:$0xff] }
 0x144   :  { %682 = vmatprep.mubr.f32.mxu1 %v5738_v16 }
 0x145   :  { %3022 = vmatpush1.bf16.msra.mxu1 %v3821_v49  ;;  %v5741_v49 = vld [vmem:[#allocation10_spill] sm:$0xff] }
 0x146   :  { %3122 = vrot.lane.b32.xlu1 %v3121_v60, %s3401_s20  ;;  %3007 = vmatprep.subr.bf16.mxu1 %v5740_v40  ;;  %v4280_v60 = vld [vmem:[#allocation2 + $0x4b] sm:$0xff] }
 0x147   :  { %3117 = vrot.lane.b32.xlu0 %v3116_v10, %s3402_s1  ;;  %2843 = vmatmul.mubr.msk.f32.gmra.mrb[14].mxu1 %vm264_vm1, %v4051_v48  ;;  %v3136_v48 = vpack.i.bf16 %v973_v39, %v1045_v5  ;;  %v3151_v39 = vpack.i.bf16 %v974_v4, %v1046_v29  ;;  %v3161_v4 = vpack.i.bf16 %v1010_v0, %v977_v55  ;;  %v1047_v10 = vld [vmem:[#allocation2 + $0x41] sm:$0xff]  ;;  %v5748_v40 = vld [vmem:[#allocation23_spill] sm:$0xff] }
 0x148   :  { %688 = vmatprep.mubr.f32.mxu1 %v5738_v16  ;;  %v978_v5 = vld [vmem:[#allocation2 + $0x4c] sm:$0xff]  ;;  %v1014_v0 = vld [vmem:[#allocation2 + $0x57] sm:$0xff] }
 0x149   :  { %3023 = vmatpush1.bf16.msra.mxu1 %v5741_v49  ;;  %v1011_v49 = vld [vmem:[#allocation2 + $0x3f] sm:$0xff]  ;;  %v1012_v29 = vld [vmem:[#allocation2 + $0x47] sm:$0xff] }
 0x14a   :  { %3132 = vrot.lane.b32.xlu1 %v3131_v62, %s3402_s1  ;;  %3008 = vmatprep.subr.bf16.mxu1 %v5742_v3  ;;  %v3171_v62 = vpack.i.bf16 %v4282_v42, %v4280_v60  ;;  %v4302_v3 = vld [vmem:[#allocation2 + $0x3d] sm:$0xff] }
 0x14b   :  { %3127 = vrot.lane.b32.xlu0 %v3126_v30, %s3400_s19  ;;  %2844 = vmatmul.mubr.msk.f32.gmra.mrb[16].mxu1 %vm264_vm1, %v4096_v26  ;;  %v3146_v26 = vpack.i.bf16 %v1009_v13, %v976_v58  ;;  %v5747_v30 = vld [vmem:[#allocation20_spill] sm:$0xff] }
 0x14c   :  { %694 = vmatprep.mubr.f32.mxu1 %v5738_v16  ;;  %v979_v13 = vld [vmem:[#allocation2 + $0x54] sm:$0xff] }
 0x14d   :  { %3024 = vmatpush1.bf16.msra.mxu1 %v5743_v46  ;;  %v4315_v46 = vld [vmem:[#allocation2 + $0x45] sm:$0xff] }
 0x14e   :  { %3142 = vrot.lane.b32.xlu1 %v3141_v2, %s3400_s19  ;;  %3009 = vmatprep.subr.bf16.mxu1 %v5744_v43  ;;  %v4298_v2 = vld [vmem:[#allocation2 + $0x53] sm:$0xff]  ;;  %v4331_v43 = vld [vmem:[#allocation2 + $0x63] sm:$0xff] }
 0x14f   :  { %3137 = vrot.lane.b32.xlu0 %v3136_v48, %s3401_s20  ;;  %2845 = vmatmul.mubr.msk.f32.gmra.mrb[18].mxu1 %vm264_vm1, %v4098_v38  ;;  %v3156_v38 = vpack.i.bf16 %v4269_v7, %v4265_v18  ;;  %v1048_v48 = vld [vmem:[#allocation2 + $0x49] sm:$0xff] }
 0x150   :  { %700 = vmatprep.mubr.f32.mxu1 %v5738_v16 }
 0x151   :  { %3025 = vmatpush1.bf16.msra.mxu1 %v5745_v61  ;;  %v4345_v61 = vld [vmem:[#allocation2 + $0x6b] sm:$0xff] }
 0x152   :  { %3152 = vrot.lane.b32.xlu1 %v3151_v39, %s3401_s20  ;;  %3010 = vmatprep.subr.bf16.mxu1 %v5746_v19  ;;  %v1050_v39 = vld [vmem:[#allocation2 + $0x59] sm:$0xff] }
 0x153   :  { %3147 = vrot.lane.b32.xlu0 %v3146_v26, %s3402_s1  ;;  %2846 = vmatmul.mubr.msk.f32.gmra.mrb[20].mxu1 %vm264_vm1, %v4100_v41  ;;  %v3166_v41 = vpack.i.bf16 %v975_v47, %v1047_v10  ;;  %v3181_v47 = vpack.i.bf16 %v976_v58, %v1048_v48  ;;  %v4313_v58 = vld [vmem:[#allocation2 + $0x5b] sm:$0xff]  ;;  %v1013_v26 = vld [vmem:[#allocation2 + $0x4f] sm:$0xff] }
 0x154   :  { %706 = vmatprep.mubr.f32.mxu1 %v5738_v16  ;;  %v1015_v19 = vld [vmem:[#allocation2 + $0x5f] sm:$0xff]  ;;  %v1052_v10 = vld [vmem:[#allocation2 + $0x69] sm:$0xff] }
 0x155   :  { %3026 = vmatpush1.bf16.msra.mxu1 %v5747_v30 }
 0x156   :  { %3162 = vrot.lane.b32.xlu1 %v3161_v4, %s3402_s1  ;;  %3011 = vmatprep.subr.bf16.mxu1 %v5748_v40  ;;  %v982_v4 = vld [vmem:[#allocation2 + $0x6c] sm:$0xff]  ;;  %v4359_v40 = vld [vmem:[#allocation2 + $0x5d] sm:$0xff] }
 0x157   :  { %3157 = vrot.lane.b32.xlu0 %v3156_v38, %s3400_s19  ;;  %2847 = vmatmul.mubr.msk.f32.gmra.mrb[22].mxu1 %vm264_vm1, %v4102_v14  ;;  %v3176_v14 = vpack.i.bf16 %v1011_v49, %v978_v5  ;;  %v4347_v38 = vld [vmem:[#allocation2 + $0x55] sm:$0xff]  ;;  %v3236_v30 = vpack.i.bf16 %v1015_v19, %v982_v4  ;;  %v1016_v49 = vld [vmem:[#allocation2 + $0x67] sm:$0xff]  ;;  %v1019_v19 = vld [vmem:[#allocation2 + $0x7f] sm:$0xff] }
 0x158   :  { %712 = vmatprep.mubr.f32.mxu1 %v5738_v16 }
 0x159   :  { %3027 = vmatpush1.bf16.msra.mxu1 %v3934_v57  ;;  %v3186_v57 = vpack.i.bf16 %v4302_v3, %v4298_v2 }
 0x15a   :  { %3172 = vrot.lane.b32.xlu1 %v3171_v62, %s3400_s19  ;;  %3012 = vmatprep.subr.bf16.mxu1 %v3949_v35  ;;  %v1049_v35 = vld [vmem:[#allocation2 + $0x51] sm:$0xff] }
 0x15b   :  { %3167 = vrot.lane.b32.xlu0 %v3166_v41, %s3401_s20  ;;  %2848 = vmatmul.mubr.msk.f32.gmra.mrb[24].mxu1 %vm264_vm1, %v4116_v53  ;;  %v3191_v53 = vpack.i.bf16 %v1012_v29, %v979_v13  ;;  %v4357_v62 = vld [vmem:[#allocation2 + $0x73] sm:$0xff] }
 0x15c   :  { %718 = vmatprep.mubr.f32.mxu1 %v5738_v16 }
 0x15d   :  { %3028 = vmatpush1.bf16.msra.mxu1 %v3972_v52  ;;  %v3196_v52 = vpack.i.bf16 %v977_v55, %v1049_v35  ;;  %v981_v55 = vld [vmem:[#allocation2 + $0x64] sm:$0xff]  ;;  %v1017_v35 = vld [vmem:[#allocation2 + $0x6f] sm:$0xff] }
 0x15e   :  { %3182 = vrot.lane.b32.xlu1 %v3181_v47, %s3401_s20  ;;  %3013 = vmatprep.subr.bf16.mxu1 %v3979_v45  ;;  %v3201_v45 = vpack.i.bf16 %v4315_v46, %v4313_v58  ;;  %v4365_v47 = vld [vmem:[#allocation2 + $0x7b] sm:$0xff] }
 0x15f   :  { %3177 = vrot.lane.b32.xlu0 %v3176_v14, %s3402_s1  ;;  %2849 = vmatmul.mubr.msk.f32.gmra.mrb[26].mxu1 %vm264_vm1, %v4118_v9  ;;  %v980_v9 = vld [vmem:[#allocation2 + $0x5c] sm:$0xff]  ;;  %v1053_v14 = vld [vmem:[#allocation2 + $0x71] sm:$0xff] }
 0x160   :  { %724 = vmatprep.mubr.f32.mxu1 %v5738_v16  ;;  %v3241_v41 = vpack.i.bf16 %v980_v9, %v1052_v10  ;;  %v3256_v29 = vpack.i.bf16 %v981_v55, %v1053_v14  ;;  %v1056_v10 = vld [vmem:[#allocation2 + $0x89] sm:$0xff]  ;;  %v1062_v14 = vld [vmem:[#allocation2 + $0x94] sm:$0xff] }
 0x161   :  { %3029 = vmatpush1.bf16.msra.mxu1 %v3983_v21  ;;  %v3206_v21 = vpack.i.bf16 %v1013_v26, %v980_v9  ;;  %v4375_v26 = vld [vmem:[#allocation2 + $0x83] sm:$0xff] }
 0x162   :  { %3192 = vrot.lane.b32.xlu1 %v3191_v53, %s3402_s1  ;;  %3014 = vmatprep.subr.bf16.mxu1 %v4149_v33  ;;  %v4335_v33 = vld [vmem:[#allocation2 + $0x4d] sm:$0xff]  ;;  %v984_v53 = vld [vmem:[#allocation2 + $0x7c] sm:$0xff] }
 0x163   :  { %3187 = vrot.lane.b32.xlu0 %v3186_v57, %s3400_s19  ;;  %2850 = vmatmul.mubr.msk.f32.gmra.mrb[28].mxu1 %vm264_vm1, %v4147_v32  ;;  %v3211_v32 = vpack.i.bf16 %v978_v5, %v1050_v39  ;;  %v983_v5 = vld [vmem:[#allocation2 + $0x74] sm:$0xff] }
 0x164   :  { %730 = vmatprep.mubr.f32.mxu1 %v5738_v16  ;;  %v3251_v48 = vpack.i.bf16 %v1016_v49, %v983_v5  ;;  %v4377_v39 = vld [vmem:[#allocation2 + $0x6d] sm:$0xff]  ;;  %v4393_v49 = vld [vmem:[#allocation2 + $0x7d] sm:$0xff] }
 0x165   :  { %3030 = vmatpush1.bf16.msra.mxu1 %v4151_v36  ;;  %v3216_v36 = vpack.i.bf16 %v4335_v33, %v4331_v43 }
 0x166   :  { %3202 = vrot.lane.b32.xlu1 %v3201_v45, %s3400_s19  ;;  %3015 = vmatprep.subr.bf16.mxu1 %v4153_v24  ;;  %v1051_v24 = vld [vmem:[#allocation2 + $0x61] sm:$0xff]  ;;  %v3266_v45 = vpack.i.bf16 %v1017_v35, %v984_v53 }
 0x167   :  { %3197 = vrot.lane.b32.xlu0 %v3196_v52, %s3401_s20  ;;  %2851 = vmatmul.mubr.msk.f32.gmra.mrb[30].mxu1 %vm264_vm1, %v4155_v25  ;;  %v3221_v25 = vpack.i.bf16 %v1014_v0, %v981_v55  ;;  %v1054_v52 = vld [vmem:[#allocation2 + $0x79] sm:$0xff]  ;;  %v3276_v55 = vpack.i.bf16 %v4377_v39, %v4375_v26  ;;  %v4398_v35 = vld [vmem:[#allocation2 + $0x85] sm:$0xff] }
 0x168   :  { %736 = vmatprep.mubr.f32.mxu1 %v5738_v16  ;;  %v3271_v9 = vpack.i.bf16 %v982_v4, %v1054_v52  ;;  %v986_v4 = vld [vmem:[#allocation2 + $0x8c] sm:$0xff]  ;;  %v1060_v52 = vld [vmem:[#allocation2 + $0x9b] sm:$0xff] }
 0x169   :  { %3031 = vmatpush1.bf16.msra.mxu1 %v4195_v22  ;;  %v3226_v22 = vpack.i.bf16 %v979_v13, %v1051_v24  ;;  %v4367_v13 = vld [vmem:[#allocation2 + $0x65] sm:$0xff]  ;;  %v4385_v24 = vld [vmem:[#allocation2 + $0x75] sm:$0xff] }
 0x16a   :  { %3212 = vrot.lane.b32.xlu1 %v3211_v32, %s3401_s20  ;;  %v3261_v57 = vpack.i.bf16 %v4367_v13, %v4365_v47  ;;  %v1018_v32 = vld [vmem:[#allocation2 + $0x77] sm:$0xff] }
 0x16b   :  { %3207 = vrot.lane.b32.xlu0 %v3206_v21, %s3402_s1  ;;  %2852 = vmatmul.mubr.msk.f32.gmra.mrb[32].mxu1 %vm264_vm1, %v4158_v27  ;;  %v3231_v27 = vpack.i.bf16 %v4347_v38, %v4345_v61  ;;  %v985_v21 = vld [vmem:[#allocation2 + $0x84] sm:$0xff] }
 0x16c   :  { %742 = vmatprep.mubr.f32.mxu1 %v5738_v16  ;;  %v3281_v0 = vpack.i.bf16 %v1018_v32, %v985_v21  ;;  %v1063_v32 = vld [vmem:[#allocation2 + $0x9c] sm:$0xff] }
 0x16e   :  { %3222 = vrot.lane.b32.xlu1 %v3221_v25, %s3402_s1  ;;  %v4383_v25 = vld [vmem:[#allocation2 + $0x8b] sm:$0xff] }
 0x16f   :  { %3217 = vrot.lane.b32.xlu0 %v3216_v36, %s3400_s19  ;;  %2853 = vmatmul.mubr.msk.f32.gmra.mrb[34].mxu1 %vm264_vm1, %v4160_v63  ;;  %v3246_v63 = vpack.i.bf16 %v4359_v40, %v4357_v62  ;;  %v1055_v36 = vld [vmem:[#allocation2 + $0x81] sm:$0xff] }
 0x172   :  { %3232 = vrot.lane.b32.xlu1 %v3231_v27, %s3400_s19  ;;  %v3291_v27 = vpack.i.bf16 %v4385_v24, %v4383_v25 }
 0x173   :  { %3227 = vrot.lane.b32.xlu0 %v3226_v22, %s3401_s20  ;;  %v3286_v22 = vpack.i.bf16 %v983_v5, %v1055_v36 }
 0x176   :  { %3242 = vrot.lane.b32.xlu1 %v3241_v41, %s3401_s20  ;;  %v3301_v41 = vpack.i.bf16 %v984_v53, %v1056_v10  ;;  %v1064_v10 = vld [vmem:[#allocation2 + $0xa4] sm:$0xff] }
 0x177   :  { %3237 = vrot.lane.b32.xlu0 %v3236_v30, %s3402_s1  ;;  %v3296_v30 = vpack.i.bf16 %v1019_v19, %v986_v4  ;;  %v1022_v19 = vld [vmem:[#allocation2 + $0x97] sm:$0xff] }
 0x17a   :  { %3252 = vrot.lane.b32.xlu1 %v3251_v48, %s3402_s1  ;;  %v1020_v48 = vld [vmem:[#allocation2 + $0x87] sm:$0xff] }
 0x17b   :  { %3247 = vrot.lane.b32.xlu0 %v3246_v63, %s3400_s19  ;;  %v1059_v63 = vld [vmem:[#allocation2 + $0x93] sm:$0xff] }
 0x17c   :  { %v3306_v5 = vpack.i.bf16 %v4393_v49, %v1059_v63  ;;  %v951_v63 = vld [vmem:[#allocation2 + $0x3] sm:$0xff] }
 0x17e   :  { %3262 = vrot.lane.b32.xlu1 %v3261_v57, %s3400_s19  ;;  %v1057_v57 = vld [vmem:[#allocation2 + $0x91] sm:$0xff] }
 0x17f   :  { %3257 = vrot.lane.b32.xlu0 %v3256_v29, %s3401_s20  ;;  %v3311_v29 = vpack.i.bf16 %v1020_v48, %v1062_v14  ;;  %v3316_v53 = vpack.i.bf16 %v985_v21, %v1057_v57  ;;  %v1023_v57 = vld [vmem:[#allocation2 + $0x10] sm:$0xff] }
 0x182   :  { %3272 = vrot.lane.b32.xlu1 %v3271_v9, %s3401_s20  ;;  %v1021_v9 = vld [vmem:[#allocation2 + $0x8f] sm:$0xff] }
 0x183   :  { %3267 = vrot.lane.b32.xlu0 %v3266_v45, %s3402_s1  ;;  %v3321_v45 = vpack.i.bf16 %v4398_v35, %v1060_v52  ;;  %v1659_v52 = vld [vmem:[%s5624_s5 + $0x200] sm:$0xff] }
 0x186   :  { %3282 = vrot.lane.b32.xlu1 %v3281_v0, %s3402_s1  ;;  %v3326_v0 = vpack.i.bf16 %v1021_v9, %v1063_v32 }
 0x187   :  { %3277 = vrot.lane.b32.xlu0 %v3276_v55, %s3400_s19  ;;  %v1058_v55 = vld [vmem:[#allocation2 + $0x99] sm:$0xff] }
 0x188   :  { %v3331_v36 = vpack.i.bf16 %v986_v4, %v1058_v55 }
 0x18a   :  { %3292 = vrot.lane.b32.xlu1 %v3291_v27, %s3400_s19  ;;  %v4405_v27 = vld [vmem:[#allocation2 + $0x8d] sm:$0xff] }
 0x18b   :  { %3287 = vrot.lane.b32.xlu0 %v3286_v22, %s3401_s20  ;;  %v1061_v22 = vld [vmem:[#allocation2 + $0xa3] sm:$0xff] }
 0x18c   :  { %v3336_v21 = vpack.i.bf16 %v4405_v27, %v1061_v22 }
 0x18e   :  { %3302 = vrot.lane.b32.xlu1 %v3301_v41, %s3401_s20 }
 0x18f   :  { %3297 = vrot.lane.b32.xlu0 %v3296_v30, %s3402_s1  ;;  %v3341_v30 = vpack.i.bf16 %v1022_v19, %v1064_v10 }
 0x192   :  { %3312 = vrot.lane.b32.xlu1 %v3311_v29, %s3402_s1 }
 0x193   :  { %3307 = vrot.lane.b32.xlu0 %v3306_v5, %s3400_s19 }
 0x196   :  { %3322 = vrot.lane.b32.xlu1 %v3321_v45, %s3400_s19 }
 0x197   :  { %3317 = vrot.lane.b32.xlu0 %v3316_v53, %s3401_s20  ;;  %v1661_v53 = vld [vmem:[%s5624_s5 + $0x210] sm:$0xff] }
 0x198   :  { %v2994_v10 = vpack.c.bf16 %v1661_v53, %v1659_v52  ;;  %v1665_v52 = vld [vmem:[%s5624_s5 + $0x230] sm:$0xff] }
 0x19a   :  { %3332 = vrot.lane.b32.xlu1 %v3331_v36, %s3401_s20  ;;  %v1666_v36 = vld [vmem:[%s5624_s5 + $0x238] sm:$0xff] }
 0x19b   :  { %3327 = vrot.lane.b32.xlu0 %v3326_v0, %s3402_s1  ;;  %v1664_v0 = vld [vmem:[%s5624_s5 + $0x228] sm:$0xff] }
 0x19e   :  { %3342 = vrot.lane.b32.xlu1 %v3341_v30, %s3402_s1 }
 0x19f   :  { %3337 = vrot.lane.b32.xlu0 %v3336_v21, %s3400_s19 }
 0x1a8   :  { %v3083_v41 = vpop.permute.xlu1 %3082 }
 0x1a9   :  { %v3078_v48 = vpop.permute.xlu0 %3077  ;;  %v3085_v5 = vunpack.i.h.bf16 %v3083_v41  ;;  %v3084_v29 = vunpack.i.l.bf16 %v3083_v41 }
 0x1aa   :  { %v3080_v4 = vunpack.i.h.bf16 %v3078_v48  ;;  %v3079_v14 = vunpack.i.l.bf16 %v3078_v48 }
 0x1ac   :  { %v1485_v45 = vsel %vm264_vm1, %v951_v63, %v3080_v4  ;;  %v1541_v9 = vsel %vm264_vm1, %v1023_v57, %v3079_v14  ;;  %v3093_v55 = vpop.permute.xlu1 %3092  ;;  %v2996_v14 = vpack.c.bf16 %v1666_v36, %v1664_v0 }
 0x1ad   :  { %v3088_v32 = vpop.permute.xlu0 %3087  ;;  %v3095_v21 = vunpack.i.h.bf16 %v3093_v55  ;;  %v3094_v30 = vunpack.i.l.bf16 %v3093_v55  ;;  %v1559_v41 = vsel %vm1503_vm3, %v1541_v9, %v3084_v29  ;;  %v1504_v63 = vsel %vm1503_vm3, %v1485_v45, %v3085_v5  ;;  %v1024_v45 = vld [vmem:[#allocation2 + $0x18] sm:$0xff] }
 0x1ae   :  { %v3090_v22 = vunpack.i.h.bf16 %v3088_v32  ;;  %v3089_v19 = vunpack.i.l.bf16 %v3088_v32  ;;  %v952_v32 = vld [vmem:[#allocation2 + $0xb] sm:$0xff] }
 0x1af   :  { %v1542_v55 = vsel %vm264_vm1, %v1024_v45, %v3094_v30  ;;  %v1486_v0 = vsel %vm264_vm1, %v952_v32, %v3095_v21  ;;  %v1025_v21 = vld [vmem:[#allocation2 + $0x20] sm:$0xff] }
 0x1b0   :  { %v1577_v48 = vsel %vm1522_vm4, %v1559_v41, %v3089_v19  ;;  %v1523_v4 = vsel %vm1522_vm4, %v1504_v63, %v3090_v22  ;;  %v3103_v15 = vpop.permute.xlu1 %3102  ;;  %v2998_v19 = vpack.c.bf16 %v1665_v52, %v1663_v51 }
 0x1b1   :  { %1770 = vmatprep.mubr.f32.mxu0 %v1577_v48  ;;  %v3098_v57 = vpop.permute.xlu0 %3097  ;;  %v3105_v9 = vunpack.i.h.bf16 %v3103_v15  ;;  %v3104_v5 = vunpack.i.l.bf16 %v3103_v15 }
 0x1b2   :  { %v3100_v53 = vunpack.i.h.bf16 %v3098_v57  ;;  %v3099_v29 = vunpack.i.l.bf16 %v3098_v57  ;;  %1771 = vmatmul.mubr.f32.vlgmr.msra.gmra.mrb[18].mxu0 %v1523_v4 }
 0x1b3   :  { %2995 = vmatpush1.bf16.msra.mxu0 %v2994_v10  ;;  %v953_v10 = vld [vmem:[#allocation2 + $0x13] sm:$0xff] }
 0x1b4   :  { %v1560_v36 = vsel %vm1503_vm3, %v1542_v55, %v3099_v29  ;;  %v1505_v22 = vsel %vm1503_vm3, %v1486_v0, %v3100_v53  ;;  %2997 = vmatprep.subr.bf16.mxu0 %v2996_v14  ;;  %v3113_v63 = vpop.permute.xlu1 %3112 }
 0x1b5   :  { %v3108_v41 = vpop.permute.xlu0 %3107  ;;  %v1578_v48 = vsel %vm1522_vm4, %v1560_v36, %v3104_v5  ;;  %v1524_v15 = vsel %vm1522_vm4, %v1505_v22, %v3105_v9  ;;  %v3115_v44 = vunpack.i.h.bf16 %v3113_v63  ;;  %v3114_v30 = vunpack.i.l.bf16 %v3113_v63 }
 0x1b6   :  { %v3110_v4 = vunpack.i.h.bf16 %v3108_v41  ;;  %v3109_v57 = vunpack.i.l.bf16 %v3108_v41  ;;  %1776 = vmatprep.mubr.f32.mxu0 %v1578_v48 }
 0x1b7   :  { %1777 = vmatmul.mubr.f32.gmra.mrb[20].mxu0 %v1524_v15  ;;  %v1026_v15 = vld [vmem:[#allocation2 + $0x28] sm:$0xff] }
 0x1b8   :  { %v1487_v29 = vsel %vm264_vm1, %v953_v10, %v3110_v4  ;;  %2999 = vmatpush1.bf16.msra.mxu0 %v2998_v19  ;;  %1943 = vmatprep.mubr.f32.mxu0 %v5738_v16  ;;  %v1543_v51 = vsel %vm264_vm1, %v1025_v21, %v3109_v57  ;;  %v3123_v52 = vpop.permute.xlu1 %3122 }
 0x1b9   :  { %v3118_v14 = vpop.permute.xlu0 %3117  ;;  %v1506_v9 = vsel %vm1503_vm3, %v1487_v29, %v3115_v44  ;;  %v3125_v45 = vunpack.i.h.bf16 %v3123_v52  ;;  %v3124_v32 = vunpack.i.l.bf16 %v3123_v52  ;;  %v1561_v55 = vsel %vm1503_vm3, %v1543_v51, %v3114_v30 }
 0x1ba   :  { %v3120_v53 = vunpack.i.h.bf16 %v3118_v14  ;;  %v3119_v5 = vunpack.i.l.bf16 %v3118_v14 }
 0x1bb   :  { %2854 = vmatmul.mubr.msk.f32.vlgmr.msra.gmra.mrb[18].mxu0 %vm264_vm1, %v4236_v20  ;;  %v1544_v20 = vsel %vm264_vm1, %v1026_v15, %v3124_v32  ;;  %v1488_v4 = vsel %vm264_vm1, %v4169_v11, %v3125_v45  ;;  %v1027_v11 = vld [vmem:[#allocation2 + $0x30] sm:$0xff] }
 0x1bc   :  { %v1579_v0 = vsel %vm1522_vm4, %v1561_v55, %v3119_v5  ;;  %v1525_v36 = vsel %vm1522_vm4, %v1506_v9, %v3120_v53  ;;  %1949 = vmatprep.mubr.f32.mxu0 %v5738_v16  ;;  %v3133_v19 = vpop.permute.xlu1 %3132 }
 0x1bd   :  { %v3128_v22 = vpop.permute.xlu0 %3127  ;;  %1782 = vmatprep.mubr.f32.mxu1 %v1579_v0  ;;  %v3135_v48 = vunpack.i.h.bf16 %v3133_v19  ;;  %v3134_v44 = vunpack.i.l.bf16 %v3133_v19 }
 0x1be   :  { %v3130_v41 = vunpack.i.h.bf16 %v3128_v22  ;;  %v3129_v63 = vunpack.i.l.bf16 %v3128_v22  ;;  %1783 = vmatmul.mubr.f32.vlgmr.msra.gmra.mrb[36].mxu1 %v1525_v36 }
 0x1bf   :  { %2855 = vmatmul.mubr.msk.f32.gmra.mrb[20].mxu0 %vm264_vm1, %v4249_v1 }
 0x1c0   :  { %v1562_v57 = vsel %vm1503_vm3, %v1544_v20, %v3129_v63  ;;  %1955 = vmatprep.mubr.f32.mxu0 %v5738_v16  ;;  %v1507_v10 = vsel %vm1503_vm3, %v1488_v4, %v3130_v41  ;;  %v3143_v21 = vpop.permute.xlu1 %3142 }
 0x1c1   :  { %v3138_v30 = vpop.permute.xlu0 %3137  ;;  %v1580_v29 = vsel %vm1522_vm4, %v1562_v57, %v3134_v44  ;;  %v1526_v51 = vsel %vm1522_vm4, %v1507_v10, %v3135_v48  ;;  %v3145_v1 = vunpack.i.h.bf16 %v3143_v21  ;;  %v3144_v53 = vunpack.i.l.bf16 %v3143_v21  ;;  %v1028_v57 = vld [vmem:[#allocation2 + $0x38] sm:$0xff] }
 0x1c2   :  { %v3140_v14 = vunpack.i.h.bf16 %v3138_v30  ;;  %v3139_v52 = vunpack.i.l.bf16 %v3138_v30  ;;  %1788 = vmatprep.mubr.f32.mxu1 %v1580_v29 }
 0x1c3   :  { %1789 = vmatmul.mubr.f32.gmra.mrb[38].mxu1 %v1526_v51  ;;  %2856 = vmatmul.mubr.msk.f32.gmra.mrb[22].mxu0 %vm264_vm1, %v4269_v7 }
 0x1c4   :  { %1961 = vmatprep.mubr.f32.mxu0 %v5738_v16  ;;  %v1545_v5 = vsel %vm264_vm1, %v1027_v11, %v3139_v52  ;;  %v1489_v9 = vsel %vm264_vm1, %v4203_v54, %v3140_v14  ;;  %v3153_v32 = vpop.permute.xlu1 %3152 }
 0x1c5   :  { %v3148_v45 = vpop.permute.xlu0 %3147  ;;  %v3155_v36 = vunpack.i.h.bf16 %v3153_v32  ;;  %v3154_v22 = vunpack.i.l.bf16 %v3153_v32  ;;  %v1563_v19 = vsel %vm1503_vm3, %v1545_v5, %v3144_v53  ;;  %v1508_v7 = vsel %vm1503_vm3, %v1489_v9, %v3145_v1 }
 0x1c6   :  { %v3150_v55 = vunpack.i.h.bf16 %v3148_v45  ;;  %v3149_v0 = vunpack.i.l.bf16 %v3148_v45 }
 0x1c7   :  { %2857 = vmatmul.mubr.msk.f32.gmra.mrb[24].mxu0 %vm264_vm1, %v4282_v42  ;;  %v1546_v42 = vsel %vm264_vm1, %v1028_v57, %v3154_v22  ;;  %v1490_v10 = vsel %vm264_vm1, %v4216_v23, %v3155_v36  ;;  %v1029_v23 = vld [vmem:[#allocation2 + $0x40] sm:$0xff] }
 0x1c8   :  { %v1581_v41 = vsel %vm1522_vm4, %v1563_v19, %v3149_v0  ;;  %v1527_v63 = vsel %vm1522_vm4, %v1508_v7, %v3150_v55  ;;  %1967 = vmatprep.mubr.f32.mxu0 %v5738_v16  ;;  %v3163_v48 = vpop.permute.xlu1 %3162 }
 0x1c9   :  { %v3158_v54 = vpop.permute.xlu0 %3157  ;;  %1794 = vmatprep.mubr.f32.mxu1 %v1581_v41  ;;  %v3165_v20 = vunpack.i.h.bf16 %v3163_v48  ;;  %v3164_v4 = vunpack.i.l.bf16 %v3163_v48 }
 0x1ca   :  { %v3160_v44 = vunpack.i.h.bf16 %v3158_v54  ;;  %v3159_v15 = vunpack.i.l.bf16 %v3158_v54  ;;  %1795 = vmatmul.mubr.f32.gmra.mrb[40].mxu1 %v1527_v63 }
 0x1cb   :  { %2858 = vmatmul.mubr.msk.f32.gmra.mrb[26].mxu0 %vm264_vm1, %v4302_v3 }
 0x1cc   :  { %v1564_v30 = vsel %vm1503_vm3, %v1546_v42, %v3159_v15  ;;  %1973 = vmatprep.mubr.f32.mxu0 %v5738_v16  ;;  %v1509_v21 = vsel %vm1503_vm3, %v1490_v10, %v3160_v44  ;;  %v3173_v51 = vpop.permute.xlu1 %3172 }
 0x1cd   :  { %v3168_v29 = vpop.permute.xlu0 %3167  ;;  %v1582_v14 = vsel %vm1522_vm4, %v1564_v30, %v3164_v4  ;;  %v1528_v52 = vsel %vm1522_vm4, %v1509_v21, %v3165_v20  ;;  %v3175_v3 = vunpack.i.h.bf16 %v3173_v51  ;;  %v3174_v11 = vunpack.i.l.bf16 %v3173_v51  ;;  %v1030_v20 = vld [vmem:[#allocation2 + $0x48] sm:$0xff] }
 0x1ce   :  { %v3170_v1 = vunpack.i.h.bf16 %v3168_v29  ;;  %v3169_v53 = vunpack.i.l.bf16 %v3168_v29  ;;  %1800 = vmatprep.mubr.f32.mxu1 %v1582_v14 }
 0x1cf   :  { %1801 = vmatmul.mubr.f32.gmra.mrb[42].mxu1 %v1528_v52  ;;  %2859 = vmatmul.mubr.msk.f32.gmra.mrb[28].mxu0 %vm264_vm1, %v4315_v46 }
 0x1d0   :  { %1979 = vmatprep.mubr.f32.mxu0 %v5738_v16  ;;  %v1547_v5 = vsel %vm264_vm1, %v1029_v23, %v3169_v53  ;;  %v1491_v9 = vsel %vm264_vm1, %v4232_v28, %v3170_v1  ;;  %v3183_v32 = vpop.permute.xlu1 %3182 }
 0x1d1   :  { %v3178_v45 = vpop.permute.xlu0 %3177  ;;  %v3185_v36 = vunpack.i.h.bf16 %v3183_v32  ;;  %v3184_v22 = vunpack.i.l.bf16 %v3183_v32  ;;  %v1565_v19 = vsel %vm1503_vm3, %v1547_v5, %v3174_v11  ;;  %v1510_v46 = vsel %vm1503_vm3, %v1491_v9, %v3175_v3 }
 0x1d2   :  { %v3180_v55 = vunpack.i.h.bf16 %v3178_v45  ;;  %v3179_v0 = vunpack.i.l.bf16 %v3178_v45 }
 0x1d3   :  { %2860 = vmatmul.mubr.msk.f32.gmra.mrb[30].mxu0 %vm264_vm1, %v4335_v33  ;;  %v1548_v33 = vsel %vm264_vm1, %v1030_v20, %v3184_v22  ;;  %v1492_v4 = vsel %vm264_vm1, %v4247_v59, %v3185_v36  ;;  %v1031_v59 = vld [vmem:[#allocation2 + $0x50] sm:$0xff] }
 0x1d4   :  { %v1583_v7 = vsel %vm1522_vm4, %v1565_v19, %v3179_v0  ;;  %v1529_v41 = vsel %vm1522_vm4, %v1510_v46, %v3180_v55  ;;  %1985 = vmatprep.mubr.f32.mxu0 %v5738_v16  ;;  %v3193_v63 = vpop.permute.xlu1 %3192 }
 0x1d5   :  { %v3188_v28 = vpop.permute.xlu0 %3187  ;;  %1806 = vmatprep.mubr.f32.mxu1 %v1583_v7  ;;  %v3195_v44 = vunpack.i.h.bf16 %v3193_v63  ;;  %v3194_v15 = vunpack.i.l.bf16 %v3193_v63 }
 0x1d6   :  { %v3190_v54 = vunpack.i.h.bf16 %v3188_v28  ;;  %v3189_v48 = vunpack.i.l.bf16 %v3188_v28  ;;  %1807 = vmatmul.mubr.f32.gmra.mrb[44].mxu1 %v1529_v41  ;;  %v1032_v41 = vld [vmem:[#allocation2 + $0x58] sm:$0xff] }
 0x1d7   :  { %2861 = vmatmul.mubr.msk.f32.gmra.mrb[32].mxu0 %vm264_vm1, %v4347_v38 }
 0x1d8   :  { %v1566_v57 = vsel %vm1503_vm3, %v1548_v33, %v3189_v48  ;;  %1991 = vmatprep.mubr.f32.mxu0 %v5738_v16  ;;  %v1511_v42 = vsel %vm1503_vm3, %v1492_v4, %v3190_v54  ;;  %v3203_v30 = vpop.permute.xlu1 %3202 }
 0x1d9   :  { %v3198_v10 = vpop.permute.xlu0 %3197  ;;  %v1584_v21 = vsel %vm1522_vm4, %v1566_v57, %v3194_v15  ;;  %v1530_v29 = vsel %vm1522_vm4, %v1511_v42, %v3195_v44  ;;  %v3205_v38 = vunpack.i.h.bf16 %v3203_v30  ;;  %v3204_v52 = vunpack.i.l.bf16 %v3203_v30 }
 0x1da   :  { %v3200_v51 = vunpack.i.h.bf16 %v3198_v10  ;;  %v3199_v14 = vunpack.i.l.bf16 %v3198_v10  ;;  %1812 = vmatprep.mubr.f32.mxu1 %v1584_v21 }
 0x1db   :  { %1813 = vmatmul.mubr.f32.gmra.mrb[46].mxu1 %v1530_v29  ;;  %2862 = vmatmul.mubr.msk.f32.gmra.mrb[34].mxu0 %vm264_vm1, %v4359_v40 }
 0x1dc   :  { %1997 = vmatprep.mubr.f32.mxu0 %v5738_v16  ;;  %v1549_v1 = vsel %vm264_vm1, %v1031_v59, %v3199_v14  ;;  %v1493_v53 = vsel %vm264_vm1, %v4265_v18, %v3200_v51  ;;  %v3213_v11 = vpop.permute.xlu1 %3212 }
 0x1dd   :  { %v3208_v3 = vpop.permute.xlu0 %3207  ;;  %v3215_v9 = vunpack.i.h.bf16 %v3213_v11  ;;  %v3214_v45 = vunpack.i.l.bf16 %v3213_v11  ;;  %v1567_v32 = vsel %vm1503_vm3, %v1549_v1, %v3204_v52  ;;  %v1512_v40 = vsel %vm1503_vm3, %v1493_v53, %v3205_v38 }
 0x1de   :  { %v3210_v23 = vunpack.i.h.bf16 %v3208_v3  ;;  %v3209_v5 = vunpack.i.l.bf16 %v3208_v3 }
 0x1df   :  { %2863 = vmatmul.mubr.msk.f32.gmra.mrb[36].mxu0 %vm264_vm1, %v4367_v13  ;;  %v1550_v13 = vsel %vm264_vm1, %v1032_v41, %v3214_v45  ;;  %v1494_v28 = vsel %vm264_vm1, %v4280_v60, %v3215_v9  ;;  %v1033_v60 = vld [vmem:[#allocation2 + $0x60] sm:$0xff]  ;;  %v1034_v9 = vld [vmem:[#allocation2 + $0x68] sm:$0xff] }
 0x1e0   :  { %v1585_v55 = vsel %vm1522_vm4, %v1567_v32, %v3209_v5  ;;  %v1531_v0 = vsel %vm1522_vm4, %v1512_v40, %v3210_v23  ;;  %2003 = vmatprep.mubr.f32.mxu0 %v5738_v16  ;;  %v3223_v36 = vpop.permute.xlu1 %3222 }
 0x1e1   :  { %v3218_v18 = vpop.permute.xlu0 %3217  ;;  %1818 = vmatprep.mubr.f32.mxu1 %v1585_v55  ;;  %v3225_v46 = vunpack.i.h.bf16 %v3223_v36  ;;  %v3224_v7 = vunpack.i.l.bf16 %v3223_v36 }
 0x1e2   :  { %v3220_v22 = vunpack.i.h.bf16 %v3218_v18  ;;  %v3219_v19 = vunpack.i.l.bf16 %v3218_v18  ;;  %1819 = vmatmul.mubr.f32.gmra.mrb[48].mxu1 %v1531_v0 }
 0x1e3   :  { %2864 = vmatmul.mubr.msk.f32.gmra.mrb[38].mxu0 %vm264_vm1, %v4377_v39 }
 0x1e4   :  { %v1568_v63 = vsel %vm1503_vm3, %v1550_v13, %v3219_v19  ;;  %2009 = vmatprep.mubr.f32.mxu0 %v5738_v16  ;;  %v1513_v54 = vsel %vm1503_vm3, %v1494_v28, %v3220_v22  ;;  %v3233_v44 = vpop.permute.xlu1 %3232 }
 0x1e5   :  { %v3228_v48 = vpop.permute.xlu0 %3227  ;;  %v1586_v15 = vsel %vm1522_vm4, %v1568_v63, %v3224_v7  ;;  %v1532_v20 = vsel %vm1522_vm4, %v1513_v54, %v3225_v46  ;;  %v3235_v39 = vunpack.i.h.bf16 %v3233_v44  ;;  %v3234_v57 = vunpack.i.l.bf16 %v3233_v44 }
 0x1e6   :  { %v3230_v33 = vunpack.i.h.bf16 %v3228_v48  ;;  %v3229_v4 = vunpack.i.l.bf16 %v3228_v48  ;;  %1824 = vmatprep.mubr.f32.mxu1 %v1586_v15  ;;  %v1065_v48 = vld [vmem:[#allocation2 + $0x95] sm:$0xff] }
 0x1e7   :  { %1825 = vmatmul.mubr.f32.gmra.mrb[50].mxu1 %v1532_v20  ;;  %2865 = vmatmul.mubr.msk.f32.gmra.mrb[40].mxu0 %vm264_vm1, %v4385_v24 }
 0x1e8   :  { %2015 = vmatprep.mubr.f32.mxu0 %v5738_v16  ;;  %v1551_v42 = vsel %vm264_vm1, %v1033_v60, %v3229_v4  ;;  %v1495_v10 = vsel %vm264_vm1, %v4298_v2, %v3230_v33  ;;  %v3243_v21 = vpop.permute.xlu1 %3242 }
 0x1e9   :  { %v3238_v30 = vpop.permute.xlu0 %3237  ;;  %v3245_v14 = vunpack.i.h.bf16 %v3243_v21  ;;  %v3244_v38 = vunpack.i.l.bf16 %v3243_v21  ;;  %v1569_v52 = vsel %vm1503_vm3, %v1551_v42, %v3234_v57  ;;  %v1514_v24 = vsel %vm1503_vm3, %v1495_v10, %v3235_v39  ;;  %v1036_v21 = vld [vmem:[#allocation2 + $0x78] sm:$0xff] }
 0x1ea   :  { %v3240_v29 = vunpack.i.h.bf16 %v3238_v30  ;;  %v3239_v51 = vunpack.i.l.bf16 %v3238_v30  ;;  %v1066_v30 = vld [vmem:[#allocation2 + $0x9d] sm:$0xff] }
 0x1eb   :  { %2866 = vmatmul.mubr.msk.f32.gmra.mrb[42].mxu0 %vm264_vm1, %v4393_v49  ;;  %v1552_v49 = vsel %vm264_vm1, %v1034_v9, %v3244_v38  ;;  %v1496_v45 = vsel %vm264_vm1, %v4313_v58, %v3245_v14  ;;  %v1035_v58 = vld [vmem:[#allocation2 + $0x70] sm:$0xff] }
 0x1ec   :  { %v1587_v59 = vsel %vm1522_vm4, %v1569_v52, %v3239_v51  ;;  %v1533_v1 = vsel %vm1522_vm4, %v1514_v24, %v3240_v29  ;;  %2021 = vmatprep.mubr.f32.mxu0 %v5738_v16  ;;  %v3253_v53 = vpop.permute.xlu1 %3252  ;;  %v1067_v52 = vld [vmem:[#allocation2 + $0xa5] sm:$0xff] }
 0x1ed   :  { %v3248_v2 = vpop.permute.xlu0 %3247  ;;  %1830 = vmatprep.mubr.f32.mxu1 %v1587_v59  ;;  %v3255_v23 = vunpack.i.h.bf16 %v3253_v53  ;;  %v3254_v5 = vunpack.i.l.bf16 %v3253_v53 }
 0x1ee   :  { %v3250_v3 = vunpack.i.h.bf16 %v3248_v2  ;;  %v3249_v11 = vunpack.i.l.bf16 %v3248_v2  ;;  %1831 = vmatmul.mubr.f32.gmra.mrb[52].mxu1 %v1533_v1 }
 0x1ef   :  { %2867 = vmatmul.mubr.msk.f32.gmra.mrb[44].mxu0 %vm264_vm1, %v4398_v35 }
 0x1f0   :  { %v1570_v32 = vsel %vm1503_vm3, %v1552_v49, %v3249_v11  ;;  %2027 = vmatprep.mubr.f32.mxu0 %v5738_v16  ;;  %v1515_v40 = vsel %vm1503_vm3, %v1496_v45, %v3250_v3  ;;  %v3263_v0 = vpop.permute.xlu1 %3262 }
 0x1f1   :  { %v3258_v55 = vpop.permute.xlu0 %3257  ;;  %v1588_v18 = vsel %vm1522_vm4, %v1570_v32, %v3254_v5  ;;  %v1534_v36 = vsel %vm1522_vm4, %v1515_v40, %v3255_v23  ;;  %v3265_v35 = vunpack.i.h.bf16 %v3263_v0  ;;  %v3264_v46 = vunpack.i.l.bf16 %v3263_v0 }
 0x1f2   :  { %v3260_v22 = vunpack.i.h.bf16 %v3258_v55  ;;  %v3259_v19 = vunpack.i.l.bf16 %v3258_v55  ;;  %1836 = vmatprep.mubr.f32.mxu1 %v1588_v18 }
 0x1f3   :  { %1837 = vmatmul.mubr.f32.gmra.mrb[54].mxu1 %v1534_v36  ;;  %2868 = vmatmul.mubr.msk.f32.gmra.mrb[46].mxu0 %vm264_vm1, %v4405_v27 }
 0x1f4   :  { %2033 = vmatprep.mubr.f32.mxu0 %v5738_v16  ;;  %v1553_v7 = vsel %vm264_vm1, %v1035_v58, %v3259_v19  ;;  %v1497_v41 = vsel %vm264_vm1, %v4331_v43, %v3260_v22  ;;  %v3273_v28 = vpop.permute.xlu1 %3272  ;;  %v1038_v58 = vld [vmem:[#allocation2 + $0x88] sm:$0xff] }
 0x1f5   :  { %v3268_v13 = vpop.permute.xlu0 %3267  ;;  %v3275_v44 = vunpack.i.h.bf16 %v3273_v28  ;;  %v3274_v15 = vunpack.i.l.bf16 %v3273_v28  ;;  %v1571_v20 = vsel %vm1503_vm3, %v1553_v7, %v3264_v46  ;;  %v1516_v27 = vsel %vm1503_vm3, %v1497_v41, %v3265_v35 }
 0x1f6   :  { %v3270_v63 = vunpack.i.h.bf16 %v3268_v13  ;;  %v3269_v54 = vunpack.i.l.bf16 %v3268_v13 }
 0x1f7   :  { %2869 = vmatmul.mubr.msk.f32.gmra.mrb[48].mxu0 %vm264_vm1, %v1065_v48  ;;  %v1554_v29 = vsel %vm264_vm1, %v1036_v21, %v3274_v15  ;;  %v1498_v51 = vsel %vm264_vm1, %v4345_v61, %v3275_v44  ;;  %v1037_v61 = vld [vmem:[#allocation2 + $0x80] sm:$0xff] }
 0x1f8   :  { %v1589_v33 = vsel %vm1522_vm4, %v1571_v20, %v3269_v54  ;;  %v1535_v4 = vsel %vm1522_vm4, %v1516_v27, %v3270_v63  ;;  %2039 = vmatprep.mubr.f32.mxu0 %v5738_v16  ;;  %v3283_v39 = vpop.permute.xlu1 %3282 }
 0x1f9   :  { %v3278_v43 = vpop.permute.xlu0 %3277  ;;  %1842 = vmatprep.mubr.f32.mxu1 %v1589_v33  ;;  %v3285_v42 = vunpack.i.h.bf16 %v3283_v39  ;;  %v3284_v10 = vunpack.i.l.bf16 %v3283_v39 }
 0x1fa   :  { %v3280_v57 = vunpack.i.h.bf16 %v3278_v43  ;;  %v3279_v60 = vunpack.i.l.bf16 %v3278_v43  ;;  %1843 = vmatmul.mubr.f32.gmra.mrb[56].mxu1 %v1535_v4 }
 0x1fb   :  { %2870 = vmatmul.mubr.msk.f32.gmra.mrb[50].mxu0 %vm264_vm1, %v1066_v30 }
 0x1fc   :  { %v1572_v14 = vsel %vm1503_vm3, %v1554_v29, %v3279_v60  ;;  %v1517_v38 = vsel %vm1503_vm3, %v1498_v51, %v3280_v57  ;;  %2045 = vmatprep.mubr.f32.mxu0 %v5738_v16  ;;  %v3293_v59 = vpop.permute.xlu1 %3292 }
 0x1fd   :  { %v3288_v24 = vpop.permute.xlu0 %3287  ;;  %v1590_v1 = vsel %vm1522_vm4, %v1572_v14, %v3284_v10  ;;  %v1536_v2 = vsel %vm1522_vm4, %v1517_v38, %v3285_v42  ;;  %v3295_v11 = vunpack.i.h.bf16 %v3293_v59  ;;  %v3294_v23 = vunpack.i.l.bf16 %v3293_v59 }
 0x1fe   :  { %v3290_v53 = vunpack.i.h.bf16 %v3288_v24  ;;  %v3289_v3 = vunpack.i.l.bf16 %v3288_v24  ;;  %1848 = vmatprep.mubr.f32.mxu1 %v1590_v1  ;;  %v4576_v5 = vpop.f32.mrb[0].mxu1 }
 0x1ff   :  { %1849 = vmatmul.mubr.f32.gmra.mrb[58].mxu1 %v1536_v2  ;;  %2871 = vmatmul.mubr.msk.f32.gmra.mrb[52].mxu0 %vm264_vm1, %v1067_v52  ;;  %v4581_v18 = vpop.f32.mrb[1].mxu1  ;;  %v795_v19 = vmul.f32 %v4576_v5, %v4576_v5 }
 0x200   :  { %v1555_v16 = vsel %vm264_vm1, %v1037_v61, %v3289_v3  ;;  %v1499_v9 = vsel %vm264_vm1, %v4357_v62, %v3290_v53  ;;  %v3303_v45 = vpop.permute.xlu1 %3302  ;;  %v796_v7 = vmul.f32 %v4581_v18, %v4581_v18 }
 0x201   :  { %v3298_v49 = vpop.permute.xlu0 %3297  ;;  %v3305_v55 = vunpack.i.h.bf16 %v3303_v45  ;;  %v3304_v0 = vunpack.i.l.bf16 %v3303_v45  ;;  %v1573_v36 = vsel %vm1503_vm3, %v1555_v16, %v3294_v23  ;;  %v1518_v22 = vsel %vm1503_vm3, %v1499_v9, %v3295_v11  ;;  %v1039_v11 = vld [vmem:[#allocation2 + $0x90] sm:$0xff] }
 0x202   :  { %v3300_v32 = vunpack.i.h.bf16 %v3298_v49  ;;  %v3299_v40 = vunpack.i.l.bf16 %v3298_v49  ;;  %v4587_v35 = vpop.f32.mrb[2].mxu1 }
 0x203   :  { %v749_v41 = vadd.f32 %v4587_v35, %v4576_v5  ;;  %v797_v13 = vmul.f32 %v4587_v35, %v4587_v35  ;;  %v1556_v54 = vsel %vm264_vm1, %v1038_v58, %v3304_v0  ;;  %v4598_v20 = vpop.f32.mrb[3].mxu1  ;;  %v1500_v27 = vsel %vm264_vm1, %v4365_v47, %v3305_v55 }
 0x204   :  { %v1591_v46 = vsel %vm1522_vm4, %v1573_v36, %v3299_v40  ;;  %v1537_v62 = vsel %vm1522_vm4, %v1518_v22, %v3300_v32  ;;  %v3313_v63 = vpop.permute.xlu1 %3312  ;;  %v772_v43 = vadd.f32 %v4598_v20, %v4581_v18  ;;  %v798_v39 = vmul.f32 %v4598_v20, %v4598_v20 }
 0x205   :  { %v3308_v28 = vpop.permute.xlu0 %3307  ;;  %1854 = vmatprep.mubr.f32.mxu1 %v1591_v46  ;;  %v3314_v15 = vunpack.i.l.bf16 %v3313_v63  ;;  %v831_v33 = vadd.f32 %v797_v13, %v795_v19  ;;  %v3315_v4 = vunpack.i.h.bf16 %v3313_v63  ;;  %v1040_v63 = vld [vmem:[#allocation2 + $0x98] sm:$0xff] }
 0x206   :  { %v3310_v48 = vunpack.i.h.bf16 %v3308_v28  ;;  %v3309_v44 = vunpack.i.l.bf16 %v3308_v28  ;;  %1855 = vmatmul.mubr.f32.gmra.mrb[60].mxu1 %v1537_v62  ;;  %v4606_v57 = vpop.f32.mrb[4].mxu1  ;;  %v854_v10 = vadd.f32 %v798_v39, %v796_v7 }
 0x207   :  { %v750_v30 = vadd.f32 %v749_v41, %v4606_v57  ;;  %v799_v47 = vmul.f32 %v4606_v57, %v4606_v57  ;;  %v4614_v59 = vpop.f32.mrb[5].mxu1 }
 0x208   :  { %v1574_v60 = vsel %vm1503_vm3, %v1556_v54, %v3309_v44  ;;  %v1519_v42 = vsel %vm1503_vm3, %v1500_v27, %v3310_v48  ;;  %v3323_v29 = vpop.permute.xlu1 %3322  ;;  %v773_v2 = vadd.f32 %v772_v43, %v4614_v59  ;;  %v800_v53 = vmul.f32 %v4614_v59, %v4614_v59 }
 0x209   :  { %v3318_v21 = vpop.permute.xlu0 %3317  ;;  %v1592_v51 = vsel %vm1522_vm4, %v1574_v60, %v3314_v15  ;;  %v3325_v52 = vunpack.i.h.bf16 %v3323_v29  ;;  %v3324_v24 = vunpack.i.l.bf16 %v3323_v29  ;;  %v832_v1 = vadd.f32 %v831_v33, %v799_v47 }
 0x20a   :  { %v3320_v14 = vunpack.i.h.bf16 %v3318_v21  ;;  %v3319_v38 = vunpack.i.l.bf16 %v3318_v21  ;;  %1860 = vmatprep.mubr.f32.mxu1 %v1592_v51  ;;  %v1538_v3 = vsel %vm1522_vm4, %v1519_v42, %v3315_v4  ;;  %v4620_v23 = vpop.f32.mrb[6].mxu1  ;;  %v855_v9 = vadd.f32 %v854_v10, %v800_v53 }
 0x20b   :  { %1861 = vmatmul.mubr.f32.gmra.mrb[62].mxu1 %v1538_v3  ;;  %v751_v49 = vadd.f32 %v750_v30, %v4620_v23  ;;  %v801_v45 = vmul.f32 %v4620_v23, %v4620_v23  ;;  %v4629_v46 = vpop.f32.mrb[7].mxu1 }
 0x20c   :  { %v1557_v61 = vsel %vm264_vm1, %v1039_v11, %v3319_v38  ;;  %v1501_v16 = vsel %vm264_vm1, %v4375_v26, %v3320_v14  ;;  %v3333_v40 = vpop.permute.xlu1 %3332  ;;  %v774_v58 = vadd.f32 %v773_v2, %v4629_v46  ;;  %v802_v26 = vmul.f32 %v4629_v46, %v4629_v46 }
 0x20d   :  { %v3328_v32 = vpop.permute.xlu0 %3327  ;;  %v1575_v55 = vsel %vm1503_vm3, %v1557_v61, %v3324_v24  ;;  %v3335_v22 = vunpack.i.h.bf16 %v3333_v40  ;;  %v3334_v19 = vunpack.i.l.bf16 %v3333_v40  ;;  %v833_v62 = vadd.f32 %v832_v1, %v801_v45 }
 0x20e   :  { %v3330_v0 = vunpack.i.h.bf16 %v3328_v32  ;;  %v3329_v36 = vunpack.i.l.bf16 %v3328_v32  ;;  %v1520_v7 = vsel %vm1503_vm3, %v1501_v16, %v3325_v52  ;;  %v4635_v41 = vpop.f32.mrb[8].mxu1  ;;  %v856_v54 = vadd.f32 %v855_v9, %v802_v26 }
 0x20f   :  { %v752_v48 = vadd.f32 %v751_v49, %v4635_v41  ;;  %v803_v44 = vmul.f32 %v4635_v41, %v4635_v41  ;;  %v1558_v33 = vsel %vm264_vm1, %v1040_v63, %v3334_v19  ;;  %v4643_v42 = vpop.f32.mrb[9].mxu1  ;;  %v1502_v21 = vsel %vm264_vm1, %v4383_v25, %v3335_v22 }
 0x210   :  { %v1593_v13 = vsel %vm1522_vm4, %v1575_v55, %v3329_v36  ;;  %v1539_v28 = vsel %vm1522_vm4, %v1520_v7, %v3330_v0  ;;  %v3343_v27 = vpop.permute.xlu1 %3342  ;;  %v775_v30 = vadd.f32 %v774_v58, %v4643_v42  ;;  %v804_v47 = vmul.f32 %v4643_v42, %v4643_v42 }
 0x211   :  { %v3338_v15 = vpop.permute.xlu0 %3337  ;;  %1866 = vmatprep.mubr.f32.mxu1 %v1593_v13  ;;  %v3345_v39 = vunpack.i.h.bf16 %v3343_v27  ;;  %v3344_v60 = vunpack.i.l.bf16 %v3343_v27  ;;  %v834_v10 = vadd.f32 %v833_v62, %v803_v44 }
 0x212   :  { %v3340_v4 = vunpack.i.h.bf16 %v3338_v15  ;;  %v3339_v43 = vunpack.i.l.bf16 %v3338_v15  ;;  %1867 = vmatmul.mubr.f32.gmra.mrb[64].mxu1 %v1539_v28  ;;  %v4650_v29 = vpop.f32.mrb[10].mxu1  ;;  %v857_v38 = vadd.f32 %v856_v54, %v804_v47 }
 0x213   :  { %v753_v52 = vadd.f32 %v752_v48, %v4650_v29  ;;  %v805_v24 = vmul.f32 %v4650_v29, %v4650_v29  ;;  %v4657_v1 = vpop.f32.mrb[11].mxu1 }
 0x214   :  { %v1576_v51 = vsel %vm1503_vm3, %v1558_v33, %v3339_v43  ;;  %v1521_v14 = vsel %vm1503_vm3, %v1502_v21, %v3340_v4  ;;  %v776_v53 = vadd.f32 %v775_v30, %v4657_v1  ;;  %v806_v25 = vmul.f32 %v4657_v1, %v4657_v1 }
 0x215   :  { %v1594_v2 = vsel %vm1522_vm4, %v1576_v51, %v3344_v60  ;;  %v1540_v3 = vsel %vm1522_vm4, %v1521_v14, %v3345_v39  ;;  %v835_v11 = vadd.f32 %v834_v10, %v805_v24 }
 0x216   :  { %1872 = vmatprep.mubr.f32.mxu1 %v1594_v2  ;;  %v858_v61 = vadd.f32 %v857_v38, %v806_v25  ;;  %v4664_v16 = vpop.f32.mrb[12].mxu1 }
 0x217   :  { %1873 = vmatmul.mubr.f32.gmra.mrb[66].mxu1 %v1540_v3  ;;  %v754_v9 = vadd.f32 %v753_v52, %v4664_v16  ;;  %v807_v49 = vmul.f32 %v4664_v16, %v4664_v16  ;;  %v4669_v45 = vpop.f32.mrb[13].mxu1 }
 0x218   :  { %v777_v32 = vadd.f32 %v776_v53, %v4669_v45  ;;  %v808_v40 = vmul.f32 %v4669_v45, %v4669_v45 }
 0x219   :  { %v836_v55 = vadd.f32 %v835_v11, %v807_v49 }
 0x21a   :  { %v859_v0 = vadd.f32 %v858_v61, %v808_v40  ;;  %v4674_v36 = vpop.f32.mrb[14].mxu1 }
 0x21b   :  { %v755_v22 = vadd.f32 %v754_v9, %v4674_v36  ;;  %v809_v19 = vmul.f32 %v4674_v36, %v4674_v36  ;;  %v4679_v62 = vpop.f32.mrb[15].mxu1 }
 0x21c   :  { %v778_v58 = vadd.f32 %v777_v32, %v4679_v62  ;;  %v810_v26 = vmul.f32 %v4679_v62, %v4679_v62 }
 0x21d   :  { %v837_v7 = vadd.f32 %v836_v55, %v809_v19 }
 0x21e   :  { %v860_v13 = vadd.f32 %v859_v0, %v810_v26  ;;  %v4684_v28 = vpop.f32.mrb[16].mxu1 }
 0x21f   :  { %v756_v63 = vadd.f32 %v755_v22, %v4684_v28  ;;  %v811_v54 = vmul.f32 %v4684_v28, %v4684_v28  ;;  %v4689_v48 = vpop.f32.mrb[17].mxu1 }
 0x220   :  { %v779_v44 = vadd.f32 %v778_v58, %v4689_v48  ;;  %v812_v15 = vmul.f32 %v4689_v48, %v4689_v48 }
 0x221   :  { %v838_v27 = vadd.f32 %v837_v7, %v811_v54 }
 0x222   :  { %v861_v33 = vadd.f32 %v860_v13, %v812_v15  ;;  %v4694_v4 = vpop.f32.mrb[18].mxu1 }
 0x223   :  { %v757_v43 = vadd.f32 %v756_v63, %v4694_v4  ;;  %v813_v39 = vmul.f32 %v4694_v4, %v4694_v4  ;;  %v4699_v60 = vpop.f32.mrb[19].mxu1 }
 0x224   :  { %v780_v10 = vadd.f32 %v779_v44, %v4699_v60  ;;  %v814_v30 = vmul.f32 %v4699_v60, %v4699_v60 }
 0x225   :  { %v839_v47 = vadd.f32 %v838_v27, %v813_v39 }
 0x226   :  { %v862_v21 = vadd.f32 %v861_v33, %v814_v30  ;;  %v4704_v51 = vpop.f32.mrb[20].mxu1 }
 0x227   :  { %v758_v14 = vadd.f32 %v757_v43, %v4704_v51  ;;  %v815_v38 = vmul.f32 %v4704_v51, %v4704_v51  ;;  %v4709_v52 = vpop.f32.mrb[21].mxu1 }
 0x228   :  { %v781_v24 = vadd.f32 %v780_v10, %v4709_v52  ;;  %v816_v2 = vmul.f32 %v4709_v52, %v4709_v52 }
 0x229   :  { %v840_v53 = vadd.f32 %v839_v47, %v815_v38 }
 0x22a   :  { %v863_v25 = vadd.f32 %v862_v21, %v816_v2  ;;  %v4714_v3 = vpop.f32.mrb[22].mxu1 }
 0x22b   :  { %v759_v11 = vadd.f32 %v758_v14, %v4714_v3  ;;  %v817_v61 = vmul.f32 %v4714_v3, %v4714_v3  ;;  %v4719_v9 = vpop.f32.mrb[23].mxu1 }
 0x22c   :  { %v782_v49 = vadd.f32 %v781_v24, %v4719_v9  ;;  %v818_v32 = vmul.f32 %v4719_v9, %v4719_v9 }
 0x22d   :  { %v841_v40 = vadd.f32 %v840_v53, %v817_v61 }
 0x22e   :  { %v864_v55 = vadd.f32 %v863_v25, %v818_v32  ;;  %v4724_v0 = vpop.f32.mrb[24].mxu1 }
 0x22f   :  { %v760_v22 = vadd.f32 %v759_v11, %v4724_v0  ;;  %v819_v19 = vmul.f32 %v4724_v0, %v4724_v0  ;;  %v4729_v58 = vpop.f32.mrb[25].mxu1 }
 0x230   :  { %v783_v26 = vadd.f32 %v782_v49, %v4729_v58  ;;  %v820_v7 = vmul.f32 %v4729_v58, %v4729_v58 }
 0x231   :  { %v842_v13 = vadd.f32 %v841_v40, %v819_v19 }
 0x232   :  { %v865_v63 = vadd.f32 %v864_v55, %v820_v7  ;;  %v4734_v54 = vpop.f32.mrb[26].mxu1 }
 0x233   :  { %v761_v44 = vadd.f32 %v760_v22, %v4734_v54  ;;  %v821_v15 = vmul.f32 %v4734_v54, %v4734_v54  ;;  %v4739_v27 = vpop.f32.mrb[27].mxu1 }
 0x234   :  { %v784_v33 = vadd.f32 %v783_v26, %v4739_v27  ;;  %v822_v43 = vmul.f32 %v4739_v27, %v4739_v27 }
 0x235   :  { %v843_v39 = vadd.f32 %v842_v13, %v821_v15 }
 0x236   :  { %v866_v10 = vadd.f32 %v865_v63, %v822_v43  ;;  %v4744_v30 = vpop.f32.mrb[28].mxu1 }
 0x237   :  { %v762_v47 = vadd.f32 %v761_v44, %v4744_v30  ;;  %v823_v21 = vmul.f32 %v4744_v30, %v4744_v30  ;;  %v4749_v14 = vpop.f32.mrb[29].mxu1 }
 0x238   :  { %v785_v38 = vadd.f32 %v784_v33, %v4749_v14  ;;  %v824_v24 = vmul.f32 %v4749_v14, %v4749_v14 }
 0x239   :  { %v844_v2 = vadd.f32 %v843_v39, %v823_v21 }
 0x23a   :  { %v867_v53 = vadd.f32 %v866_v10, %v824_v24  ;;  %v4754_v25 = vpop.f32.mrb[30].mxu1 }
 0x23b   :  { %v763_v11 = vadd.f32 %v762_v47, %v4754_v25  ;;  %v825_v61 = vmul.f32 %v4754_v25, %v4754_v25  ;;  %v4759_v49 = vpop.f32.mrb[31].mxu1 }
 0x23c   :  { %v786_v32 = vadd.f32 %v785_v38, %v4759_v49  ;;  %v826_v40 = vmul.f32 %v4759_v49, %v4759_v49 }
 0x23d   :  { %v845_v55 = vadd.f32 %v844_v2, %v825_v61 }
 0x23e   :  { %v868_v22 = vadd.f32 %v867_v53, %v826_v40  ;;  %v4764_v19 = vpop.f32.mrb[32].mxu1 }
 0x23f   :  { %v764_v26 = vadd.f32 %v763_v11, %v4764_v19  ;;  %v827_v7 = vmul.f32 %v4764_v19, %v4764_v19  ;;  %v4769_v13 = vpop.f32.mrb[33].mxu1 }
 0x240   :  { %v787_v63 = vadd.f32 %v786_v32, %v4769_v13  ;;  %v828_v44 = vmul.f32 %v4769_v13, %v4769_v13 }
 0x241   :  { %v846_v15 = vadd.f32 %v845_v55, %v827_v7 }
 0x242   :  { %v869_v33 = vadd.f32 %v868_v22, %v828_v44  ;;  %v4774_v43 = vpop.f32.mrb[34].mxu1 }
 0x243   :  { %v765_v39 = vadd.f32 %v764_v26, %v4774_v43  ;;  %v829_v10 = vmul.f32 %v4774_v43, %v4774_v43  ;;  %v4779_v47 = vpop.f32.mrb[35].mxu1 }
 0x244   :  { %v788_v21 = vadd.f32 %v787_v63, %v4779_v47  ;;  %v830_v38 = vmul.f32 %v4779_v47, %v4779_v47 }
 0x245   :  { %v766_v24 = vrot.slane %v765_v39, 4  ;;  %v847_v2 = vadd.f32 %v846_v15, %v829_v10 }
 0x246   :  { %v789_v53 = vrot.slane %v788_v21, 4  ;;  %v870_v11 = vadd.f32 %v869_v33, %v830_v38 }
 0x247   :  { %v767_v61 = vadd.f32 %v766_v24, %v765_v39  ;;  %v848_v32 = vrot.slane %v847_v2, 4 }
 0x248   :  { %v790_v40 = vadd.f32 %v789_v53, %v788_v21  ;;  %v871_v55 = vrot.slane %v870_v11, 4 }
 0x249   :  { %v768_v22 = vrot.slane %v767_v61, 2  ;;  %v849_v26 = vadd.f32 %v848_v32, %v847_v2 }
 0x24a   :  { %v791_v7 = vrot.slane %v790_v40, 2  ;;  %v872_v44 = vadd.f32 %v871_v55, %v870_v11 }
 0x24b   :  { %v769_v6 = vadd.f32 %v768_v22, %v767_v61  ;;  %v850_v12 = vrot.slane %v849_v26, 2 }
 0x24c   :  { %v792_v34 = vadd.f32 %v791_v7, %v790_v40  ;;  %v873_v37 = vrot.slane %v872_v44, 2 }
 0x24d   :  { %v770_v63 = vrot.slane %v769_v6, 1  ;;  %v851_v56 = vadd.f32 %v850_v12, %v849_v26 }
 0x24e   :  { %v793_v50 = vrot.slane %v792_v34, 1  ;;  %v874_v8 = vadd.f32 %v873_v37, %v872_v44 }
 0x24f   :  { %v771_v17 = vadd.f32 %v770_v63, %v769_v6  ;;  %v852_v15 = vrot.slane %v851_v56, 1 }
 0x250   :  { %v794_v10 = vadd.f32 %v793_v50, %v792_v34  ;;  %v875_v33 = vrot.slane %v874_v8, 1  ;;  %v886_v34 = vld [vmem:[%s5627_s6] sm:$0x3] }
 0x251   :  { %v853_v39 = vadd.f32 %v852_v15, %v851_v56  ;;  %v878_v38 = vmul.f32 0.0069444445, %v771_v17  ;;  %v5749_v50 = vld [vmem:[#allocation21_spill] sm:$0xff] }
 0x252   :  { %v876_v21 = vadd.f32 %v875_v33, %v874_v8  ;;  %v879_v24 = vmul.f32 0.0069444445, %v794_v10  ;;  %v4788_v17 = vsub.s32 1, %v5749_v50  ;;  %v3403_v8 = vmov 1966171168   ;;  %v5750_v56 = vld [vmem:[#allocation25_spill] sm:$0xff] }
 0x253   :  { %v880_v53 = vmul.f32 0.0069444445, %v853_v39  ;;  %v882_v2 = vmul.f32 %v878_v38, %v878_v38  ;;  %v913_v37 = vunpack.c.l.s4 %v3403_v8  ;;  %v898_v6 = vrot.slane %v886_v34, %v5750_v56 }
 0x254   :  { %v881_v32 = vmul.f32 0.0069444445, %v876_v21  ;;  %v883_v11 = vmul.f32 %v879_v24, %v879_v24  ;;  %v902_v26 = vrot.slane %v886_v34, %v4788_v17 }
 0x255   :  { %v884_v61 = vsub.f32 %v880_v53, %v882_v2  ;;  %v914_v63 = vunpack.c.0.s8 %v913_v37 }
 0x256   :  { %v885_v55 = vsub.f32 %v881_v32, %v883_v11 }
 0x257   :  { %v888_v40 = vmax.f32 %v884_v61, 0.0  ;;  %v4794_v2 = vsub.s32 %v914_v63, %v5749_v50 }
 0x258   :  { %v889_v22 = vmax.f32 %v885_v55, 0.0 }
 0x259   :  { %v890_v7 = vadd.f32 1e-05, %v888_v40 }
 0x25a   :  { %v891_v12 = vadd.f32 1e-05, %v889_v22 }
 0x25b   :  { %3348 = vrsqrt.f32 %v890_v7 }
 0x25c   :  { %3350 = vrsqrt.f32 %v891_v12 }
 0x265   :  { %v3349_v44 = vpop.eup %3348 }
 0x266   :  { %v3351_v15 = vpop.eup %3350  ;;  %v905_v10 = vmul.f32 %v3349_v44, %v898_v6 }
 0x267   :  { %v906_v33 = vmul.f32 %v3351_v15, %v902_v26 }
 0x268   :  { %v907_v39 = vmul.f32 %v905_v10, %v878_v38  ;;  %v2307_v21 = vrot.slane %v905_v10, %v5750_v56 }
 0x269   :  { %v908_v53 = vmul.f32 %v906_v33, %v879_v24  ;;  %v2508_v32 = vmul.f32 %v906_v33, %v885_v55 }
 0x26a   :  { %v4797_v11 = vmul.f32 %v2307_v21, %v4774_v43  ;;  %v4800_v61 = vmul.f32 %v2307_v21, %v4576_v5  ;;  %v4803_v40 = vmul.f32 %v2307_v21, %v4587_v35  ;;  %v4806_v22 = vmul.f32 %v2307_v21, %v4606_v57 }
 0x26b   :  { %v911_v38 = vcombine.low %v907_v39, %v908_v53  ;;  %v2509_v7 = vmul.f32 %v2508_v32, %v906_v33  ;;  %v4809_v24 = vmul.f32 %v2307_v21, %v4620_v23  ;;  %v4812_v12 = vmul.f32 %v2307_v21, %v4635_v41 }
 0x26c   :  { %5751 = vst [vmem:[#allocation9_spill] sm:$0xff] %v4800_v61  ;;  %5752 = vst [vmem:[#allocation10_spill] sm:$0xff] %v4803_v40  ;;  %v4815_v43 = vmul.f32 %v2307_v21, %v4650_v29  ;;  %v4818_v5 = vmul.f32 %v2307_v21, %v4664_v16  ;;  %v4821_v35 = vmul.f32 %v2307_v21, %v4674_v36  ;;  %v887_v29 = vld [vmem:[%s5628_s7] sm:$0x3] }
 0x26d   :  { %5753 = vst [vmem:[#allocation12_spill] sm:$0xff] %v4806_v22  ;;  %5754 = vst [vmem:[#allocation14_spill] sm:$0xff] %v4809_v24  ;;  %v4824_v57 = vmul.f32 %v2307_v21, %v4684_v28  ;;  %v918_v55 = vrot.slane %v911_v38, %v4794_v2  ;;  %v2510_v34 = vmax.f32 %v2509_v7, 0.0  ;;  %v4828_v23 = vmul.f32 %v2307_v21, %v4694_v4 }
 0x26e   :  { %5755 = vst [vmem:[#allocation15_spill] sm:$0xff] %v4812_v12  ;;  %5756 = vst [vmem:[#allocation17_spill] sm:$0xff] %v4815_v43  ;;  %v4831_v41 = vmul.f32 %v2307_v21, %v4704_v51  ;;  %v4837_v16 = vmul.f32 %v2307_v21, %v4714_v3  ;;  %v4840_v36 = vmul.f32 %v2307_v21, %v4724_v0 }
 0x26f   :  { %5757 = vst [vmem:[#allocation19_spill] sm:$0xff] %v4818_v5  ;;  %5758 = vst [vmem:[#allocation20_spill] sm:$0xff] %v4821_v35  ;;  %v4843_v28 = vmul.f32 %v2307_v21, %v4734_v54  ;;  %v4846_v50 = vmul.f32 %v2307_v21, %v4744_v30  ;;  %v925_v4 = vrot.slane %v918_v55, %v4794_v2  ;;  %v2511_v51 = vadd.f32 1e-05, %v2510_v34  ;;  %v4862_v30 = vld [vmem:[%s5627_s6] sm:$0x3] }
 0x270   :  { %5759 = vst [vmem:[#allocation23_spill] sm:$0xff] %v4824_v57  ;;  %5760 = vst [vmem:[#allocation21_spill] sm:$0xff] %v4828_v23  ;;  %v4850_v8 = vmul.f32 %v2307_v21, %v4754_v25  ;;  %v4853_v37 = vmul.f32 %v2307_v21, %v4764_v19  ;;  %v4869_v19 = vld [vmem:[%s5628_s7] sm:$0x3] }
 0x271   :  { %5761 = vst [vmem:[#allocation25_spill] sm:$0xff] %v4831_v41  ;;  %5762 = vst [vmem:[#allocation32_spill] sm:$0xff] %v4837_v16  ;;  %v4855_v3 = vsub.f32 %v887_v29, %v925_v4  ;;  %3352 = vrsqrt.f32 %v2511_v51  ;;  %v5803_v16 = vld [vmem:[#allocation8_spill] sm:$0xff] }
 0x272   :  { %5763 = vst [vmem:[#allocation33_spill] sm:$0xff] %v4840_v36  ;;  %5764 = vst [vmem:[#allocation34_spill] sm:$0xff] %v4843_v28 }
 0x273   :  { %5765 = vst [vmem:[#allocation35_spill] sm:$0xff] %v4846_v50  ;;  %5766 = vst [vmem:[#allocation36_spill] sm:$0xff] %v4850_v8  ;;  %v2505_v0 = vrot.slane %v4855_v3, %v4788_v17  ;;  %v2517_v25 = vrot.slane %v4855_v3, 1 }
 0x274   :  { %5767 = vst [vmem:[#allocation37_spill] sm:$0xff] %v4853_v37  ;;  %5768 = vst [vmem:[#allocation38_spill] sm:$0xff] %v4855_v3 }
 0x275   :  { %v2507_v54 = vadd.f32 %v2505_v0, %v908_v53  ;;  %5769 = vst [vmem:[#allocation39_spill] sm:$0xff] %v4862_v30  ;;  %5770 = vst [vmem:[#allocation40_spill] sm:$0xff] %v4869_v19 }
 0x27b   :  { %v3353_v6 = vpop.eup %3352 }
 0x27c   :  { %v2513_v26 = vmul.f32 %v3353_v6, %v4862_v30 }
 0x27e   :  { %v2514_v44 = vmul.f32 %v2513_v26, %v2507_v54  ;;  %v2516_v63 = vmul.f32 %v2513_v26, %v906_v33  ;;  %v2519_v15 = vmul.f32 %v2517_v25, %v2513_v26 }
 0x280   :  { %v2515_v10 = vsub.f32 %v4869_v19, %v2514_v44  ;;  %v2553_v39 = vrot.slane %v2516_v63, %v5750_v56 }
 0x282   :  { %v2520_v21 = vadd.f32 %v2519_v15, %v2515_v10  ;;  %v2571_v53 = vmul.f32 %v2553_v39, %v4779_v47  ;;  %v2554_v32 = vmul.f32 %v2553_v39, %v4581_v18  ;;  %v2555_v38 = vmul.f32 %v2553_v39, %v4598_v20 }
 0x283   :  { %v2556_v7 = vmul.f32 %v2553_v39, %v4614_v59  ;;  %v2557_v55 = vmul.f32 %v2553_v39, %v4629_v46  ;;  %v2558_v34 = vmul.f32 %v2553_v39, %v4643_v42  ;;  %v2559_v33 = vmul.f32 %v2553_v39, %v4657_v1 }
 0x284   :  { %v2576_v29 = vrot.slane %v2520_v21, %v5750_v56  ;;  %v2560_v4 = vmul.f32 %v2553_v39, %v4669_v45  ;;  %v2561_v51 = vmul.f32 %v2553_v39, %v4679_v62  ;;  %v2562_v47 = vmul.f32 %v2553_v39, %v4689_v48 }
 0x285   :  { %v2563_v18 = vmul.f32 %v2553_v39, %v4699_v60  ;;  %v2564_v20 = vmul.f32 %v2553_v39, %v4709_v52  ;;  %v2565_v59 = vmul.f32 %v2553_v39, %v4719_v9  ;;  %v2566_v46 = vmul.f32 %v2553_v39, %v4729_v58 }
 0x286   :  { %v4886_v0 = vadd.f32 %v2576_v29, %v2571_v53  ;;  %v2567_v42 = vmul.f32 %v2553_v39, %v4739_v27  ;;  %v2568_v1 = vmul.f32 %v2553_v39, %v4749_v14  ;;  %v2569_v45 = vmul.f32 %v2553_v39, %v4759_v49 }
 0x287   :  { %v2570_v62 = vmul.f32 %v2553_v39, %v4769_v13  ;;  %v4894_v54 = vadd.f32 %v2576_v29, %v2554_v32  ;;  %v4896_v48 = vadd.f32 %v2576_v29, %v2555_v38  ;;  %v4898_v60 = vadd.f32 %v2576_v29, %v2556_v7 }
 0x288   :  { %5771 = vst [vmem:[#allocation41_spill] sm:$0xff] %v4886_v0  ;;  %v4900_v52 = vadd.f32 %v2576_v29, %v2557_v55  ;;  %v4902_v6 = vadd.f32 %v2576_v29, %v2558_v34  ;;  %v4904_v9 = vadd.f32 %v2576_v29, %v2559_v33  ;;  %v4906_v58 = vadd.f32 %v2576_v29, %v2560_v4  ;;  %v5790_v34 = vld [vmem:[#allocation4_spill] sm:$0xff]  ;;  %v5791_v4 = vld [vmem:[#allocation6_spill] sm:$0xff] }
 0x289   :  { %5772 = vst [vmem:[#allocation42_spill] sm:$0xff] %v4894_v54  ;;  %5773 = vst [vmem:[#allocation43_spill] sm:$0xff] %v4896_v48  ;;  %v4908_v27 = vadd.f32 %v2576_v29, %v2561_v51  ;;  %v4910_v14 = vadd.f32 %v2576_v29, %v2562_v47  ;;  %v4912_v49 = vadd.f32 %v2576_v29, %v2563_v18 }
 0x28a   :  { %5774 = vst [vmem:[#allocation44_spill] sm:$0xff] %v4898_v60  ;;  %5775 = vst [vmem:[#allocation45_spill] sm:$0xff] %v4900_v52  ;;  %v4914_v13 = vadd.f32 %v2576_v29, %v2564_v20  ;;  %v4916_v26 = vadd.f32 %v2576_v29, %v2565_v59  ;;  %v4918_v25 = vadd.f32 %v2576_v29, %v2566_v46 }
 0x28b   :  { %5776 = vst [vmem:[#allocation46_spill] sm:$0xff] %v4902_v6  ;;  %5777 = vst [vmem:[#allocation47_spill] sm:$0xff] %v4904_v9  ;;  %v4920_v44 = vadd.f32 %v2576_v29, %v2567_v42  ;;  %v4922_v63 = vadd.f32 %v2576_v29, %v2568_v1  ;;  %v4924_v15 = vadd.f32 %v2576_v29, %v2569_v45 }
 0x28c   :  { %5778 = vst [vmem:[#allocation48_spill] sm:$0xff] %v4906_v58  ;;  %5779 = vst [vmem:[#allocation49_spill] sm:$0xff] %v4908_v27  ;;  %v4926_v10 = vadd.f32 %v2576_v29, %v2570_v62 }
 0x28d   :  { %5780 = vst [vmem:[#allocation50_spill] sm:$0xff] %v4910_v14  ;;  %5781 = vst [vmem:[#allocation51_spill] sm:$0xff] %v4912_v49 }
 0x28e   :  { %5782 = vst [vmem:[#allocation52_spill] sm:$0xff] %v4914_v13  ;;  %5783 = vst [vmem:[#allocation53_spill] sm:$0xff] %v4916_v26  ;;  %v4928_v39 = vpop.f32.mrb[18].mxu0 }
 0x28f   :  { %5784 = vst [vmem:[#allocation54_spill] sm:$0xff] %v4918_v25  ;;  %5785 = vst [vmem:[#allocation55_spill] sm:$0xff] %v4920_v44  ;;  %v4930_v21 = vpop.f32.mrb[19].mxu0  ;;  %v2134_v53 = vmul.f32 %v4928_v39, %v4928_v39  ;;  %v2052_v33 = vmul.f32 %v4928_v39, %v5790_v34 }
 0x290   :  { %5786 = vst [vmem:[#allocation56_spill] sm:$0xff] %v4922_v63  ;;  %5787 = vst [vmem:[#allocation57_spill] sm:$0xff] %v4924_v15  ;;  %v2135_v38 = vmul.f32 %v4930_v21, %v4930_v21  ;;  %v2053_v18 = vmul.f32 %v4930_v21, %v5790_v34 }
 0x291   :  { %5788 = vst [vmem:[#allocation58_spill] sm:$0xff] %v4926_v10  ;;  %5789 = vst [vmem:[#allocation59_spill] sm:$0xff] %v4930_v21  ;;  %v1784_v32 = vpop.f32.mrb[36].mxu1  ;;  %v2170_v46 = vmul.f32 %v2134_v53, %v5790_v34  ;;  %v5802_v21 = vld [vmem:[#allocation5_spill] sm:$0xff] }
 0x292   :  { %v1786_v7 = vpop.f32.mrb[37].mxu1  ;;  %v4936_v55 = vpop.f32.mrb[20].mxu0  ;;  %v2171_v45 = vmul.f32 %v2135_v38, %v5790_v34 }
 0x293   :  { %v2054_v29 = vmul.f32 %v4936_v55, %v5791_v4  ;;  %v2136_v51 = vmul.f32 %v4936_v55, %v4936_v55  ;;  %v4944_v47 = vpop.f32.mrb[21].mxu0 }
 0x294   :  { %5792 = vst [vmem:[#allocation60_spill] sm:$0xff] %v4944_v47  ;;  %v2055_v20 = vmul.f32 %v4944_v47, %v5791_v4  ;;  %v2137_v59 = vmul.f32 %v4944_v47, %v4944_v47 }
 0x295   :  { %v4953_v42 = vadd.f32 %v2054_v29, %v2052_v33  ;;  %v2172_v1 = vmul.f32 %v2136_v51, %v5791_v4 }
 0x296   :  { %v4957_v62 = vadd.f32 %v2055_v20, %v2053_v18  ;;  %v2173_v0 = vmul.f32 %v2137_v59, %v5791_v4  ;;  %v1790_v10 = vpop.f32.mrb[38].mxu1  ;;  %v1957_v15 = vpop.f32.mrb[22].mxu0 }
 0x297   :  { %v4960_v63 = vadd.f32 %v2172_v1, %v2170_v46  ;;  %v4962_v44 = vadd.f32 %v1957_v15, %v1784_v32  ;;  %v1792_v25 = vpop.f32.mrb[39].mxu1  ;;  %v1959_v26 = vpop.f32.mrb[23].mxu0 }
 0x298   :  { %v4964_v13 = vadd.f32 %v2173_v0, %v2171_v45  ;;  %v4966_v53 = vadd.f32 %v1959_v26, %v1786_v7 }
 0x29a   :  { %5793 = vst [vmem:[#allocation61_spill] sm:$0xff] %v4966_v53  ;;  %v1963_v33 = vpop.f32.mrb[24].mxu0 }
 0x29b   :  { %v4968_v29 = vadd.f32 %v1963_v33, %v1790_v10  ;;  %v1965_v38 = vpop.f32.mrb[25].mxu0 }
 0x29c   :  { %v4970_v51 = vadd.f32 %v1965_v38, %v1792_v25 }
 0x29d   :  { %v1796_v18 = vpop.f32.mrb[40].mxu1  ;;  %v2058_v19 = vmul.f32 %v4968_v29, %v5802_v21 }
 0x29e   :  { %5794 = vst [vmem:[#allocation62_spill] sm:$0xff] %v4970_v51  ;;  %v1798_v20 = vpop.f32.mrb[41].mxu1  ;;  %v1969_v59 = vpop.f32.mrb[26].mxu0  ;;  %v2141_v37 = vmul.f32 %v4970_v51, %v4970_v51 }
 0x29f   :  { %v4972_v49 = vadd.f32 %v1969_v59, %v1796_v18  ;;  %v1971_v46 = vpop.f32.mrb[27].mxu0 }
 0x2a0   :  { %v4974_v15 = vadd.f32 %v1971_v46, %v1798_v20 }
 0x2a1   :  { %v2142_v30 = vmul.f32 %v4972_v49, %v4972_v49 }
 0x2a2   :  { %5795 = vst [vmem:[#allocation63_spill] sm:$0xff] %v4974_v15  ;;  %v1802_v32 = vpop.f32.mrb[42].mxu1  ;;  %v1975_v1 = vpop.f32.mrb[28].mxu0 }
 0x2a3   :  { %v4976_v0 = vadd.f32 %v1975_v1, %v1802_v32  ;;  %v1804_v26 = vpop.f32.mrb[43].mxu1  ;;  %v1977_v7 = vpop.f32.mrb[29].mxu0 }
 0x2a4   :  { %v4978_v45 = vadd.f32 %v1977_v7, %v1804_v26 }
 0x2a5   :  { %v2144_v28 = vmul.f32 %v4976_v0, %v4976_v0 }
 0x2a6   :  { %5796 = vst [vmem:[#allocation64_spill] sm:$0xff] %v4978_v45  ;;  %v1981_v10 = vpop.f32.mrb[30].mxu0  ;;  %v2145_v35 = vmul.f32 %v4978_v45, %v4978_v45 }
 0x2a7   :  { %v1983_v33 = vpop.f32.mrb[31].mxu0 }
 0x2a9   :  { %v1808_v25 = vpop.f32.mrb[44].mxu1 }
 0x2aa   :  { %v4980_v38 = vadd.f32 %v1981_v10, %v1808_v25  ;;  %v1810_v14 = vpop.f32.mrb[45].mxu1  ;;  %v1987_v27 = vpop.f32.mrb[32].mxu0 }
 0x2ab   :  { %v4982_v18 = vadd.f32 %v1983_v33, %v1810_v14  ;;  %v1989_v59 = vpop.f32.mrb[33].mxu0 }
 0x2ad   :  { %5797 = vst [vmem:[#allocation65_spill] sm:$0xff] %v4982_v18 }
 0x2ae   :  { %v1814_v20 = vpop.f32.mrb[46].mxu1  ;;  %v1993_v46 = vpop.f32.mrb[34].mxu0 }
 0x2af   :  { %v4984_v58 = vadd.f32 %v1987_v27, %v1814_v20  ;;  %v1816_v32 = vpop.f32.mrb[47].mxu1  ;;  %v1995_v1 = vpop.f32.mrb[35].mxu0 }
 0x2b0   :  { %v4986_v9 = vadd.f32 %v1989_v59, %v1816_v32  ;;  %v2138_v59 = vmul.f32 %v4962_v44, %v4962_v44 }
 0x2b2   :  { %5798 = vst [vmem:[#allocation66_spill] sm:$0xff] %v4986_v9  ;;  %v1999_v26 = vpop.f32.mrb[36].mxu0 }
 0x2b3   :  { %v2001_v7 = vpop.f32.mrb[37].mxu0 }
 0x2b5   :  { %v1820_v6 = vpop.f32.mrb[48].mxu1 }
 0x2b6   :  { %v4988_v52 = vadd.f32 %v1993_v46, %v1820_v6  ;;  %v1822_v10 = vpop.f32.mrb[49].mxu1  ;;  %v2005_v25 = vpop.f32.mrb[38].mxu0  ;;  %v2140_v6 = vmul.f32 %v4968_v29, %v4968_v29 }
 0x2b7   :  { %v4990_v60 = vadd.f32 %v1995_v1, %v1822_v10  ;;  %v2007_v14 = vpop.f32.mrb[39].mxu0  ;;  %v5801_v1 = vld [vmem:[#allocation3_spill] sm:$0xff] }
 0x2b8   :  { %v2056_v10 = vmul.f32 %v4962_v44, %v5801_v1 }
 0x2b9   :  { %5799 = vst [vmem:[#allocation67_spill] sm:$0xff] %v4990_v60 }
 0x2ba   :  { %v1826_v33 = vpop.f32.mrb[50].mxu1  ;;  %v2011_v48 = vpop.f32.mrb[40].mxu0  ;;  %v2089_v50 = vadd.f32 %v4953_v42, %v2056_v10  ;;  %v2146_v42 = vmul.f32 %v4980_v38, %v4980_v38 }
 0x2bb   :  { %v4992_v54 = vadd.f32 %v1999_v26, %v1826_v33  ;;  %v1828_v27 = vpop.f32.mrb[51].mxu1  ;;  %v2013_v20 = vpop.f32.mrb[41].mxu0  ;;  %v2174_v26 = vmul.f32 %v2138_v59, %v5801_v1  ;;  %v2057_v33 = vmul.f32 %v4966_v53, %v5801_v1  ;;  %v2176_v59 = vmul.f32 %v2140_v6, %v5802_v21 }
 0x2bc   :  { %v4994_v47 = vadd.f32 %v2001_v7, %v1828_v27  ;;  %v2139_v7 = vmul.f32 %v4966_v53, %v4966_v53  ;;  %v2060_v6 = vmul.f32 %v4972_v49, %v5803_v16  ;;  %v2090_v41 = vadd.f32 %v2089_v50, %v2058_v19 }
 0x2be   :  { %5800 = vst [vmem:[#allocation68_spill] sm:$0xff] %v4994_v47  ;;  %v4998_v32 = vpop.f32.mrb[42].mxu0  ;;  %v2175_v36 = vmul.f32 %v2139_v7, %v5801_v1 }
 0x2bf   :  { %v5002_v46 = vpop.f32.mrb[43].mxu0 }
 0x2c1   :  { %v1832_v27 = vpop.f32.mrb[52].mxu1 }
 0x2c2   :  { %v5015_v4 = vadd.f32 %v2005_v25, %v1832_v27  ;;  %v1834_v34 = vpop.f32.mrb[53].mxu1  ;;  %v5017_v3 = vpop.f32.mrb[44].mxu0  ;;  %v2207_v25 = vadd.f32 %v4960_v63, %v2174_v26  ;;  %v2112_v27 = vadd.f32 %v4957_v62, %v2057_v33  ;;  %v2177_v62 = vmul.f32 %v2141_v37, %v5802_v21  ;;  %v5804_v26 = vld [vmem:[#allocation7_spill] sm:$0xff] }
 0x2c3   :  { %v5022_v8 = vadd.f32 %v2007_v14, %v1834_v34  ;;  %v5024_v53 = vpop.f32.mrb[45].mxu0  ;;  %v2059_v34 = vmul.f32 %v4970_v51, %v5802_v21  ;;  %v2178_v14 = vmul.f32 %v2142_v30, %v5803_v16  ;;  %v2062_v33 = vmul.f32 %v4976_v0, %v5804_v26 }
 0x2c4   :  { %v2208_v63 = vadd.f32 %v2207_v25, %v2176_v59  ;;  %v2061_v30 = vmul.f32 %v4974_v15, %v5803_v16  ;;  %v2143_v51 = vmul.f32 %v4974_v15, %v4974_v15  ;;  %v2180_v1 = vmul.f32 %v2144_v28, %v5804_v26 }
 0x2c5   :  { %v2230_v37 = vadd.f32 %v4964_v13, %v2175_v36  ;;  %v2091_v59 = vadd.f32 %v2090_v41, %v2060_v6  ;;  %v2148_v25 = vmul.f32 %v4984_v58, %v4984_v58  ;;  %v2182_v15 = vmul.f32 %v2146_v42, %v3864_v31 }
 0x2c6   :  { %v1838_v10 = vpop.f32.mrb[54].mxu1  ;;  %v5039_v23 = vpop.f32.mrb[46].mxu0  ;;  %v2209_v21 = vadd.f32 %v2208_v63, %v2178_v14  ;;  %v2150_v36 = vmul.f32 %v4988_v52, %v4988_v52  ;;  %v2063_v14 = vmul.f32 %v4978_v45, %v5804_v26  ;;  %v2181_v43 = vmul.f32 %v2145_v35, %v5804_v26 }
 0x2c7   :  { %v5044_v7 = vadd.f32 %v2011_v48, %v1838_v10  ;;  %v1840_v50 = vpop.f32.mrb[55].mxu1  ;;  %v5046_v19 = vpop.f32.mrb[47].mxu0  ;;  %v2064_v48 = vmul.f32 %v4980_v38, %v3864_v31  ;;  %v2113_v10 = vadd.f32 %v2112_v27, %v2059_v34  ;;  %v2231_v28 = vadd.f32 %v2230_v37, %v2177_v62  ;;  %v5806_v62 = vld [vmem:[#allocation18_spill] sm:$0xff] }
 0x2c8   :  { %v5053_v57 = vadd.f32 %v2013_v20, %v1840_v50  ;;  %v2092_v20 = vadd.f32 %v2091_v59, %v2062_v33  ;;  %v5805_v50 = vld [vmem:[#allocation11_spill] sm:$0xff]  ;;  %v2179_v27 = vmul.f32 %v2143_v51, %v5803_v16  ;;  %v2210_v34 = vadd.f32 %v2209_v21, %v2180_v1 }
 0x2c9   :  { %v2066_v41 = vmul.f32 %v4984_v58, %v5805_v50  ;;  %v2114_v6 = vadd.f32 %v2113_v10, %v2061_v30  ;;  %v2184_v63 = vmul.f32 %v2148_v25, %v5805_v50  ;;  %v2068_v33 = vmul.f32 %v4988_v52, %v5806_v62  ;;  %v5807_v10 = vld [vmem:[#allocation16_spill] sm:$0xff] }
 0x2ca   :  { %v5063_v5 = vpop.f32.mrb[48].mxu0  ;;  %v2093_v42 = vadd.f32 %v2092_v20, %v2064_v48  ;;  %v2152_v37 = vmul.f32 %v4992_v54, %v4992_v54  ;;  %v2211_v12 = vadd.f32 %v2210_v34, %v2182_v15  ;;  %v2147_v51 = vmul.f32 %v4982_v18, %v4982_v18 }
 0x2cb   :  { %v5069_v13 = vpop.f32.mrb[49].mxu0  ;;  %v2186_v25 = vmul.f32 %v2150_v36, %v5806_v62  ;;  %v2070_v20 = vmul.f32 %v4992_v54, %v5807_v10  ;;  %v2232_v15 = vadd.f32 %v2231_v28, %v2179_v27  ;;  %v2115_v34 = vadd.f32 %v2114_v6, %v2063_v14 }
 0x2cc   :  { %v2094_v48 = vadd.f32 %v2093_v42, %v2066_v41  ;;  %v2212_v26 = vadd.f32 %v2211_v12, %v2184_v63  ;;  %v2149_v41 = vmul.f32 %v4986_v9, %v4986_v9  ;;  %v2188_v42 = vmul.f32 %v2152_v37, %v5807_v10 }
 0x2cd   :  { %v1844_v59 = vpop.f32.mrb[56].mxu1  ;;  %v2233_v16 = vadd.f32 %v2232_v15, %v2181_v43  ;;  %v2156_v6 = vmul.f32 %v5044_v7, %v5044_v7  ;;  %v2067_v12 = vmul.f32 %v4986_v9, %v5805_v50 }
 0x2ce   :  { %v5083_v21 = vadd.f32 %v4998_v32, %v1844_v59  ;;  %v1846_v1 = vpop.f32.mrb[57].mxu1  ;;  %v5085_v30 = vpop.f32.mrb[50].mxu0  ;;  %v2065_v32 = vmul.f32 %v4982_v18, %v3864_v31  ;;  %v2154_v59 = vmul.f32 %v5015_v4, %v5015_v4  ;;  %v2095_v36 = vadd.f32 %v2094_v48, %v2068_v33  ;;  %v5809_v48 = vld [vmem:[#allocation22_spill] sm:$0xff] }
 0x2cf   :  { %v5091_v45 = vadd.f32 %v5002_v46, %v1846_v1  ;;  %v5093_v35 = vpop.f32.mrb[51].mxu0  ;;  %v2183_v46 = vmul.f32 %v2147_v51, %v3864_v31  ;;  %v5808_v1 = vld [vmem:[#allocation24_spill] sm:$0xff]  ;;  %v2213_v63 = vadd.f32 %v2212_v26, %v2186_v25  ;;  %v2074_v15 = vmul.f32 %v5044_v7, %v5809_v48 }
 0x2d0   :  { %v2072_v28 = vmul.f32 %v5015_v4, %v5808_v1  ;;  %v2096_v18 = vadd.f32 %v2095_v36, %v2070_v20  ;;  %v2190_v51 = vmul.f32 %v2154_v59, %v5808_v1  ;;  %v2158_v31 = vmul.f32 %v5083_v21, %v5083_v21  ;;  %v5810_v59 = vld [vmem:[#allocation27_spill] sm:$0xff] }
 0x2d1   :  { %v2116_v9 = vadd.f32 %v2115_v34, %v2065_v32  ;;  %v2185_v26 = vmul.f32 %v2149_v41, %v5805_v50  ;;  %v2214_v25 = vadd.f32 %v2213_v63, %v2188_v42  ;;  %v2192_v36 = vmul.f32 %v2156_v6, %v5809_v48  ;;  %v5811_v42 = vld [vmem:[#allocation26_spill] sm:$0xff] }
 0x2d2   :  { %v1850_v27 = vpop.f32.mrb[58].mxu1  ;;  %v5107_v14 = vpop.f32.mrb[52].mxu0  ;;  %v2097_v20 = vadd.f32 %v2096_v18, %v2072_v28  ;;  %v2234_v40 = vadd.f32 %v2233_v16, %v2183_v46  ;;  %v2153_v34 = vmul.f32 %v4994_v47, %v4994_v47  ;;  %v2194_v18 = vmul.f32 %v2158_v31, %v5810_v59 }
 0x2d3   :  { %v5112_v33 = vadd.f32 %v5017_v3, %v1850_v27  ;;  %v1852_v43 = vpop.f32.mrb[59].mxu1  ;;  %v5114_v37 = vpop.f32.mrb[53].mxu0  ;;  %v2151_v3 = vmul.f32 %v4990_v60, %v4990_v60  ;;  %v2076_v27 = vmul.f32 %v5083_v21, %v5810_v59  ;;  %v2117_v61 = vadd.f32 %v2116_v9, %v2067_v12 }
 0x2d4   :  { %v5122_v24 = vadd.f32 %v5024_v53, %v1852_v43  ;;  %v2069_v53 = vmul.f32 %v4990_v60, %v5806_v62  ;;  %v2215_v32 = vadd.f32 %v2214_v25, %v2190_v51  ;;  %v2098_v41 = vadd.f32 %v2097_v20, %v2074_v15  ;;  %v5813_v60 = vld [vmem:[#allocation29_spill] sm:$0xff] }
 0x2d5   :  { %v2160_v22 = vmul.f32 %v5112_v33, %v5112_v33  ;;  %v2078_v28 = vmul.f32 %v5112_v33, %v5811_v42  ;;  %v2235_v6 = vadd.f32 %v2234_v40, %v2185_v26  ;;  %v2187_v63 = vmul.f32 %v2151_v3, %v5806_v62 }
 0x2d6   :  { %v2071_v16 = vmul.f32 %v4994_v47, %v5807_v10  ;;  %v2155_v9 = vmul.f32 %v5022_v8, %v5022_v8  ;;  %v2216_v12 = vadd.f32 %v2215_v32, %v2192_v36  ;;  %v2099_v43 = vadd.f32 %v2098_v41, %v2076_v27 }
 0x2d7   :  { %v2196_v51 = vmul.f32 %v2160_v22, %v5811_v42  ;;  %v2118_v25 = vadd.f32 %v2117_v61, %v2069_v53  ;;  %v2189_v40 = vmul.f32 %v2153_v34, %v5807_v10  ;;  %v2073_v26 = vmul.f32 %v5022_v8, %v5808_v1 }
 0x2d8   :  { %v2217_v20 = vadd.f32 %v2216_v12, %v2194_v18  ;;  %v2100_v47 = vadd.f32 %v2099_v43, %v2078_v28  ;;  %v2157_v61 = vmul.f32 %v5053_v57, %v5053_v57  ;;  %v2191_v53 = vmul.f32 %v2155_v9, %v5808_v1 }
 0x2d9   :  { %v1856_v46 = vpop.f32.mrb[60].mxu1  ;;  %v2119_v27 = vadd.f32 %v2118_v25, %v2071_v16  ;;  %v2075_v41 = vmul.f32 %v5053_v57, %v5809_v48  ;;  %v2159_v18 = vmul.f32 %v5091_v45, %v5091_v45  ;;  %v2161_v43 = vmul.f32 %v5122_v24, %v5122_v24  ;;  %v5815_v25 = vld [vmem:[#allocation28_spill] sm:$0xff] }
 0x2da   :  { %v5146_v15 = vadd.f32 %v5039_v23, %v1856_v46  ;;  %v1858_v31 = vpop.f32.mrb[61].mxu1  ;;  %v2236_v23 = vadd.f32 %v2235_v6, %v2187_v63  ;;  %v2218_v34 = vadd.f32 %v2217_v20, %v2196_v51  ;;  %v2193_v9 = vmul.f32 %v2157_v61, %v5809_v48 }
 0x2db   :  { %v5152_v3 = vadd.f32 %v5046_v19, %v1858_v31  ;;  %v2120_v12 = vadd.f32 %v2119_v27, %v2073_v26  ;;  %v2195_v20 = vmul.f32 %v2159_v18, %v5810_v59 }
 0x2dc   :  { %v2080_v36 = vmul.f32 %v5146_v15, %v5813_v60  ;;  %v2162_v22 = vmul.f32 %v5146_v15, %v5146_v15  ;;  %v2237_v46 = vadd.f32 %v2236_v23, %v2189_v40 }
 0x2dd   :  { %5812 = vst [vmem:[#allocation11_spill] sm:$0xff] %v5152_v3  ;;  %v2121_v26 = vadd.f32 %v2120_v12, %v2075_v41 }
 0x2de   :  { %v2101_v32 = vadd.f32 %v2100_v47, %v2080_v36  ;;  %v2198_v19 = vmul.f32 %v2162_v22, %v5813_v60  ;;  %v1862_v28 = vpop.f32.mrb[62].mxu1  ;;  %v2077_v47 = vmul.f32 %v5091_v45, %v5810_v59  ;;  %v2238_v31 = vadd.f32 %v2237_v46, %v2191_v53 }
 0x2df   :  { %v5167_v63 = vadd.f32 %v5063_v5, %v1862_v28  ;;  %v1864_v16 = vpop.f32.mrb[63].mxu1  ;;  %v2079_v36 = vmul.f32 %v5122_v24, %v5811_v42  ;;  %v2163_v22 = vmul.f32 %v5152_v3, %v5152_v3  ;;  %v2197_v53 = vmul.f32 %v2161_v43, %v5811_v42  ;;  %v5817_v43 = vld [vmem:[#allocation31_spill] sm:$0xff] }
 0x2e0   :  { %v2219_v6 = vadd.f32 %v2218_v34, %v2198_v19  ;;  %v5175_v51 = vadd.f32 %v5069_v13, %v1864_v16  ;;  %v2239_v27 = vadd.f32 %v2238_v31, %v2193_v9  ;;  %v2122_v61 = vadd.f32 %v2121_v26, %v2077_v47 }
 0x2e1   :  { %v2082_v40 = vmul.f32 %v5167_v63, %v5815_v25  ;;  %v2164_v5 = vmul.f32 %v5167_v63, %v5167_v63  ;;  %v2081_v34 = vmul.f32 %v5152_v3, %v5813_v60  ;;  %v2199_v16 = vmul.f32 %v2163_v22, %v5813_v60 }
 0x2e2   :  { %5814 = vst [vmem:[#allocation18_spill] sm:$0xff] %v5175_v51  ;;  %v2165_v18 = vmul.f32 %v5175_v51, %v5175_v51  ;;  %v2240_v12 = vadd.f32 %v2239_v27, %v2195_v20  ;;  %v2083_v47 = vmul.f32 %v5175_v51, %v5815_v25 }
 0x2e3   :  { %v2102_v23 = vadd.f32 %v2101_v32, %v2082_v40  ;;  %v2200_v13 = vmul.f32 %v2164_v5, %v5815_v25  ;;  %v2123_v32 = vadd.f32 %v2122_v61, %v2079_v36 }
 0x2e4   :  { %v2241_v40 = vadd.f32 %v2240_v12, %v2197_v53  ;;  %v2201_v26 = vmul.f32 %v2165_v18, %v5815_v25  ;;  %v5819_v18 = vld [vmem:[#allocation30_spill] sm:$0xff] }
 0x2e5   :  { %v1868_v19 = vpop.f32.mrb[64].mxu1  ;;  %v2220_v41 = vadd.f32 %v2219_v6, %v2200_v13 }
 0x2e6   :  { %v5193_v28 = vadd.f32 %v5085_v30, %v1868_v19  ;;  %v1870_v46 = vpop.f32.mrb[65].mxu1  ;;  %v2124_v30 = vadd.f32 %v2123_v32, %v2081_v34  ;;  %v2242_v13 = vadd.f32 %v2241_v40, %v2199_v16 }
 0x2e7   :  { %v5197_v9 = vadd.f32 %v5093_v35, %v1870_v46 }
 0x2e8   :  { %v2084_v6 = vmul.f32 %v5193_v28, %v5817_v43  ;;  %v2166_v31 = vmul.f32 %v5193_v28, %v5193_v28  ;;  %v2125_v19 = vadd.f32 %v2124_v30, %v2083_v47  ;;  %v2243_v32 = vadd.f32 %v2242_v13, %v2201_v26 }
 0x2e9   :  { %5816 = vst [vmem:[#allocation16_spill] sm:$0xff] %v5197_v9  ;;  %v2167_v5 = vmul.f32 %v5197_v9, %v5197_v9  ;;  %v2085_v36 = vmul.f32 %v5197_v9, %v5817_v43 }
 0x2ea   :  { %v2103_v20 = vadd.f32 %v2102_v23, %v2084_v6  ;;  %v2202_v35 = vmul.f32 %v2166_v31, %v5817_v43  ;;  %v1874_v22 = vpop.f32.mrb[66].mxu1 }
 0x2eb   :  { %v5212_v27 = vadd.f32 %v5107_v14, %v1874_v22  ;;  %v1876_v61 = vpop.f32.mrb[67].mxu1  ;;  %v2203_v34 = vmul.f32 %v2167_v5, %v5817_v43  ;;  %v2126_v6 = vadd.f32 %v2125_v19, %v2085_v36 }
 0x2ec   :  { %v2221_v53 = vadd.f32 %v2220_v41, %v2202_v35  ;;  %v5216_v46 = vadd.f32 %v5114_v37, %v1876_v61 }
 0x2ed   :  { %v2086_v23 = vmul.f32 %v5212_v27, %v5819_v18  ;;  %v2168_v12 = vmul.f32 %v5212_v27, %v5212_v27  ;;  %v2244_v31 = vadd.f32 %v2243_v32, %v2203_v34 }
 0x2ee   :  { %5818 = vst [vmem:[#allocation24_spill] sm:$0xff] %v5216_v46  ;;  %v2087_v14 = vmul.f32 %v5216_v46, %v5819_v18  ;;  %v2169_v16 = vmul.f32 %v5216_v46, %v5216_v46 }
 0x2ef   :  { %v2104_v41 = vadd.f32 %v2103_v20, %v2086_v23  ;;  %v2204_v47 = vmul.f32 %v2168_v12, %v5819_v18 }
 0x2f0   :  { %v2127_v37 = vadd.f32 %v2126_v6, %v2087_v14  ;;  %v2205_v40 = vmul.f32 %v2169_v16, %v5819_v18 }
 0x2f1   :  { %v2105_v30 = vrot.slane %v2104_v41, 4  ;;  %v2222_v5 = vadd.f32 %v2221_v53, %v2204_v47 }
 0x2f2   :  { %v2128_v35 = vrot.slane %v2127_v37, 4  ;;  %v2245_v22 = vadd.f32 %v2244_v31, %v2205_v40 }
 0x2f3   :  { %v2106_v61 = vadd.f32 %v2105_v30, %v2104_v41  ;;  %v2223_v26 = vrot.slane %v2222_v5, 4 }
 0x2f4   :  { %v2129_v36 = vadd.f32 %v2128_v35, %v2127_v37  ;;  %v2246_v13 = vrot.slane %v2245_v22, 4 }
 0x2f5   :  { %v2107_v19 = vrot.slane %v2106_v61, 2  ;;  %v2224_v9 = vadd.f32 %v2223_v26, %v2222_v5 }
 0x2f6   :  { %v2130_v51 = vrot.slane %v2129_v36, 2  ;;  %v2247_v3 = vadd.f32 %v2246_v13, %v2245_v22 }
 0x2f7   :  { %v2108_v46 = vadd.f32 %v2107_v19, %v2106_v61  ;;  %v2225_v20 = vrot.slane %v2224_v9, 2 }
 0x2f8   :  { %v2131_v23 = vadd.f32 %v2130_v51, %v2129_v36  ;;  %v2248_v12 = vrot.slane %v2247_v3, 2 }
 0x2f9   :  { %v2109_v34 = vrot.slane %v2108_v46, 1  ;;  %v2226_v32 = vadd.f32 %v2225_v20, %v2224_v9 }
 0x2fa   :  { %v2132_v6 = vrot.slane %v2131_v23, 1  ;;  %v2249_v14 = vadd.f32 %v2248_v12, %v2247_v3 }
 0x2fb   :  { %v2110_v16 = vadd.f32 %v2109_v34, %v2108_v46  ;;  %v2227_v53 = vrot.slane %v2226_v32, 1  ;;  %v5234_v46 = vld [vmem:[%s5629_s8] sm:$0x3] }
 0x2fc   :  { %v2133_v47 = vadd.f32 %v2132_v6, %v2131_v23  ;;  %v2250_v31 = vrot.slane %v2249_v14, 1  ;;  %v2272_v19 = vrot.slane %v5234_v46, %v5750_v56  ;;  %v2276_v20 = vrot.slane %v5234_v46, %v4788_v17 }
 0x2fd   :  { %v2228_v41 = vadd.f32 %v2227_v53, %v2226_v32  ;;  %v2252_v40 = vmul.f32 0.01, %v2110_v16 }
 0x2fe   :  { %v2251_v37 = vadd.f32 %v2250_v31, %v2249_v14  ;;  %v2253_v30 = vmul.f32 0.01, %v2133_v47 }
 0x2ff   :  { %v2254_v35 = vmul.f32 0.01, %v2228_v41  ;;  %v2256_v5 = vmul.f32 %v2252_v40, %v2252_v40 }
 0x300   :  { %v2255_v26 = vmul.f32 0.01, %v2251_v37  ;;  %v2257_v22 = vmul.f32 %v2253_v30, %v2253_v30 }
 0x301   :  { %v2258_v61 = vsub.f32 %v2254_v35, %v2256_v5 }
 0x302   :  { %v5228_v13 = vsub.f32 %v2255_v26, %v2257_v22 }
 0x303   :  { %v2262_v51 = vmax.f32 %v2258_v61, 0.0 }
 0x304   :  { %v2263_v9 = vmax.f32 %v5228_v13, 0.0 }
 0x305   :  { %v2264_v36 = vadd.f32 1e-05, %v2262_v51 }
 0x306   :  { %v2265_v3 = vadd.f32 1e-05, %v2263_v9  ;;  %v5822_v9 = vld [vmem:[#allocation12_spill] sm:$0xff] }
 0x307   :  { %3354 = vrsqrt.f32 %v2264_v36 }
 0x308   :  { %3356 = vrsqrt.f32 %v2265_v3  ;;  %v5823_v3 = vld [vmem:[#allocation14_spill] sm:$0xff] }
 0x311   :  { %v3355_v23 = vpop.eup %3354 }
 0x312   :  { %v3357_v12 = vpop.eup %3356  ;;  %v2279_v34 = vmul.f32 %v3355_v23, %v2272_v19  ;;  %v5825_v23 = vld [vmem:[#allocation17_spill] sm:$0xff] }
 0x313   :  { %v5240_v32 = vmul.f32 %v3357_v12, %v2276_v20  ;;  %v5824_v20 = vld [vmem:[#allocation15_spill] sm:$0xff] }
 0x314   :  { %v2281_v6 = vmul.f32 %v2279_v34, %v2252_v40  ;;  %v2329_v14 = vrot.slane %v2279_v34, %v5750_v56 }
 0x315   :  { %v2282_v16 = vmul.f32 %v5240_v32, %v2253_v30 }
 0x316   :  { %v2347_v53 = vmul.f32 %v2329_v14, %v5212_v27  ;;  %v2330_v47 = vmul.f32 %v2329_v14, %v4928_v39  ;;  %v2331_v31 = vmul.f32 %v2329_v14, %v4936_v55  ;;  %v2332_v41 = vmul.f32 %v2329_v14, %v4962_v44 }
 0x317   :  { %v2285_v37 = vcombine.low %v2281_v6, %v2282_v16  ;;  %v2333_v35 = vmul.f32 %v2329_v14, %v4968_v29  ;;  %v2334_v5 = vmul.f32 %v2329_v14, %v4972_v49  ;;  %v2335_v26 = vmul.f32 %v2329_v14, %v4976_v0  ;;  %v5262_v49 = vld [vmem:[%s5630_s9] sm:$0x3] }
 0x318   :  { %v2365_v40 = vadd.f32 %v2347_v53, %v4797_v11  ;;  %v2336_v22 = vmul.f32 %v2329_v14, %v4980_v38  ;;  %v2337_v30 = vmul.f32 %v2329_v14, %v4984_v58  ;;  %v2338_v27 = vmul.f32 %v2329_v14, %v4988_v52 }
 0x319   :  { %v2292_v39 = vrot.slane %v2285_v37, %v4794_v2  ;;  %v2339_v55 = vmul.f32 %v2329_v14, %v4992_v54  ;;  %v2340_v44 = vmul.f32 %v2329_v14, %v5015_v4  ;;  %v2341_v29 = vmul.f32 %v2329_v14, %v5044_v7  ;;  %v5820_v4 = vld [vmem:[#allocation9_spill] sm:$0xff]  ;;  %v5821_v7 = vld [vmem:[#allocation10_spill] sm:$0xff] }
 0x31a   :  { %v2342_v11 = vmul.f32 %v2329_v14, %v5083_v21  ;;  %v2343_v0 = vmul.f32 %v2329_v14, %v5112_v33  ;;  %v2344_v58 = vmul.f32 %v2329_v14, %v5146_v15  ;;  %v2345_v52 = vmul.f32 %v2329_v14, %v5167_v63  ;;  %v5826_v63 = vld [vmem:[#allocation19_spill] sm:$0xff] }
 0x31b   :  { %v2299_v38 = vrot.slane %v2292_v39, %v4794_v2  ;;  %v2346_v54 = vmul.f32 %v2329_v14, %v5193_v28  ;;  %v2348_v61 = vadd.f32 %v2330_v47, %v5820_v4  ;;  %v2349_v51 = vadd.f32 %v2331_v31, %v5821_v7  ;;  %v5827_v2 = vld [vmem:[#allocation20_spill] sm:$0xff]  ;;  %v5828_v28 = vld [vmem:[#allocation23_spill] sm:$0xff]  ;;  %v5829_v14 = vld [vmem:[#allocation21_spill] sm:$0xff] }
 0x31c   :  { %v2350_v36 = vadd.f32 %v2332_v41, %v5822_v9  ;;  %v2351_v19 = vadd.f32 %v2333_v35, %v5823_v3  ;;  %v2352_v21 = vadd.f32 %v2334_v5, %v5824_v20  ;;  %v2353_v33 = vadd.f32 %v2335_v26, %v5825_v23  ;;  %v5830_v47 = vld [vmem:[#allocation25_spill] sm:$0xff]  ;;  %v5831_v41 = vld [vmem:[#allocation32_spill] sm:$0xff]  ;;  %v5833_v5 = vld [vmem:[#allocation34_spill] sm:$0xff] }
 0x31d   :  { %v5277_v15 = vsub.f32 %v5262_v49, %v2299_v38  ;;  %v2354_v12 = vadd.f32 %v2336_v22, %v5826_v63  ;;  %v2355_v34 = vadd.f32 %v2337_v30, %v5827_v2  ;;  %v2356_v6 = vadd.f32 %v2338_v27, %v5828_v28  ;;  %v5832_v35 = vld [vmem:[#allocation33_spill] sm:$0xff]  ;;  %v5834_v26 = vld [vmem:[#allocation35_spill] sm:$0xff]  ;;  %v5835_v38 = vld [vmem:[#allocation36_spill] sm:$0xff] }
 0x31e   :  { %v2357_v53 = vadd.f32 %v2339_v55, %v5829_v14  ;;  %v2358_v31 = vadd.f32 %v2340_v44, %v5830_v47  ;;  %v2359_v37 = vadd.f32 %v2341_v29, %v5831_v41  ;;  %v2360_v39 = vadd.f32 %v2342_v11, %v5832_v35  ;;  %v5836_v3 = vld [vmem:[#allocation37_spill] sm:$0xff]  ;;  %v5837_v20 = vld [vmem:[#allocation38_spill] sm:$0xff]  ;;  %v5842_v28 = vld [vmem:[#allocation4_spill] sm:$0xff] }
 0x31f   :  { %v2361_v4 = vadd.f32 %v2343_v0, %v5833_v5  ;;  %v2362_v7 = vadd.f32 %v2344_v58, %v5834_v26  ;;  %v2363_v9 = vadd.f32 %v2345_v52, %v5835_v38  ;;  %v2364_v22 = vadd.f32 %v2346_v54, %v5836_v3  ;;  %v5843_v14 = vld [vmem:[#allocation6_spill] sm:$0xff] }
 0x320   :  { %v2366_v30 = vadd.f32 %v5277_v15, %v5837_v20  ;;  %v2525_v27 = vrot.slane %v5277_v15, %v4788_v17  ;;  %v2528_v47 = vmul.f32 %v5240_v32, %v5228_v13 }
 0x322   :  { %v2371_v55 = vrot.slane %v2366_v30, %v5750_v56  ;;  %v5295_v44 = vadd.f32 %v2525_v27, %v2282_v16  ;;  %v2529_v35 = vmul.f32 %v2528_v47, %v5240_v32 }
 0x324   :  { %v5297_v29 = vadd.f32 %v2371_v55, %v2348_v61  ;;  %v5299_v11 = vadd.f32 %v2371_v55, %v2349_v51  ;;  %v5301_v0 = vadd.f32 %v2371_v55, %v2350_v36  ;;  %v5303_v58 = vadd.f32 %v2371_v55, %v2351_v19 }
 0x325   :  { %v5305_v52 = vadd.f32 %v2371_v55, %v2352_v21  ;;  %v5307_v54 = vadd.f32 %v2371_v55, %v2353_v33  ;;  %v5309_v23 = vadd.f32 %v2371_v55, %v2354_v12  ;;  %v5311_v63 = vadd.f32 %v2371_v55, %v2355_v34 }
 0x326   :  { %v5313_v2 = vadd.f32 %v2371_v55, %v2356_v6  ;;  %v5315_v16 = vadd.f32 %v2371_v55, %v2357_v53  ;;  %v5317_v61 = vadd.f32 %v2371_v55, %v2358_v31  ;;  %v5319_v51 = vadd.f32 %v2371_v55, %v2359_v37  ;;  %v5844_v31 = vld [vmem:[#allocation3_spill] sm:$0xff] }
 0x327   :  { %5838 = vst [vmem:[#allocation22_spill] sm:$0xff] %v5305_v52  ;;  %5839 = vst [vmem:[#allocation27_spill] sm:$0xff] %v5307_v54  ;;  %v5321_v36 = vadd.f32 %v2371_v55, %v2360_v39  ;;  %v5323_v19 = vadd.f32 %v2371_v55, %v2361_v4  ;;  %v5325_v21 = vadd.f32 %v2371_v55, %v2362_v7  ;;  %v5845_v39 = vld [vmem:[#allocation5_spill] sm:$0xff]  ;;  %v5846_v7 = vld [vmem:[#allocation8_spill] sm:$0xff] }
 0x328   :  { %5840 = vst [vmem:[#allocation26_spill] sm:$0xff] %v5309_v23  ;;  %5841 = vst [vmem:[#allocation29_spill] sm:$0xff] %v5311_v63  ;;  %v5327_v33 = vadd.f32 %v2371_v55, %v2363_v9  ;;  %v5329_v12 = vadd.f32 %v2371_v55, %v2364_v22  ;;  %v5331_v34 = vadd.f32 %v2371_v55, %v2365_v40  ;;  %v5847_v9 = vld [vmem:[#allocation7_spill] sm:$0xff]  ;;  %v2530_v22 = vmax.f32 %v2529_v35, 0.0 }
 0x329   :  { %v2391_v6 = vmul.f32 %v5297_v29, %v5842_v28  ;;  %v2392_v53 = vmul.f32 %v5299_v11, %v5843_v14  ;;  %v2393_v41 = vmul.f32 %v5301_v0, %v5844_v31  ;;  %v2394_v5 = vmul.f32 %v5303_v58, %v5845_v39 }
 0x32a   :  { %v2432_v4 = vmul.f32 %v5297_v29, %v5297_v29  ;;  %v2433_v26 = vmul.f32 %v5299_v11, %v5299_v11  ;;  %v2395_v38 = vmul.f32 %v5305_v52, %v5846_v7  ;;  %v2396_v3 = vmul.f32 %v5307_v54, %v5847_v9 }
 0x32b   :  { %v2409_v37 = vadd.f32 %v2392_v53, %v2391_v6  ;;  %v2434_v30 = vmul.f32 %v5301_v0, %v5301_v0  ;;  %v5848_v6 = vld [vmem:[#allocation13_spill] sm:$0xff]  ;;  %v2436_v35 = vmul.f32 %v5305_v52, %v5305_v52 }
 0x32c   :  { %v2450_v27 = vmul.f32 %v2432_v4, %v5842_v28  ;;  %v2451_v55 = vmul.f32 %v2433_v26, %v5843_v14  ;;  %v2397_v53 = vmul.f32 %v5309_v23, %v5848_v6  ;;  %v2531_v28 = vadd.f32 1e-05, %v2530_v22 }
 0x32d   :  { %v2410_v40 = vadd.f32 %v2409_v37, %v2393_v41  ;;  %v2435_v41 = vmul.f32 %v5303_v58, %v5303_v58  ;;  %v2398_v37 = vmul.f32 %v5311_v63, %v5805_v50  ;;  %v2399_v14 = vmul.f32 %v5313_v2, %v5806_v62 }
 0x32e   :  { %v2437_v4 = vmul.f32 %v5307_v54, %v5307_v54  ;;  %3358 = vrsqrt.f32 %v2531_v28  ;;  %v2454_v22 = vmul.f32 %v2436_v35, %v5846_v7  ;;  %v2440_v7 = vmul.f32 %v5313_v2, %v5313_v2 }
 0x32f   :  { %v2411_v13 = vadd.f32 %v2410_v40, %v2394_v5  ;;  %v2452_v40 = vmul.f32 %v2434_v30, %v5844_v31  ;;  %v2438_v31 = vmul.f32 %v5309_v23, %v5309_v23 }
 0x331   :  { %v2412_v20 = vadd.f32 %v2411_v13, %v2395_v38  ;;  %v2468_v38 = vadd.f32 %v2451_v55, %v2450_v27  ;;  %v2453_v13 = vmul.f32 %v2435_v41, %v5845_v39  ;;  %v2401_v27 = vmul.f32 %v5317_v61, %v5808_v1  ;;  %v5849_v41 = vld [vmem:[#allocation39_spill] sm:$0xff] }
 0x332   :  { %v2455_v39 = vmul.f32 %v2437_v4, %v5847_v9  ;;  %v2456_v35 = vmul.f32 %v2438_v31, %v5848_v6  ;;  %v2404_v9 = vmul.f32 %v5323_v19, %v5811_v42  ;;  %v2405_v6 = vmul.f32 %v5325_v21, %v5813_v60 }
 0x333   :  { %v2413_v47 = vadd.f32 %v2412_v20, %v2396_v3  ;;  %v2469_v3 = vadd.f32 %v2468_v38, %v2452_v40  ;;  %v2400_v20 = vmul.f32 %v5315_v16, %v5807_v10  ;;  %v2407_v31 = vmul.f32 %v5329_v12, %v5817_v43 }
 0x335   :  { %v2414_v5 = vadd.f32 %v2413_v47, %v2397_v53  ;;  %v2470_v30 = vadd.f32 %v2469_v3, %v2453_v13  ;;  %v2439_v53 = vmul.f32 %v5311_v63, %v5311_v63 }
 0x337   :  { %v2415_v26 = vadd.f32 %v2414_v5, %v2398_v37  ;;  %v2471_v47 = vadd.f32 %v2470_v30, %v2454_v22  ;;  %v2537_v37 = vrot.slane %v5849_v41, %v4788_v17  ;;  %v2402_v5 = vmul.f32 %v5319_v51, %v5809_v48 }
 0x338   :  { %v2546_v17 = vrot.slane %v5277_v15, 1  ;;  %v2457_v13 = vmul.f32 %v2439_v53, %v5805_v50  ;;  %v2408_v22 = vmul.f32 %v5331_v34, %v5819_v18  ;;  %v3359_v15 = vpop.eup %3358  ;;  %v2458_v50 = vmul.f32 %v2440_v7, %v5806_v62 }
 0x339   :  { %v2416_v52 = vadd.f32 %v2415_v26, %v2399_v14  ;;  %v2472_v38 = vadd.f32 %v2471_v47, %v2455_v39  ;;  %v2403_v14 = vmul.f32 %v5321_v36, %v5810_v59  ;;  %v2441_v26 = vmul.f32 %v5315_v16, %v5315_v16 }
 0x33a   :  { %v2443_v53 = vmul.f32 %v5319_v51, %v5319_v51  ;;  %v2444_v39 = vmul.f32 %v5321_v36, %v5321_v36  ;;  %v2445_v47 = vmul.f32 %v5323_v19, %v5323_v19  ;;  %v2539_v41 = vmul.f32 %v3359_v15, %v2537_v37 }
 0x33b   :  { %v2417_v55 = vadd.f32 %v2416_v52, %v2400_v20  ;;  %v5850_v52 = vld [vmem:[#allocation40_spill] sm:$0xff]  ;;  %v2473_v3 = vadd.f32 %v2472_v38, %v2456_v35  ;;  %v2406_v20 = vmul.f32 %v5327_v33, %v5815_v25  ;;  %v2459_v35 = vmul.f32 %v2441_v26, %v5807_v10 }
 0x33c   :  { %v2542_v28 = vrot.slane %v5850_v52, 1  ;;  %v2447_v62 = vmul.f32 %v5327_v33, %v5327_v33  ;;  %v2540_v7 = vmul.f32 %v2539_v41, %v5295_v44  ;;  %v2545_v52 = vmul.f32 %v2539_v41, %v5240_v32 }
 0x33d   :  { %v2418_v40 = vadd.f32 %v2417_v55, %v2401_v27  ;;  %v2442_v27 = vmul.f32 %v5317_v61, %v5317_v61  ;;  %v2474_v55 = vadd.f32 %v2473_v3, %v2457_v13  ;;  %v2448_v13 = vmul.f32 %v5329_v12, %v5329_v12 }
 0x33e   :  { %v2449_v3 = vmul.f32 %v5331_v34, %v5331_v34  ;;  %v2461_v10 = vmul.f32 %v2443_v53, %v5809_v48  ;;  %v2544_v26 = vsub.f32 %v2542_v28, %v2540_v7  ;;  %v2599_v15 = vrot.slane %v2545_v52, %v5750_v56  ;;  %v5853_v53 = vld [vmem:[#allocation61_spill] sm:$0xff]  ;;  %v5856_v7 = vld [vmem:[#allocation64_spill] sm:$0xff] }
 0x33f   :  { %v2419_v4 = vadd.f32 %v2418_v40, %v2402_v5  ;;  %v2446_v40 = vmul.f32 %v5325_v21, %v5325_v21  ;;  %v2475_v38 = vadd.f32 %v2474_v55, %v2458_v50  ;;  %v2460_v37 = vmul.f32 %v2442_v27, %v5808_v1  ;;  %v5851_v55 = vld [vmem:[#allocation59_spill] sm:$0xff]  ;;  %v5852_v27 = vld [vmem:[#allocation60_spill] sm:$0xff] }
 0x340   :  { %v2462_v44 = vmul.f32 %v2444_v39, %v5810_v59  ;;  %v2463_v32 = vmul.f32 %v2445_v47, %v5811_v42  ;;  %v2600_v1 = vmul.f32 %v2599_v15, %v5851_v55  ;;  %v2466_v48 = vmul.f32 %v2448_v13, %v5817_v43  ;;  %v5854_v39 = vld [vmem:[#allocation62_spill] sm:$0xff]  ;;  %v5855_v47 = vld [vmem:[#allocation63_spill] sm:$0xff]  ;;  %v5860_v43 = vld [vmem:[#allocation68_spill] sm:$0xff] }
 0x341   :  { %v2420_v30 = vadd.f32 %v2419_v4, %v2403_v14  ;;  %v2548_v14 = vmul.f32 %v2546_v17, %v2539_v41  ;;  %v2601_v41 = vmul.f32 %v2599_v15, %v5852_v27  ;;  %v2602_v59 = vmul.f32 %v2599_v15, %v5853_v53  ;;  %v5863_v53 = vld [vmem:[#allocation16_spill] sm:$0xff] }
 0x342   :  { %v2603_v42 = vmul.f32 %v2599_v15, %v5854_v39  ;;  %v2605_v52 = vmul.f32 %v2599_v15, %v5856_v7  ;;  %v2609_v13 = vmul.f32 %v2599_v15, %v5860_v43  ;;  %v2616_v39 = vmul.f32 %v2599_v15, %v5863_v53 }
 0x343   :  { %v2421_v5 = vadd.f32 %v2420_v30, %v2404_v9  ;;  %v2476_v9 = vadd.f32 %v2475_v38, %v2459_v35  ;;  %v2549_v50 = vadd.f32 %v2548_v14, %v2544_v26  ;;  %v2465_v35 = vmul.f32 %v2447_v62, %v5815_v25  ;;  %v5857_v14 = vld [vmem:[#allocation65_spill] sm:$0xff]  ;;  %v5859_v25 = vld [vmem:[#allocation67_spill] sm:$0xff] }
 0x344   :  { %v2604_v38 = vmul.f32 %v2599_v15, %v5855_v47  ;;  %v2608_v62 = vmul.f32 %v2599_v15, %v5859_v25  ;;  %v2612_v26 = vmul.f32 %v2599_v15, %v5091_v45  ;;  %v5864_v47 = vld [vmem:[#allocation24_spill] sm:$0xff] }
 0x345   :  { %v2422_v4 = vadd.f32 %v2421_v5, %v2405_v6  ;;  %v2477_v17 = vadd.f32 %v2476_v9, %v2460_v37  ;;  %v2464_v6 = vmul.f32 %v2446_v40, %v5813_v60  ;;  %v2622_v27 = vrot.slane %v2549_v50, %v5750_v56 }
 0x347   :  { %v2423_v30 = vadd.f32 %v2422_v4, %v2406_v20  ;;  %v2478_v28 = vadd.f32 %v2477_v17, %v2461_v10  ;;  %v2467_v20 = vmul.f32 %v2449_v3, %v5819_v18  ;;  %v2606_v4 = vmul.f32 %v2599_v15, %v5857_v14  ;;  %v5862_v17 = vld [vmem:[#allocation18_spill] sm:$0xff] }
 0x348   :  { %v2610_v18 = vmul.f32 %v2599_v15, %v5022_v8  ;;  %v2611_v10 = vmul.f32 %v2599_v15, %v5053_v57  ;;  %v2615_v55 = vmul.f32 %v2599_v15, %v5862_v17  ;;  %v2617_v8 = vmul.f32 %v2599_v15, %v5864_v47  ;;  %v5865_v47 = vld [vmem:[#allocation42_spill] sm:$0xff] }
 0x349   :  { %v2424_v5 = vadd.f32 %v2423_v30, %v2407_v31  ;;  %v2479_v40 = vadd.f32 %v2478_v28, %v2462_v44  ;;  %v5858_v31 = vld [vmem:[#allocation66_spill] sm:$0xff]  ;;  %v5861_v30 = vld [vmem:[#allocation11_spill] sm:$0xff]  ;;  %v2624_v7 = vadd.f32 %v2622_v27, %v2600_v1  ;;  %v2627_v57 = vadd.f32 %v2622_v27, %v2603_v42 }
 0x34a   :  { %v2607_v37 = vmul.f32 %v2599_v15, %v5858_v31  ;;  %v2614_v44 = vmul.f32 %v2599_v15, %v5861_v30  ;;  %v2628_v31 = vadd.f32 %v2622_v27, %v2604_v38  ;;  %v2630_v25 = vadd.f32 %v2622_v27, %v2606_v4  ;;  %v5866_v38 = vld [vmem:[#allocation43_spill] sm:$0xff]  ;;  %v5867_v4 = vld [vmem:[#allocation44_spill] sm:$0xff] }
 0x34b   :  { %v2425_v60 = vadd.f32 %v2424_v5, %v2408_v22  ;;  %v2480_v3 = vadd.f32 %v2479_v40, %v2463_v32  ;;  %v2613_v22 = vmul.f32 %v2599_v15, %v5122_v24  ;;  %v2625_v32 = vadd.f32 %v2622_v27, %v2601_v41 }
 0x34c   :  { %v2626_v40 = vadd.f32 %v2622_v27, %v2602_v59  ;;  %v2629_v24 = vadd.f32 %v2622_v27, %v2605_v52  ;;  %v2631_v43 = vadd.f32 %v2622_v27, %v2607_v37  ;;  %v2632_v30 = vadd.f32 %v2622_v27, %v2608_v62  ;;  %v5868_v62 = vld [vmem:[#allocation45_spill] sm:$0xff] }
 0x34d   :  { %v2426_v9 = vrot.slane %v2425_v60, 4  ;;  %v2481_v28 = vadd.f32 %v2480_v3, %v2464_v6  ;;  %v2633_v17 = vadd.f32 %v2622_v27, %v2609_v13  ;;  %v2635_v6 = vadd.f32 %v2622_v27, %v2611_v10  ;;  %v5870_v10 = vld [vmem:[#allocation47_spill] sm:$0xff] }
 0x34e   :  { %v2637_v3 = vadd.f32 %v2622_v27, %v2613_v22  ;;  %v2638_v53 = vadd.f32 %v2622_v27, %v2614_v44  ;;  %v2639_v15 = vadd.f32 %v2622_v27, %v2615_v55  ;;  %v2640_v59 = vadd.f32 %v2622_v27, %v2616_v39  ;;  %v5871_v22 = vld [vmem:[#allocation48_spill] sm:$0xff]  ;;  %v5874_v39 = vld [vmem:[#allocation51_spill] sm:$0xff] }
 0x34f   :  { %v2427_v5 = vadd.f32 %v2426_v9, %v2425_v60  ;;  %v2482_v45 = vadd.f32 %v2481_v28, %v2465_v35  ;;  %v2634_v60 = vadd.f32 %v2622_v27, %v2610_v18  ;;  %v2636_v9 = vadd.f32 %v2622_v27, %v2612_v26 }
 0x350   :  { %v2641_v42 = vadd.f32 %v2622_v27, %v2617_v8  ;;  %v2642_v35 = vmul.f32 %v2624_v7, %v5865_v47  ;;  %v2643_v52 = vmul.f32 %v2625_v32, %v5866_v38  ;;  %v2644_v37 = vmul.f32 %v2626_v40, %v5867_v4  ;;  %v5873_v27 = vld [vmem:[#allocation50_spill] sm:$0xff]  ;;  %v5875_v40 = vld [vmem:[#allocation52_spill] sm:$0xff]  ;;  %v5880_v47 = vld [vmem:[#allocation57_spill] sm:$0xff] }
 0x351   :  { %v2428_v14 = vrot.slane %v2427_v5, 2  ;;  %v2483_v50 = vadd.f32 %v2482_v45, %v2466_v48  ;;  %v2645_v13 = vmul.f32 %v2627_v57, %v5868_v62  ;;  %v5869_v48 = vld [vmem:[#allocation46_spill] sm:$0xff]  ;;  %v5458_v26 = vmul.f32 %v2629_v24, %v5870_v10 }
 0x352   :  { %v2646_v18 = vmul.f32 %v2628_v31, %v5869_v48  ;;  %v5461_v44 = vmul.f32 %v2630_v25, %v5871_v22  ;;  %v5467_v28 = vmul.f32 %v2632_v30, %v5873_v27  ;;  %v5470_v8 = vmul.f32 %v2633_v17, %v5874_v39  ;;  %v5877_v31 = vld [vmem:[#allocation54_spill] sm:$0xff]  ;;  %v5878_v25 = vld [vmem:[#allocation55_spill] sm:$0xff] }
 0x353   :  { %v2429_v63 = vadd.f32 %v2428_v14, %v2427_v5  ;;  %v2484_v41 = vadd.f32 %v2483_v50, %v2467_v20  ;;  %v5872_v20 = vld [vmem:[#allocation49_spill] sm:$0xff]  ;;  %v5473_v57 = vmul.f32 %v2634_v60, %v5875_v40  ;;  %v5479_v24 = vmul.f32 %v2636_v9, %v5877_v31  ;;  %v5879_v50 = vld [vmem:[#allocation56_spill] sm:$0xff] }
 0x354   :  { %v5464_v55 = vmul.f32 %v2631_v43, %v5872_v20  ;;  %v5876_v14 = vld [vmem:[#allocation53_spill] sm:$0xff]  ;;  %v5482_v43 = vmul.f32 %v2637_v3, %v5878_v25  ;;  %v5485_v30 = vmul.f32 %v2638_v53, %v5879_v50  ;;  %v5488_v17 = vmul.f32 %v2639_v15, %v5880_v47 }
 0x355   :  { %v2430_v1 = vrot.slane %v2429_v63, 1  ;;  %v2485_v5 = vrot.slane %v2484_v41, 4  ;;  %v5476_v45 = vmul.f32 %v2635_v6, %v5876_v14  ;;  %v5882_v60 = vld [vmem:[#allocation41_spill] sm:$0xff]  ;;  %3360 = vrcp.f32 %v2642_v35 }
 0x356   :  { %v5494_v38 = vmul.f32 %v2641_v42, %v5882_v60  ;;  %3362 = vrcp.f32 %v2643_v52 }
 0x357   :  { %v2431_v7 = vadd.f32 %v2430_v1, %v2429_v63  ;;  %v2486_v32 = vadd.f32 %v2485_v5, %v2484_v41  ;;  %v5881_v1 = vld [vmem:[#allocation58_spill] sm:$0xff]  ;;  %3364 = vrcp.f32 %v2644_v37 }
 0x358   :  { %v5491_v41 = vmul.f32 %v2640_v59, %v5881_v1  ;;  %3366 = vrcp.f32 %v2645_v13 }
 0x359   :  { %v2487_v63 = vrot.slane %v2486_v32, 2  ;;  %v5496_v9 = vmul.f32 0.01, %v2431_v7  ;;  %3368 = vrcp.f32 %v2646_v18 }
 0x35a   :  { %3370 = vrcp.f32 %v5458_v26 }
 0x35b   :  { %v2488_v6 = vadd.f32 %v2487_v63, %v2486_v32  ;;  %v2493_v15 = vmul.f32 %v5496_v9, %v5496_v9  ;;  %3372 = vrcp.f32 %v5461_v44 }
 0x35c   :  { %3374 = vrcp.f32 %v5464_v55 }
 0x35d   :  { %v2489_v3 = vrot.slane %v2488_v6, 1  ;;  %3376 = vrcp.f32 %v5467_v28 }
 0x35e   :  { %3378 = vrcp.f32 %v5470_v8 }
 0x35f   :  { %v2490_v53 = vadd.f32 %v2489_v3, %v2488_v6  ;;  %v3361_v4 = vpop.eup %3360  ;;  %3380 = vrcp.f32 %v5473_v57 }
 0x360   :  { %v3363_v62 = vpop.eup %3362  ;;  %3382 = vrcp.f32 %v5476_v45  ;;  %v2678_v39 = vmul.f32 %v3361_v4, %v2642_v35 }
 0x361   :  { %v2492_v59 = vmul.f32 0.01, %v2490_v53  ;;  %v3365_v48 = vpop.eup %3364  ;;  %3384 = vrcp.f32 %v5479_v24  ;;  %v2679_v7 = vmul.f32 %v3363_v62, %v2643_v52 }
 0x362   :  { %v3367_v10 = vpop.eup %3366  ;;  %3386 = vrcp.f32 %v5482_v43  ;;  %v2680_v32 = vmul.f32 %v3365_v48, %v2644_v37  ;;  %v2696_v63 = vsub.f32 2.0, %v2678_v39 }
 0x363   :  { %v2494_v42 = vsub.f32 %v2492_v59, %v2493_v15  ;;  %v3369_v20 = vpop.eup %3368  ;;  %3388 = vrcp.f32 %v5485_v30  ;;  %v2681_v14 = vmul.f32 %v3367_v10, %v2645_v13  ;;  %v2697_v1 = vsub.f32 2.0, %v2679_v7 }
 0x364   :  { %v3371_v27 = vpop.eup %3370  ;;  %v2682_v25 = vmul.f32 %v3369_v20, %v2646_v18  ;;  %v2698_v60 = vsub.f32 2.0, %v2680_v32 }
 0x365   :  { %v2495_v5 = vmax.f32 %v2494_v42, 0.0  ;;  %v3373_v40 = vpop.eup %3372  ;;  %v2683_v35 = vmul.f32 %v3371_v27, %v5458_v26  ;;  %v2699_v37 = vsub.f32 2.0, %v2681_v14  ;;  %v5521_v26 = vmul.f32 %v3361_v4, %v2696_v63 }
 0x366   :  { %v3375_v31 = vpop.eup %3374  ;;  %v2684_v52 = vmul.f32 %v3373_v40, %v5461_v44  ;;  %v2700_v15 = vsub.f32 2.0, %v2682_v25  ;;  %v5523_v44 = vmul.f32 %v3363_v62, %v2697_v1  ;;  %v5525_v7 = vmul.f32 %v3365_v48, %v2698_v60 }
 0x367   :  { %v2496_v22 = vadd.f32 1e-05, %v2495_v5  ;;  %v3377_v50 = vpop.eup %3376  ;;  %v2685_v13 = vmul.f32 %v3375_v31, %v5464_v55  ;;  %v2701_v32 = vsub.f32 2.0, %v2683_v35  ;;  %v5528_v25 = vmul.f32 %v3367_v10, %v2699_v37 }
 0x368   :  { %v3379_v47 = vpop.eup %3378  ;;  %v2686_v53 = vmul.f32 %v3377_v50, %v5467_v28  ;;  %v2702_v14 = vsub.f32 2.0, %v2684_v52  ;;  %v5531_v54 = vmul.f32 %v3369_v20, %v2700_v15 }
 0x369   :  { %3390 = vrsqrt.f32 %v2496_v22  ;;  %v3381_v6 = vpop.eup %3380  ;;  %v2687_v59 = vmul.f32 %v3379_v47, %v5470_v8 }
 0x36a   :  { %3392 = vrcp.f32 %v5488_v17  ;;  %v3383_v3 = vpop.eup %3382  ;;  %v2688_v42 = vmul.f32 %v3381_v6, %v5473_v57  ;;  %v2704_v23 = vsub.f32 2.0, %v2686_v53  ;;  %5883 = vst [vmem:[#allocation28_spill] sm:$0xff] %v5531_v54  ;;  %v2720_v15 = vmul.f32 %v3373_v40, %v2702_v14  ;;  %v5886_v14 = vld [vmem:[#allocation26_spill] sm:$0xff] }
 0x36b   :  { %3394 = vrcp.f32 %v5491_v41  ;;  %v3385_v18 = vpop.eup %3384  ;;  %v2689_v5 = vmul.f32 %v3383_v3, %v5476_v45  ;;  %v2703_v45 = vsub.f32 2.0, %v2685_v13  ;;  %v2705_v62 = vsub.f32 2.0, %v2687_v59 }
 0x36c   :  { %3396 = vrcp.f32 %v5494_v38  ;;  %v3387_v22 = vpop.eup %3386  ;;  %v2690_v39 = vmul.f32 %v3385_v18, %v5479_v24  ;;  %v2706_v48 = vsub.f32 2.0, %v2688_v42  ;;  %v2719_v13 = vmul.f32 %v3371_v27, %v2701_v32 }
 0x36d   :  { %v3389_v55 = vpop.eup %3388  ;;  %v2691_v28 = vmul.f32 %v3387_v22, %v5482_v43  ;;  %v2707_v63 = vsub.f32 2.0, %v2689_v5  ;;  %v2721_v59 = vmul.f32 %v3375_v31, %v2703_v45  ;;  %v2722_v42 = vmul.f32 %v3377_v50, %v2704_v23  ;;  %v5887_v45 = vld [vmem:[#allocation29_spill] sm:$0xff] }
 0x36e   :  { %v2692_v57 = vmul.f32 %v3389_v55, %v5485_v30  ;;  %v2708_v60 = vsub.f32 2.0, %v2690_v39  ;;  %v2723_v5 = vmul.f32 %v3379_v47, %v2705_v62 }
 0x36f   :  { %v2709_v35 = vsub.f32 2.0, %v2691_v28 }
 0x370   :  { %v2710_v10 = vsub.f32 2.0, %v2692_v57  ;;  %v2726_v28 = vmul.f32 %v3385_v18, %v2708_v60 }
 0x371   :  { %v2727_v57 = vmul.f32 %v3387_v22, %v2709_v35 }
 0x372   :  { %v5540_v54 = vmul.f32 %v3389_v55, %v2710_v10  ;;  %v5885_v55 = vld [vmem:[#allocation27_spill] sm:$0xff] }
 0x373   :  { %v3391_v8 = vpop.eup %3390 }
 0x374   :  { %v3393_v24 = vpop.eup %3392  ;;  %v2498_v4 = vmul.f32 %v3391_v8, %v5234_v46  ;;  %v2724_v8 = vmul.f32 %v3381_v6, %v2706_v48 }
 0x375   :  { %v3395_v1 = vpop.eup %3394  ;;  %v2693_v43 = vmul.f32 %v3393_v24, %v5488_v17  ;;  %v2725_v17 = vmul.f32 %v3383_v3, %v2707_v63 }
 0x376   :  { %v3397_v52 = vpop.eup %3396  ;;  %v2499_v37 = vmul.f32 %v2498_v4, %v5496_v9  ;;  %v2694_v30 = vmul.f32 %v3395_v1, %v5491_v41  ;;  %v2735_v20 = vrot.slane %v2498_v4, %v5750_v56 }
 0x377   :  { %v2695_v53 = vmul.f32 %v3397_v52, %v5494_v38  ;;  %v2711_v46 = vsub.f32 2.0, %v2693_v43 }
 0x378   :  { %v2500_v39 = vsub.f32 %v5262_v49, %v2499_v37  ;;  %v2712_v9 = vsub.f32 2.0, %v2694_v30  ;;  %v2736_v27 = vmul.f32 %v2735_v20, %v5297_v29  ;;  %v2737_v32 = vmul.f32 %v2735_v20, %v5299_v11 }
 0x379   :  { %v2713_v41 = vsub.f32 2.0, %v2695_v53  ;;  %v2729_v38 = vmul.f32 %v3393_v24, %v2711_v46  ;;  %v2738_v40 = vmul.f32 %v2735_v20, %v5301_v0  ;;  %v2744_v23 = vmul.f32 %v2735_v20, %v5313_v2 }
 0x37a   :  { %v2745_v31 = vmul.f32 %v2735_v20, %v5315_v16  ;;  %v2746_v50 = vmul.f32 %v2735_v20, %v5317_v61  ;;  %v2747_v49 = vmul.f32 %v2735_v20, %v5319_v51  ;;  %v2748_v47 = vmul.f32 %v2735_v20, %v5321_v36  ;;  %v5884_v16 = vld [vmem:[#allocation22_spill] sm:$0xff] }
 0x37b   :  { %v2749_v6 = vmul.f32 %v2735_v20, %v5323_v19  ;;  %v2750_v3 = vmul.f32 %v2735_v20, %v5325_v21  ;;  %v2751_v29 = vmul.f32 %v2735_v20, %v5327_v33  ;;  %v2752_v11 = vmul.f32 %v2735_v20, %v5329_v12 }
 0x37c   :  { %v2753_v0 = vmul.f32 %v2735_v20, %v5331_v34  ;;  %v2730_v18 = vmul.f32 %v3395_v1, %v2712_v9  ;;  %v2739_v2 = vmul.f32 %v2735_v20, %v5303_v58  ;;  %v2740_v22 = vmul.f32 %v2735_v20, %v5884_v16  ;;  %v5888_v9 = vld [vmem:[#allocation28_spill] sm:$0xff] }
 0x37d   :  { %v2758_v61 = vrot.slane %v2500_v39, %v5750_v56  ;;  %v2731_v51 = vmul.f32 %v3397_v52, %v2713_v41  ;;  %v2741_v36 = vmul.f32 %v2735_v20, %v5885_v55  ;;  %v2742_v19 = vmul.f32 %v2735_v20, %v5886_v14 }
 0x37e   :  { %v2743_v21 = vmul.f32 %v2735_v20, %v5887_v45 }
 0x37f   :  { %v2760_v24 = vadd.f32 %v2758_v61, %v2736_v27  ;;  %v2761_v33 = vadd.f32 %v2758_v61, %v2737_v32  ;;  %v2762_v4 = vadd.f32 %v2758_v61, %v2738_v40  ;;  %v2763_v12 = vadd.f32 %v2758_v61, %v2739_v2 }
 0x380   :  { %v2764_v62 = vadd.f32 %v2758_v61, %v2740_v22  ;;  %v2765_v34 = vadd.f32 %v2758_v61, %v2741_v36  ;;  %v2766_v48 = vadd.f32 %v2758_v61, %v2742_v19  ;;  %v2767_v63 = vadd.f32 %v2758_v61, %v2743_v21 }
 0x381   :  { %v2768_v58 = vadd.f32 %v2758_v61, %v2744_v23  ;;  %v2769_v1 = vadd.f32 %v2758_v61, %v2745_v31  ;;  %v2770_v43 = vadd.f32 %v2758_v61, %v2746_v50  ;;  %v2771_v60 = vadd.f32 %v2758_v61, %v2747_v49 }
 0x382   :  { %v2772_v56 = vadd.f32 %v2758_v61, %v2748_v47  ;;  %v2773_v35 = vadd.f32 %v2758_v61, %v2749_v6  ;;  %v2774_v10 = vadd.f32 %v2758_v61, %v2750_v3  ;;  %v2775_v52 = vadd.f32 %v2758_v61, %v2751_v29 }
 0x383   :  { %v2776_v37 = vadd.f32 %v2758_v61, %v2752_v11  ;;  %v2777_v30 = vadd.f32 %v2758_v61, %v2753_v0  ;;  %v2778_v20 = vmul.f32 %v2760_v24, %v5521_v26  ;;  %v2779_v53 = vmul.f32 %v2761_v33, %v5523_v44 }
 0x384   :  { %v2780_v46 = vmul.f32 %v2762_v4, %v5525_v7  ;;  %v2781_v39 = vmul.f32 %v2763_v12, %v5528_v25  ;;  %v2782_v41 = vmul.f32 %v2764_v62, %v5888_v9  ;;  %v2783_v27 = vmul.f32 %v2765_v34, %v2719_v13 }
 0x385   :  { %v2784_v32 = vmul.f32 %v2766_v48, %v2720_v15  ;;  %v2785_v40 = vmul.f32 %v2767_v63, %v2721_v59  ;;  %v2786_v23 = vmul.f32 %v2768_v58, %v2722_v42  ;;  %v2787_v31 = vmul.f32 %v2769_v1, %v2723_v5  ;;  %2796 = vst [vmem:[%s5631_s10] sm:$0xff] %v2778_v20 }
 0x386   :  { %2797 = vst [vmem:[%s5631_s10 + $0x8] sm:$0xff] %v2779_v53  ;;  %v2788_v26 = vmul.f32 %v2770_v43, %v2724_v8  ;;  %v2789_v44 = vmul.f32 %v2771_v60, %v2725_v17  ;;  %v2790_v7 = vmul.f32 %v2772_v56, %v2726_v28  ;;  %v2791_v50 = vmul.f32 %v2773_v35, %v2727_v57 }
 0x387   :  { %2798 = vst [vmem:[%s5631_s10 + $0x10] sm:$0xff] %v2780_v46  ;;  %2799 = vst [vmem:[%s5631_s10 + $0x18] sm:$0xff] %v2781_v39  ;;  %v2792_v25 = vmul.f32 %v2774_v10, %v5540_v54  ;;  %v2793_v13 = vmul.f32 %v2775_v52, %v2729_v38  ;;  %v2794_v15 = vmul.f32 %v2776_v37, %v2730_v18 }
 0x388   :  { %2800 = vst [vmem:[%s5631_s10 + $0x20] sm:$0xff] %v2782_v41  ;;  %2801 = vst [vmem:[%s5631_s10 + $0x28] sm:$0xff] %v2783_v27  ;;  %v2795_v59 = vmul.f32 %v2777_v30, %v2731_v51 }
 0x389   :  { %2802 = vst [vmem:[%s5631_s10 + $0x30] sm:$0xff] %v2784_v32  ;;  %2803 = vst [vmem:[%s5631_s10 + $0x38] sm:$0xff] %v2785_v40 }
 0x38a   :  { %2804 = vst [vmem:[%s5631_s10 + $0x40] sm:$0xff] %v2786_v23  ;;  %2805 = vst [vmem:[%s5631_s10 + $0x48] sm:$0xff] %v2787_v31 }
 0x38b   :  { %2806 = vst [vmem:[%s5631_s10 + $0x50] sm:$0xff] %v2788_v26  ;;  %2807 = vst [vmem:[%s5631_s10 + $0x58] sm:$0xff] %v2789_v44 }
 0x38c   :  { %2808 = vst [vmem:[%s5631_s10 + $0x60] sm:$0xff] %v2790_v7  ;;  %2809 = vst [vmem:[%s5631_s10 + $0x68] sm:$0xff] %v2791_v50 }
 0x38d   :  { %2810 = vst [vmem:[%s5631_s10 + $0x70] sm:$0xff] %v2792_v25  ;;  %2811 = vst [vmem:[%s5631_s10 + $0x78] sm:$0xff] %v2793_v13 }
 0x38e   :  { %2812 = vst [vmem:[%s5631_s10 + $0x80] sm:$0xff] %v2794_v15  ;;  %2813 = vst [vmem:[%s5631_s10 + $0x88] sm:$0xff] %v2795_v59 }

</bundles_post_ra>
